<compile_context>
chip_gen: v5e
topology: v5e:2x2
jax: 0.10.0
libtpu: 0.0.40
codegen_flags: <defaults>
</compile_context>

<pallas_src>
import functools

import jax
import jax.numpy as jnp
import numpy as np
from jax.experimental import pallas as pl
from jax.experimental.pallas import tpu as pltpu

CARDINALITY = 32          # BottleneckX.cardinality
EXPANSION = 2             # BottleneckX.expansion (unused in forward)
BN_EPS = 1e-5


# ----------------------------------------------------------------------------
# Pallas kernel
# ----------------------------------------------------------------------------
def _bottleneckx_kernel(*refs, width, rpad, residual_is_x):
    if residual_is_x:
        x_ref, m_ref, w1_ref, w2_ref, w3_ref, b_ref, out_ref, t_sc, acc = refs
        res_ref = x_ref                       # default residual == x (no extra DMA)
    else:
        (x_ref, res_ref, m_ref, w1_ref, w2_ref, w3_ref, b_ref,
         out_ref, t_sc, acc) = refs

    TM = x_ref.shape[0]                       # rows in this grid step
    Cb = w1_ref.shape[1]                      # bottleneck channels (== Cout)

    # ---- conv1 (1x1) + bn1 + relu : one MXU matmul over all TM rows --------
    t = jnp.dot(x_ref[...].astype(jnp.bfloat16), w1_ref[...],
                preferred_element_type=jnp.float32)
    t = jnp.maximum(t + b_ref[0:1, :], 0.0)                   # (TM, Cb) f32

    # bf16 staging scratch: only the two halo row-bands (which absorb the
    # +/-(W+1) row-shifted tap reads) are re-zeroed each step -- cheap, and
    # safe with megacore grid sharding; the interior store is lane-dense and
    # sublane-aligned (rpad, TM multiples of 16/8 in practice).
    t_sc[0:rpad, :] = jnp.zeros((rpad, Cb), jnp.bfloat16)
    t_sc[rpad + TM:rpad + TM + rpad, :] = jnp.zeros((rpad, Cb), jnp.bfloat16)
    t_sc[rpad:rpad + TM, :] = t.astype(jnp.bfloat16)

    # ---- conv2 (grouped 3x3) + bn2 on the MXU -------------------------------
    # 9 matmuls against dense block-diagonal per-tap weights; each tap reads a
    # row-shifted window of the scratch and is masked (per-row broadcast) where
    # the shifted source pixel falls outside the image (PyTorch zero padding).
    for tap in range(9):
        dy, dx = tap // 3 - 1, tap % 3 - 1
        k = dy * width + dx                    # row shift in flattened order
        win = t_sc[rpad + k:rpad + k + TM, :]                 # (TM, Cb) bf16
        part = jnp.dot(win, w2_ref[tap], preferred_element_type=jnp.float32)
        if dy != 0 or dx != 0:
            part = part * m_ref[:, tap:tap + 1]               # boundary mask
        if tap == 0:
            acc[...] = part
        else:
            acc[...] = acc[...] + part

    # bn2 bias + relu; reuse the scratch interior as bf16 LHS staging for conv3
    t_sc[rpad:rpad + TM, :] = jnp.maximum(
        acc[...] + b_ref[1:2, :], 0.0).astype(jnp.bfloat16)

    # ---- conv3 (1x1) + bn3 + residual (f32) + relu : one MXU matmul ---------
    o = jnp.dot(t_sc[rpad:rpad + TM, :], w3_ref[...],
                preferred_element_type=jnp.float32)
    o = o + b_ref[2:3, :] + res_ref[...]                      # residual in f32
    out_ref[...] = jnp.maximum(o, 0.0)


# ----------------------------------------------------------------------------
# Wrapper: BN folding, block-diagonal grouped-conv weights, pallas_call
# ----------------------------------------------------------------------------
def _fold_bn(gamma, beta, mean, var):
    scale = gamma / jnp.sqrt(var + BN_EPS)
    bias = beta - mean * scale
    return scale, bias


def _block_diag_taps(w2, s2, gs):
    """(Cb, gs, 3, 3) grouped weights + folded bn2 scale -> (9, Cb, Cb) dense
    block-diagonal per-tap matrices W[tap, ci, co] for the MXU (zeros outside
    each group).  Fully vectorized (no per-group Python loop)."""
    Cb = w2.shape[0]
    co = jnp.arange(Cb)
    ci = jnp.arange(Cb)
    grp = co // gs                                             # group of out ch
    in_grp = ((ci[:, None] >= grp[None, :] * gs) &
              (ci[:, None] < (grp[None, :] + 1) * gs))         # (Cin, Cout)
    ci_local = jnp.clip(ci[:, None] - grp[None, :] * gs, 0, gs - 1)
    w2_t = w2.reshape(Cb, gs, 9)                               # (co, ci_loc, tap)
    gathered = w2_t[co[None, :], ci_local, :]                  # (Cin, Cout, 9)
    dense = jnp.where(in_grp[:, :, None], gathered, 0.0) * s2[None, :, None]
    return jnp.transpose(dense, (2, 0, 1)).astype(jnp.bfloat16)   # (9, Ci, Co)


def bottleneckx_pallas_nhwc(x_nhwc, params, residual_nhwc=None,
                            stride=1, dilation=1):
    # TODO(synk): only the stride=1 / dilation=1 path (the module defaults) is
    #             implemented in the kernel.
    assert stride == 1 and dilation == 1

    N, H, W, Cin = x_nhwc.shape
    w1 = params["w1"]                        # (Cb, Cin, 1, 1)
    w2 = params["w2"]                        # (Cb, Cb//32, 3, 3)
    w3 = params["w3"]                        # (Cout, Cb, 1, 1)
    Cb, Cout = w1.shape[0], w3.shape[0]
    assert Cb == Cout, "BottleneckX always has bottle_planes == planes"
    assert Cb % CARDINALITY == 0
    gs = Cb // CARDINALITY

    residual_is_x = residual_nhwc is None
    if residual_is_x:
        assert Cin == Cout, "default residual==x requires inplanes == planes"

    # ---- fold BN scales into conv weights; keep only biases ----------------
    s1, b1 = _fold_bn(*params["bn1"])
    s2, b2 = _fold_bn(*params["bn2"])
    s3, b3 = _fold_bn(*params["bn3"])

    w1m = (w1[:, :, 0, 0] * s1[:, None]).T.astype(jnp.bfloat16)   # (Cin, Cb)
    w2t = _block_diag_taps(w2.astype(jnp.float32), s2, gs)        # (9, Cb, Cb)
    w3m = (w3[:, :, 0, 0] * s3[:, None]).T.astype(jnp.bfloat16)   # (Cb, Cout)
    b_all = jnp.stack([b1, b2, b3]).astype(jnp.float32)           # (3, Cb)

    # ---- row tiling: whole images per grid step -----------------------------
    # Target large-ish steps (better MXU fill, amortized step overhead) while
    # keeping >= 4 grid steps when the batch allows (>= 2 per TC on 2-TC chips).
    hw = H * W
    MAX_TM = 1024
    MIN_STEPS = 4
    NB = 1
    for cand in range(1, N + 1):
        if N % cand:
            continue
        if cand * hw > MAX_TM:
            continue
        if N // cand < min(MIN_STEPS, N):
            continue
        NB = cand
    TM = NB * hw
    grid = (N // NB,)
    rpad = ((W + 1 + 15) // 16) * 16        # halo rows for the +/-(W+1) shifts

    # VMEM-budget guard (double-buffered row blocks + scratch), sized so the
    # kernel fits v7x's 32 MiB scoped default with headroom.
    vmem_bytes = (
        (TM + 2 * rpad) * Cb * 2 + TM * Cb * 4                     # scratch
        + 2 * TM * Cin * 4                                         # x blocks
        + (0 if residual_is_x else 2 * TM * Cout * 4)              # residual
        + 2 * TM * Cout * 4 + 2 * TM * 9 * 4                       # out + masks
        + Cin * Cb * 2 + 9 * Cb * Cb * 2 + Cb * Cout * 2 + 3 * Cb * 4)
    # TODO(synk): add row-band tiling (with a +/-(W+1) row halo) for feature
    #             maps too large for whole-image-per-step tiling.
    assert vmem_bytes <= 24 * 1024 * 1024, (
        "feature map too large for whole-image-per-step tiling")

    # ---- per-row, per-tap boundary masks (precomputed once, one small input)
    r = np.arange(N * hw)
    hh = (r // W) % H
    ww = r % W
    cols = []
    for dy in (-1, 0, 1):
        for dx in (-1, 0, 1):
            m = np.ones(N * hw, np.float32)
            if dy < 0:
                m *= (hh >= -dy)
            if dy > 0:
                m *= (hh < H - dy)
            if dx < 0:
                m *= (ww >= -dx)
            if dx > 0:
                m *= (ww < W - dx)
            cols.append(m.astype(np.float32))
    masks = jnp.asarray(np.stack(cols, axis=1))                   # (N*hw, 9)

    # x (and residual) stay f32 so the residual add is exact; MXU operands are
    # cast to bf16 inside the kernel.
    x_rows = x_nhwc.reshape(N * hw, Cin).astype(jnp.float32)

    row_spec = lambda c: pl.BlockSpec((TM, c), lambda i: (i, 0))
    full_spec = lambda *s: pl.BlockSpec(s, lambda i: (0,) * len(s))

    args = [x_rows]
    in_specs = [row_spec(Cin)]
    if not residual_is_x:
        args.append(residual_nhwc.reshape(N * hw, Cout).astype(jnp.float32))
        in_specs.append(row_spec(Cout))
    args += [masks, w1m, w2t, w3m, b_all]
    in_specs += [row_spec(9), full_spec(Cin, Cb), full_spec(9, Cb, Cb),
                 full_spec(Cb, Cout), full_spec(3, Cb)]

    kernel = functools.partial(_bottleneckx_kernel, width=W, rpad=rpad,
                               residual_is_x=residual_is_x)

    out_rows = pl.pallas_call(
        kernel,
        out_shape=jax.ShapeDtypeStruct((N * hw, Cout), jnp.float32),
        grid=grid,
        in_specs=in_specs,
        out_specs=row_spec(Cout),
        scratch_shapes=[pltpu.VMEM((TM + 2 * rpad, Cb), jnp.bfloat16),
                        pltpu.VMEM((TM, Cb), jnp.float32)],
        compiler_params=pltpu.CompilerParams(
            dimension_semantics=("parallel",),
            vmem_limit_bytes=32 * 1024 * 1024),
    )(*args)

    return out_rows.reshape(N, H, W, Cout)


def bottleneckx_pallas(x_nchw, params, residual_nchw=None, stride=1, dilation=1):
    # NOTE: the Pallas kernel is channels-last; these transposes exist only to
    # match the PyTorch NCHW interface.
    x_nhwc = jnp.transpose(x_nchw, (0, 2, 3, 1))
    res_nhwc = (None if residual_nchw is None
                else jnp.transpose(residual_nchw, (0, 2, 3, 1)))
    out_nhwc = bottleneckx_pallas_nhwc(x_nhwc, params, res_nhwc, stride, dilation)
    return jnp.transpose(out_nhwc, (0, 3, 1, 2))


# ----------------------------------------------------------------------------
# Deterministic parameter init (matches the PyTorch module's shapes)
# ----------------------------------------------------------------------------
def init_params(key, inplanes, planes):
    Cb = planes * CARDINALITY // 32
    ks = jax.random.split(key, 6)

    def conv_init(k, shape, fan_in):
        bound = 1.0 / np.sqrt(fan_in)
        return jax.random.uniform(k, shape, jnp.float32, -bound, bound)

    def bn_init(k, c):
        k1, k2, k3, k4 = jax.random.split(k, 4)
        gamma = 1.0 + 0.1 * jax.random.normal(k1, (c,), jnp.float32)
        beta = 0.1 * jax.random.normal(k2, (c,), jnp.float32)
        mean = 0.1 * jax.random.normal(k3, (c,), jnp.float32)
        var = 0.5 + 0.5 * jnp.abs(jax.random.normal(k4, (c,), jnp.float32))
        return gamma, beta, mean, var

    return {
        "w1": conv_init(ks[0], (Cb, inplanes, 1, 1), inplanes),
        "w2": conv_init(ks[1], (Cb, Cb // CARDINALITY, 3, 3),
                        (Cb // CARDINALITY) * 9),
        "w3": conv_init(ks[2], (planes, Cb, 1, 1), Cb),
        "bn1": bn_init(ks[3], Cb),
        "bn2": bn_init(ks[4], Cb),
        "bn3": bn_init(ks[5], planes),
    }


# ----------------------------------------------------------------------------
# Pure-JAX reference (NCHW, mirrors the PyTorch forward in eval mode)
# ----------------------------------------------------------------------------
def bottleneckx_ref(x_nchw, params, residual=None, stride=1, dilation=1):
    if residual is None:
        residual = x_nchw

    def conv(x, w, stride, padding, dilation, groups):
        return jax.lax.conv_general_dilated(
            x, w, window_strides=(stride, stride),
            padding=[(padding, padding), (padding, padding)],
            rhs_dilation=(dilation, dilation),
            dimension_numbers=("NCHW", "OIHW", "NCHW"),
            feature_group_count=groups)

    def bn(y, g, b, m, v):
        sh = (1, -1, 1, 1)
        return (y - m.reshape(sh)) / jnp.sqrt(v.reshape(sh) + BN_EPS) \
            * g.reshape(sh) + b.reshape(sh)

    out = conv(x_nchw, params["w1"], 1, 0, 1, 1)
    out = jax.nn.relu(bn(out, *params["bn1"]))
    out = conv(out, params["w2"], stride, dilation, dilation, CARDINALITY)
    out = jax.nn.relu(bn(out, *params["bn2"]))
    out = conv(out, params["w3"], 1, 0, 1, 1)
    out = bn(out, *params["bn3"])
    return jax.nn.relu(out + residual)


if __name__ == "__main__":
    # Small but TPU-friendly shapes: channels are a multiple of the
    # cardinality (32) and of the 128-lane width (lane-dense stores); batch 8
    # with 8x8 images gives a 4-step parallel grid (128 rows per step).
    N, C, H, W = 8, 128, 8, 8
    key = jax.random.PRNGKey(0)
    kx, kp, kr = jax.random.split(key, 3)

    x = jax.random.normal(kx, (N, C, H, W), jnp.float32)
    params = init_params(kp, inplanes=C, planes=C)

    # default path: residual = x
    out = jax.block_until_ready(bottleneckx_pallas(x, params))
    ref = jax.block_until_ready(bottleneckx_ref(x, params))
    assert out.shape == ref.shape == (N, C, H, W)
    # bf16 MXU operands with f32 accumulation -> loosened tolerance
    np.testing.assert_allclose(np.asarray(out), np.asarray(ref),
                               rtol=3e-2, atol=3e-2)

    # explicit-residual path (forward(x, residual=...))
    res = 0.5 * jax.random.normal(kr, (N, C, H, W), jnp.float32)
    out2 = jax.block_until_ready(bottleneckx_pallas(x, params, res))
    ref2 = jax.block_until_ready(bottleneckx_ref(x, params, res))
    np.testing.assert_allclose(np.asarray(out2), np.asarray(ref2),
                               rtol=3e-2, atol=3e-2)

    print("KERNEL_OK")
</pallas_src>

<mosaic_0001>
module attributes {stable_mosaic.version = 11 : i64} {
  func.func @_bottleneckx_kernel(%arg0: i32, %arg1: memref<128x128xf32, #tpu.memory_space<vmem>>, %arg2: memref<128x9xf32, #tpu.memory_space<vmem>>, %arg3: memref<128x128xbf16, #tpu.memory_space<vmem>>, %arg4: memref<9x128x128xbf16, #tpu.memory_space<vmem>>, %arg5: memref<128x128xbf16, #tpu.memory_space<vmem>>, %arg6: memref<3x128xf32, #tpu.memory_space<vmem>>, %arg7: memref<128x128xf32, #tpu.memory_space<vmem>>, %arg8: memref<160x128xbf16, #tpu.memory_space<vmem>>, %arg9: memref<128x128xf32, #tpu.memory_space<vmem>>) attributes {dimension_semantics = [#tpu.dimension_semantics<parallel>], iteration_bounds = array<i64: 4>, scalar_prefetch = 0 : i64, scratch_operands = 2 : i64, tpu.core_type = #tpu.core_type<tc>, window_params = [{transform_indices = @transform_0, window_bounds = array<i64: 128, 128>}, {transform_indices = @transform_1, window_bounds = array<i64: 128, 9>}, {pipeline_mode = #tpu.pipeline_mode<synchronous>, transform_indices = @transform_2, window_bounds = array<i64: 128, 128>}, {pipeline_mode = #tpu.pipeline_mode<synchronous>, transform_indices = @transform_3, window_bounds = array<i64: 9, 128, 128>}, {pipeline_mode = #tpu.pipeline_mode<synchronous>, transform_indices = @transform_4, window_bounds = array<i64: 128, 128>}, {pipeline_mode = #tpu.pipeline_mode<synchronous>, transform_indices = @transform_5, window_bounds = array<i64: 3, 128>}, {transform_indices = @transform_6, window_bounds = array<i64: 128, 128>}]} {
    %c0 = arith.constant 0 : index
    %c0_0 = arith.constant 0 : index
    %0 = vector.load %arg1[%c0, %c0_0] : memref<128x128xf32, #tpu.memory_space<vmem>>, vector<128x128xf32>
    %1 = arith.truncf %0 : vector<128x128xf32> to vector<128x128xbf16>
    %c0_1 = arith.constant 0 : index
    %c0_2 = arith.constant 0 : index
    %2 = vector.load %arg3[%c0_1, %c0_2] : memref<128x128xbf16, #tpu.memory_space<vmem>>, vector<128x128xbf16>
    %cst = arith.constant dense<0.000000e+00> : vector<128x128xf32>
    %3 = tpu.matmul %1, %2, %cst {dimension_numbers = #tpu.dot_dimension_numbers<[1], [0], [0], [1], [0, 0, 1, 1], [], []>} : vector<128x128xbf16>, vector<128x128xbf16>, vector<128x128xf32> -> vector<128x128xf32>
    %c0_3 = arith.constant 0 : index
    %c0_4 = arith.constant 0 : index
    %4 = vector.load %arg6[%c0_3, %c0_4] : memref<3x128xf32, #tpu.memory_space<vmem>>, vector<1x128xf32>
    %5 = vector.broadcast %4 : vector<1x128xf32> to vector<128x128xf32>
    %6 = arith.addf %3, %5 : vector<128x128xf32>
    %cst_5 = arith.constant 0.000000e+00 : f32
    %7 = vector.broadcast %cst_5 : f32 to vector<128x128xf32>
    %8 = arith.maximumf %6, %7 : vector<128x128xf32>
    %cst_6 = arith.constant 0.000000e+00 : bf16
    %9 = vector.broadcast %cst_6 : bf16 to vector<16x128xbf16>
    %c0_7 = arith.constant 0 : index
    %c0_8 = arith.constant 0 : index
    %10 = vector.load %arg8[%c0_7, %c0_8] : memref<160x128xbf16, #tpu.memory_space<vmem>>, vector<16x128xbf16>
    tpu.vector_store %arg8[%c0_7, %c0_8], %9 {strides = array<i32>} : memref<160x128xbf16, #tpu.memory_space<vmem>>, vector<16x128xbf16>,
    %cst_9 = arith.constant 0.000000e+00 : bf16
    %11 = vector.broadcast %cst_9 : bf16 to vector<16x128xbf16>
    %c144 = arith.constant 144 : index
    %c0_10 = arith.constant 0 : index
    %12 = vector.load %arg8[%c144, %c0_10] : memref<160x128xbf16, #tpu.memory_space<vmem>>, vector<16x128xbf16>
    tpu.vector_store %arg8[%c144, %c0_10], %11 {strides = array<i32>} : memref<160x128xbf16, #tpu.memory_space<vmem>>, vector<16x128xbf16>,
    %13 = arith.truncf %8 : vector<128x128xf32> to vector<128x128xbf16>
    %c16 = arith.constant 16 : index
    %c0_11 = arith.constant 0 : index
    %14 = vector.load %arg8[%c16, %c0_11] : memref<160x128xbf16, #tpu.memory_space<vmem>>, vector<128x128xbf16>
    tpu.vector_store %arg8[%c16, %c0_11], %13 {strides = array<i32>} : memref<160x128xbf16, #tpu.memory_space<vmem>>, vector<128x128xbf16>,
    %c7 = arith.constant 7 : index
    %c0_12 = arith.constant 0 : index
    %15 = vector.load %arg8[%c7, %c0_12] : memref<160x128xbf16, #tpu.memory_space<vmem>>, vector<128x128xbf16>
    %c0_13 = arith.constant 0 : index
    %c0_14 = arith.constant 0 : index
    %c0_15 = arith.constant 0 : index
    %16 = vector.load %arg4[%c0_13, %c0_14, %c0_15] : memref<9x128x128xbf16, #tpu.memory_space<vmem>>, vector<1x128x128xbf16>
    %17 = vector.shape_cast %16 : vector<1x128x128xbf16> to vector<128x128xbf16>
    %cst_16 = arith.constant dense<0.000000e+00> : vector<128x128xf32>
    %18 = tpu.matmul %15, %17, %cst_16 {dimension_numbers = #tpu.dot_dimension_numbers<[1], [0], [0], [1], [0, 0, 1, 1], [], []>} : vector<128x128xbf16>, vector<128x128xbf16>, vector<128x128xf32> -> vector<128x128xf32>
    %c0_17 = arith.constant 0 : index
    %c0_18 = arith.constant 0 : index
    %19 = vector.load %arg2[%c0_17, %c0_18] : memref<128x9xf32, #tpu.memory_space<vmem>>, vector<128x1xf32>
    %20 = vector.broadcast %19 : vector<128x1xf32> to vector<128x128xf32>
    %21 = arith.mulf %18, %20 : vector<128x128xf32>
    %c0_19 = arith.constant 0 : index
    %c0_20 = arith.constant 0 : index
    %22 = vector.load %arg9[%c0_19, %c0_20] : memref<128x128xf32, #tpu.memory_space<vmem>>, vector<128x128xf32>
    tpu.vector_store %arg9[%c0_19, %c0_20], %21 {strides = array<i32>} : memref<128x128xf32, #tpu.memory_space<vmem>>, vector<128x128xf32>,
    %c8 = arith.constant 8 : index
    %c0_21 = arith.constant 0 : index
    %23 = vector.load %arg8[%c8, %c0_21] : memref<160x128xbf16, #tpu.memory_space<vmem>>, vector<128x128xbf16>
    %c1 = arith.constant 1 : index
    %c0_22 = arith.constant 0 : index
    %c0_23 = arith.constant 0 : index
    %24 = vector.load %arg4[%c1, %c0_22, %c0_23] : memref<9x128x128xbf16, #tpu.memory_space<vmem>>, vector<1x128x128xbf16>
    %25 = vector.shape_cast %24 : vector<1x128x128xbf16> to vector<128x128xbf16>
    %cst_24 = arith.constant dense<0.000000e+00> : vector<128x128xf32>
    %26 = tpu.matmul %23, %25, %cst_24 {dimension_numbers = #tpu.dot_dimension_numbers<[1], [0], [0], [1], [0, 0, 1, 1], [], []>} : vector<128x128xbf16>, vector<128x128xbf16>, vector<128x128xf32> -> vector<128x128xf32>
    %c0_25 = arith.constant 0 : index
    %c1_26 = arith.constant 1 : index
    %27 = vector.load %arg2[%c0_25, %c1_26] : memref<128x9xf32, #tpu.memory_space<vmem>>, vector<128x1xf32>
    %28 = vector.broadcast %27 : vector<128x1xf32> to vector<128x128xf32>
    %29 = arith.mulf %26, %28 : vector<128x128xf32>
    %c0_27 = arith.constant 0 : index
    %c0_28 = arith.constant 0 : index
    %30 = vector.load %arg9[%c0_27, %c0_28] : memref<128x128xf32, #tpu.memory_space<vmem>>, vector<128x128xf32>
    %31 = arith.addf %30, %29 : vector<128x128xf32>
    %c0_29 = arith.constant 0 : index
    %c0_30 = arith.constant 0 : index
    %32 = vector.load %arg9[%c0_29, %c0_30] : memref<128x128xf32, #tpu.memory_space<vmem>>, vector<128x128xf32>
    tpu.vector_store %arg9[%c0_29, %c0_30], %31 {strides = array<i32>} : memref<128x128xf32, #tpu.memory_space<vmem>>, vector<128x128xf32>,
    %c9 = arith.constant 9 : index
    %c0_31 = arith.constant 0 : index
    %33 = vector.load %arg8[%c9, %c0_31] : memref<160x128xbf16, #tpu.memory_space<vmem>>, vector<128x128xbf16>
    %c2 = arith.constant 2 : index
    %c0_32 = arith.constant 0 : index
    %c0_33 = arith.constant 0 : index
    %34 = vector.load %arg4[%c2, %c0_32, %c0_33] : memref<9x128x128xbf16, #tpu.memory_space<vmem>>, vector<1x128x128xbf16>
    %35 = vector.shape_cast %34 : vector<1x128x128xbf16> to vector<128x128xbf16>
    %cst_34 = arith.constant dense<0.000000e+00> : vector<128x128xf32>
    %36 = tpu.matmul %33, %35, %cst_34 {dimension_numbers = #tpu.dot_dimension_numbers<[1], [0], [0], [1], [0, 0, 1, 1], [], []>} : vector<128x128xbf16>, vector<128x128xbf16>, vector<128x128xf32> -> vector<128x128xf32>
    %c0_35 = arith.constant 0 : index
    %c2_36 = arith.constant 2 : index
    %37 = vector.load %arg2[%c0_35, %c2_36] : memref<128x9xf32, #tpu.memory_space<vmem>>, vector<128x1xf32>
    %38 = vector.broadcast %37 : vector<128x1xf32> to vector<128x128xf32>
    %39 = arith.mulf %36, %38 : vector<128x128xf32>
    %c0_37 = arith.constant 0 : index
    %c0_38 = arith.constant 0 : index
    %40 = vector.load %arg9[%c0_37, %c0_38] : memref<128x128xf32, #tpu.memory_space<vmem>>, vector<128x128xf32>
    %41 = arith.addf %40, %39 : vector<128x128xf32>
    %c0_39 = arith.constant 0 : index
    %c0_40 = arith.constant 0 : index
    %42 = vector.load %arg9[%c0_39, %c0_40] : memref<128x128xf32, #tpu.memory_space<vmem>>, vector<128x128xf32>
    tpu.vector_store %arg9[%c0_39, %c0_40], %41 {strides = array<i32>} : memref<128x128xf32, #tpu.memory_space<vmem>>, vector<128x128xf32>,
    %c15 = arith.constant 15 : index
    %c0_41 = arith.constant 0 : index
    %43 = vector.load %arg8[%c15, %c0_41] : memref<160x128xbf16, #tpu.memory_space<vmem>>, vector<128x128xbf16>
    %c3 = arith.constant 3 : index
    %c0_42 = arith.constant 0 : index
    %c0_43 = arith.constant 0 : index
    %44 = vector.load %arg4[%c3, %c0_42, %c0_43] : memref<9x128x128xbf16, #tpu.memory_space<vmem>>, vector<1x128x128xbf16>
    %45 = vector.shape_cast %44 : vector<1x128x128xbf16> to vector<128x128xbf16>
    %cst_44 = arith.constant dense<0.000000e+00> : vector<128x128xf32>
    %46 = tpu.matmul %43, %45, %cst_44 {dimension_numbers = #tpu.dot_dimension_numbers<[1], [0], [0], [1], [0, 0, 1, 1], [], []>} : vector<128x128xbf16>, vector<128x128xbf16>, vector<128x128xf32> -> vector<128x128xf32>
    %c0_45 = arith.constant 0 : index
    %c3_46 = arith.constant 3 : index
    %47 = vector.load %arg2[%c0_45, %c3_46] : memref<128x9xf32, #tpu.memory_space<vmem>>, vector<128x1xf32>
    %48 = vector.broadcast %47 : vector<128x1xf32> to vector<128x128xf32>
    %49 = arith.mulf %46, %48 : vector<128x128xf32>
    %c0_47 = arith.constant 0 : index
    %c0_48 = arith.constant 0 : index
    %50 = vector.load %arg9[%c0_47, %c0_48] : memref<128x128xf32, #tpu.memory_space<vmem>>, vector<128x128xf32>
    %51 = arith.addf %50, %49 : vector<128x128xf32>
    %c0_49 = arith.constant 0 : index
    %c0_50 = arith.constant 0 : index
    %52 = vector.load %arg9[%c0_49, %c0_50] : memref<128x128xf32, #tpu.memory_space<vmem>>, vector<128x128xf32>
    tpu.vector_store %arg9[%c0_49, %c0_50], %51 {strides = array<i32>} : memref<128x128xf32, #tpu.memory_space<vmem>>, vector<128x128xf32>,
    %c16_51 = arith.constant 16 : index
    %c0_52 = arith.constant 0 : index
    %53 = vector.load %arg8[%c16_51, %c0_52] : memref<160x128xbf16, #tpu.memory_space<vmem>>, vector<128x128xbf16>
    %c4 = arith.constant 4 : index
    %c0_53 = arith.constant 0 : index
    %c0_54 = arith.constant 0 : index
    %54 = vector.load %arg4[%c4, %c0_53, %c0_54] : memref<9x128x128xbf16, #tpu.memory_space<vmem>>, vector<1x128x128xbf16>
    %55 = vector.shape_cast %54 : vector<1x128x128xbf16> to vector<128x128xbf16>
    %cst_55 = arith.constant dense<0.000000e+00> : vector<128x128xf32>
    %56 = tpu.matmul %53, %55, %cst_55 {dimension_numbers = #tpu.dot_dimension_numbers<[1], [0], [0], [1], [0, 0, 1, 1], [], []>} : vector<128x128xbf16>, vector<128x128xbf16>, vector<128x128xf32> -> vector<128x128xf32>
    %c0_56 = arith.constant 0 : index
    %c0_57 = arith.constant 0 : index
    %57 = vector.load %arg9[%c0_56, %c0_57] : memref<128x128xf32, #tpu.memory_space<vmem>>, vector<128x128xf32>
    %58 = arith.addf %57, %56 : vector<128x128xf32>
    %c0_58 = arith.constant 0 : index
    %c0_59 = arith.constant 0 : index
    %59 = vector.load %arg9[%c0_58, %c0_59] : memref<128x128xf32, #tpu.memory_space<vmem>>, vector<128x128xf32>
    tpu.vector_store %arg9[%c0_58, %c0_59], %58 {strides = array<i32>} : memref<128x128xf32, #tpu.memory_space<vmem>>, vector<128x128xf32>,
    %c17 = arith.constant 17 : index
    %c0_60 = arith.constant 0 : index
    %60 = vector.load %arg8[%c17, %c0_60] : memref<160x128xbf16, #tpu.memory_space<vmem>>, vector<128x128xbf16>
    %c5 = arith.constant 5 : index
    %c0_61 = arith.constant 0 : index
    %c0_62 = arith.constant 0 : index
    %61 = vector.load %arg4[%c5, %c0_61, %c0_62] : memref<9x128x128xbf16, #tpu.memory_space<vmem>>, vector<1x128x128xbf16>
    %62 = vector.shape_cast %61 : vector<1x128x128xbf16> to vector<128x128xbf16>
    %cst_63 = arith.constant dense<0.000000e+00> : vector<128x128xf32>
    %63 = tpu.matmul %60, %62, %cst_63 {dimension_numbers = #tpu.dot_dimension_numbers<[1], [0], [0], [1], [0, 0, 1, 1], [], []>} : vector<128x128xbf16>, vector<128x128xbf16>, vector<128x128xf32> -> vector<128x128xf32>
    %c0_64 = arith.constant 0 : index
    %c5_65 = arith.constant 5 : index
    %64 = vector.load %arg2[%c0_64, %c5_65] : memref<128x9xf32, #tpu.memory_space<vmem>>, vector<128x1xf32>
    %65 = vector.broadcast %64 : vector<128x1xf32> to vector<128x128xf32>
    %66 = arith.mulf %63, %65 : vector<128x128xf32>
    %c0_66 = arith.constant 0 : index
    %c0_67 = arith.constant 0 : index
    %67 = vector.load %arg9[%c0_66, %c0_67] : memref<128x128xf32, #tpu.memory_space<vmem>>, vector<128x128xf32>
    %68 = arith.addf %67, %66 : vector<128x128xf32>
    %c0_68 = arith.constant 0 : index
    %c0_69 = arith.constant 0 : index
    %69 = vector.load %arg9[%c0_68, %c0_69] : memref<128x128xf32, #tpu.memory_space<vmem>>, vector<128x128xf32>
    tpu.vector_store %arg9[%c0_68, %c0_69], %68 {strides = array<i32>} : memref<128x128xf32, #tpu.memory_space<vmem>>, vector<128x128xf32>,
    %c23 = arith.constant 23 : index
    %c0_70 = arith.constant 0 : index
    %70 = vector.load %arg8[%c23, %c0_70] : memref<160x128xbf16, #tpu.memory_space<vmem>>, vector<128x128xbf16>
    %c6 = arith.constant 6 : index
    %c0_71 = arith.constant 0 : index
    %c0_72 = arith.constant 0 : index
    %71 = vector.load %arg4[%c6, %c0_71, %c0_72] : memref<9x128x128xbf16, #tpu.memory_space<vmem>>, vector<1x128x128xbf16>
    %72 = vector.shape_cast %71 : vector<1x128x128xbf16> to vector<128x128xbf16>
    %cst_73 = arith.constant dense<0.000000e+00> : vector<128x128xf32>
    %73 = tpu.matmul %70, %72, %cst_73 {dimension_numbers = #tpu.dot_dimension_numbers<[1], [0], [0], [1], [0, 0, 1, 1], [], []>} : vector<128x128xbf16>, vector<128x128xbf16>, vector<128x128xf32> -> vector<128x128xf32>
    %c0_74 = arith.constant 0 : index
    %c6_75 = arith.constant 6 : index
    %74 = vector.load %arg2[%c0_74, %c6_75] : memref<128x9xf32, #tpu.memory_space<vmem>>, vector<128x1xf32>
    %75 = vector.broadcast %74 : vector<128x1xf32> to vector<128x128xf32>
    %76 = arith.mulf %73, %75 : vector<128x128xf32>
    %c0_76 = arith.constant 0 : index
    %c0_77 = arith.constant 0 : index
    %77 = vector.load %arg9[%c0_76, %c0_77] : memref<128x128xf32, #tpu.memory_space<vmem>>, vector<128x128xf32>
    %78 = arith.addf %77, %76 : vector<128x128xf32>
    %c0_78 = arith.constant 0 : index
    %c0_79 = arith.constant 0 : index
    %79 = vector.load %arg9[%c0_78, %c0_79] : memref<128x128xf32, #tpu.memory_space<vmem>>, vector<128x128xf32>
    tpu.vector_store %arg9[%c0_78, %c0_79], %78 {strides = array<i32>} : memref<128x128xf32, #tpu.memory_space<vmem>>, vector<128x128xf32>,
    %c24 = arith.constant 24 : index
    %c0_80 = arith.constant 0 : index
    %80 = vector.load %arg8[%c24, %c0_80] : memref<160x128xbf16, #tpu.memory_space<vmem>>, vector<128x128xbf16>
    %c7_81 = arith.constant 7 : index
    %c0_82 = arith.constant 0 : index
    %c0_83 = arith.constant 0 : index
    %81 = vector.load %arg4[%c7_81, %c0_82, %c0_83] : memref<9x128x128xbf16, #tpu.memory_space<vmem>>, vector<1x128x128xbf16>
    %82 = vector.shape_cast %81 : vector<1x128x128xbf16> to vector<128x128xbf16>
    %cst_84 = arith.constant dense<0.000000e+00> : vector<128x128xf32>
    %83 = tpu.matmul %80, %82, %cst_84 {dimension_numbers = #tpu.dot_dimension_numbers<[1], [0], [0], [1], [0, 0, 1, 1], [], []>} : vector<128x128xbf16>, vector<128x128xbf16>, vector<128x128xf32> -> vector<128x128xf32>
    %c0_85 = arith.constant 0 : index
    %c7_86 = arith.constant 7 : index
    %84 = vector.load %arg2[%c0_85, %c7_86] : memref<128x9xf32, #tpu.memory_space<vmem>>, vector<128x1xf32>
    %85 = vector.broadcast %84 : vector<128x1xf32> to vector<128x128xf32>
    %86 = arith.mulf %83, %85 : vector<128x128xf32>
    %c0_87 = arith.constant 0 : index
    %c0_88 = arith.constant 0 : index
    %87 = vector.load %arg9[%c0_87, %c0_88] : memref<128x128xf32, #tpu.memory_space<vmem>>, vector<128x128xf32>
    %88 = arith.addf %87, %86 : vector<128x128xf32>
    %c0_89 = arith.constant 0 : index
    %c0_90 = arith.constant 0 : index
    %89 = vector.load %arg9[%c0_89, %c0_90] : memref<128x128xf32, #tpu.memory_space<vmem>>, vector<128x128xf32>
    tpu.vector_store %arg9[%c0_89, %c0_90], %88 {strides = array<i32>} : memref<128x128xf32, #tpu.memory_space<vmem>>, vector<128x128xf32>,
    %c25 = arith.constant 25 : index
    %c0_91 = arith.constant 0 : index
    %90 = vector.load %arg8[%c25, %c0_91] : memref<160x128xbf16, #tpu.memory_space<vmem>>, vector<128x128xbf16>
    %c8_92 = arith.constant 8 : index
    %c0_93 = arith.constant 0 : index
    %c0_94 = arith.constant 0 : index
    %91 = vector.load %arg4[%c8_92, %c0_93, %c0_94] : memref<9x128x128xbf16, #tpu.memory_space<vmem>>, vector<1x128x128xbf16>
    %92 = vector.shape_cast %91 : vector<1x128x128xbf16> to vector<128x128xbf16>
    %cst_95 = arith.constant dense<0.000000e+00> : vector<128x128xf32>
    %93 = tpu.matmul %90, %92, %cst_95 {dimension_numbers = #tpu.dot_dimension_numbers<[1], [0], [0], [1], [0, 0, 1, 1], [], []>} : vector<128x128xbf16>, vector<128x128xbf16>, vector<128x128xf32> -> vector<128x128xf32>
    %c0_96 = arith.constant 0 : index
    %c8_97 = arith.constant 8 : index
    %94 = vector.load %arg2[%c0_96, %c8_97] : memref<128x9xf32, #tpu.memory_space<vmem>>, vector<128x1xf32>
    %95 = vector.broadcast %94 : vector<128x1xf32> to vector<128x128xf32>
    %96 = arith.mulf %93, %95 : vector<128x128xf32>
    %c0_98 = arith.constant 0 : index
    %c0_99 = arith.constant 0 : index
    %97 = vector.load %arg9[%c0_98, %c0_99] : memref<128x128xf32, #tpu.memory_space<vmem>>, vector<128x128xf32>
    %98 = arith.addf %97, %96 : vector<128x128xf32>
    %c0_100 = arith.constant 0 : index
    %c0_101 = arith.constant 0 : index
    %99 = vector.load %arg9[%c0_100, %c0_101] : memref<128x128xf32, #tpu.memory_space<vmem>>, vector<128x128xf32>
    tpu.vector_store %arg9[%c0_100, %c0_101], %98 {strides = array<i32>} : memref<128x128xf32, #tpu.memory_space<vmem>>, vector<128x128xf32>,
    %c0_102 = arith.constant 0 : index
    %c0_103 = arith.constant 0 : index
    %100 = vector.load %arg9[%c0_102, %c0_103] : memref<128x128xf32, #tpu.memory_space<vmem>>, vector<128x128xf32>
    %c1_104 = arith.constant 1 : index
    %c0_105 = arith.constant 0 : index
    %101 = vector.load %arg6[%c1_104, %c0_105] : memref<3x128xf32, #tpu.memory_space<vmem>>, vector<1x128xf32>
    %102 = vector.broadcast %101 : vector<1x128xf32> to vector<128x128xf32>
    %103 = arith.addf %100, %102 : vector<128x128xf32>
    %cst_106 = arith.constant 0.000000e+00 : f32
    %104 = vector.broadcast %cst_106 : f32 to vector<128x128xf32>
    %105 = arith.maximumf %103, %104 : vector<128x128xf32>
    %106 = arith.truncf %105 : vector<128x128xf32> to vector<128x128xbf16>
    %c16_107 = arith.constant 16 : index
    %c0_108 = arith.constant 0 : index
    %107 = vector.load %arg8[%c16_107, %c0_108] : memref<160x128xbf16, #tpu.memory_space<vmem>>, vector<128x128xbf16>
    tpu.vector_store %arg8[%c16_107, %c0_108], %106 {strides = array<i32>} : memref<160x128xbf16, #tpu.memory_space<vmem>>, vector<128x128xbf16>,
    %c16_109 = arith.constant 16 : index
    %c0_110 = arith.constant 0 : index
    %108 = vector.load %arg8[%c16_109, %c0_110] : memref<160x128xbf16, #tpu.memory_space<vmem>>, vector<128x128xbf16>
    %c0_111 = arith.constant 0 : index
    %c0_112 = arith.constant 0 : index
    %109 = vector.load %arg5[%c0_111, %c0_112] : memref<128x128xbf16, #tpu.memory_space<vmem>>, vector<128x128xbf16>
    %cst_113 = arith.constant dense<0.000000e+00> : vector<128x128xf32>
    %110 = tpu.matmul %108, %109, %cst_113 {dimension_numbers = #tpu.dot_dimension_numbers<[1], [0], [0], [1], [0, 0, 1, 1], [], []>} : vector<128x128xbf16>, vector<128x128xbf16>, vector<128x128xf32> -> vector<128x128xf32>
    %c2_114 = arith.constant 2 : index
    %c0_115 = arith.constant 0 : index
    %111 = vector.load %arg6[%c2_114, %c0_115] : memref<3x128xf32, #tpu.memory_space<vmem>>, vector<1x128xf32>
    %112 = vector.broadcast %111 : vector<1x128xf32> to vector<128x128xf32>
    %113 = arith.addf %110, %112 : vector<128x128xf32>
    %c0_116 = arith.constant 0 : index
    %c0_117 = arith.constant 0 : index
    %114 = vector.load %arg1[%c0_116, %c0_117] : memref<128x128xf32, #tpu.memory_space<vmem>>, vector<128x128xf32>
    %115 = arith.addf %113, %114 : vector<128x128xf32>
    %cst_118 = arith.constant 0.000000e+00 : f32
    %116 = vector.broadcast %cst_118 : f32 to vector<128x128xf32>
    %117 = arith.maximumf %115, %116 : vector<128x128xf32>
    %c0_119 = arith.constant 0 : index
    %c0_120 = arith.constant 0 : index
    %118 = vector.load %arg7[%c0_119, %c0_120] : memref<128x128xf32, #tpu.memory_space<vmem>>, vector<128x128xf32>
    tpu.vector_store %arg7[%c0_119, %c0_120], %117 {strides = array<i32>} : memref<128x128xf32, #tpu.memory_space<vmem>>, vector<128x128xf32>,
    return
  }
  func.func @transform_0(%arg0: i32) -> (i32, i32) {
    %c0_i32 = arith.constant 0 : i32
    %c0_i32_0 = arith.constant 0 : i32
    return %arg0, %c0_i32 : i32, i32
  }
  func.func @transform_1(%arg0: i32) -> (i32, i32) {
    %c0_i32 = arith.constant 0 : i32
    %c0_i32_0 = arith.constant 0 : i32
    return %arg0, %c0_i32 : i32, i32
  }
  func.func @transform_2(%arg0: i32) -> (i32, i32) {
    %c0_i32 = arith.constant 0 : i32
    %c0_i32_0 = arith.constant 0 : i32
    %c0_i32_1 = arith.constant 0 : i32
    return %c0_i32, %c0_i32_0 : i32, i32
  }
  func.func @transform_3(%arg0: i32) -> (i32, i32, i32) {
    %c0_i32 = arith.constant 0 : i32
    %c0_i32_0 = arith.constant 0 : i32
    %c0_i32_1 = arith.constant 0 : i32
    %c0_i32_2 = arith.constant 0 : i32
    return %c0_i32, %c0_i32_0, %c0_i32_1 : i32, i32, i32
  }
  func.func @transform_4(%arg0: i32) -> (i32, i32) {
    %c0_i32 = arith.constant 0 : i32
    %c0_i32_0 = arith.constant 0 : i32
    %c0_i32_1 = arith.constant 0 : i32
    return %c0_i32, %c0_i32_0 : i32, i32
  }
  func.func @transform_5(%arg0: i32) -> (i32, i32) {
    %c0_i32 = arith.constant 0 : i32
    %c0_i32_0 = arith.constant 0 : i32
    %c0_i32_1 = arith.constant 0 : i32
    return %c0_i32, %c0_i32_0 : i32, i32
  }
  func.func @transform_6(%arg0: i32) -> (i32, i32) {
    %c0_i32 = arith.constant 0 : i32
    %c0_i32_0 = arith.constant 0 : i32
    return %arg0, %c0_i32 : i32, i32
  }
}

</mosaic_0001>

<bundles_post_ra>
// kernel: tpu_custom_call.1
= control target key start
LH: loop header
LB: loop body
LE: loop exit
PB: predicated region body
PF: predicated region fallthrough
CT: control target
= control target key end

     0   :  { %11 = vsyncpa [#allocation5], 0  ;;  %s7319_s0 = inlined_call_operand.hbm [shape: f32[512,128], index: 0, kind: input, shape index: {}]   ;;  %s7320_s1 = inlined_call_operand.vmem [shape: f32[512,9], index: 1, kind: input, shape index: {}]   ;;  %s7321_s2 = inlined_call_operand.hbm [shape: bf16[128,128], index: 2, kind: input, shape index: {}]   ;;  %s7322_s3 = inlined_call_operand.vmem [shape: bf16[9,128,128], index: 3, kind: input, shape index: {}]   ;;  %s7323_s4 = inlined_call_operand.hbm [shape: bf16[128,128], index: 4, kind: input, shape index: {}]   ;;  %s7324_s5 = inlined_call_operand.hbm [shape: f32[3,128], index: 5, kind: input, shape index: {}]   ;;  %s7325_s6 = inlined_call_operand.hbm [shape: f32[512,128], index: 6, kind: output, shape index: {}]  }
   0x1   :  { %13 = vsyncpa [#allocation5 + $0x1], 0 }
   0x2   :  { %14 = vsyncpa [#allocation8], 0 }
   0x3   :  { %15 = vsyncpa [#allocation11], 0 }
   0x4   :  { %16 = vsyncpa [#allocation6], 0 }
   0x5   :  { %18 = vsyncpa [#allocation6 + $0x1], 0  ;;  %s5875_s21 = smov 0   ;;  %s5877_s22 = smov 0  }
   0x6   :  { %s5879_s23 = smov 0   ;;  %s5881_s24 = smov 0  }
   0x7 LB: > { %s5896_s25 = sadd.s32 4294967295, %s5821_s24   ;;  %s4358_s26 = sadd.s32 4294967294, %s5821_s24   ;;  %s5821_s24 = sphi %s5881_s24, %s7373_s24   ;;  %s5817_s23 = sphi %s5879_s23, %s7372_s23   ;;  %s5813_s22 = sphi %s5877_s22, %s7371_s22   ;;  %s5809_s21 = sphi %s5875_s21, %s7370_s21  }
   0x8   : > { %p44_p0 = scmp.ne.s32.totalorder %s5813_s22, %s5809_s21  ;;  %p45_p1 = scmp.eq.s32.totalorder %s5896_s25, 0 }
   0x9   : > { %p178_p2 = scmp.eq.s32.totalorder %s5896_s25, 3  ;;  %p184_p3 = scmp.eq.s32.totalorder %s4358_s26, 3 }
   0xa   : > { %p5905_p4 = por %p45_p1, %p44_p0  ;;  %p4359_p5 = scmp.ge.s32.totalorder %s5821_s24, 1 }
   0xb   : > { %p5910_p6 = por %p184_p3, %p44_p0  ;;  %p191_p7 = scmp.lt.s32.totalorder %s5821_s24, 5 }
   0xc   : > { %s202_s7 = sshll.u32 %s7321_s2, 4  ;;  %s5823_s9 = smov [#allocation7]   ;;  %s203_s7 = int_to_ptr.hbm [resolvable:$true] %s202_s7 }
   0xd   : > { %p5918_p8 = pnand %p4359_p5, %p191_p7  ;;  %s204_s10 = sshll.u32 %s5823_s9, 4  ;;  %s205_s10 = int_to_ptr.vmem [resolvable:$true] %s204_s10 }
   0xe   : > { %s219_s14 = sshll.u32 %s7323_s4, 4  ;;  %s5824_s15 = smov 64   ;;  %s220_s14 = int_to_ptr.hbm [resolvable:$true] %s219_s14 }
   0xf   : > { %p5486_p9 = pneg %p5918_p8  ;;  %s5825_s16 = smov 4  }
  0x10   : > { %s5826_s17 = smov [#allocation9]   ;;  %s234_s26 = sshll.u32 %s7324_s5, 4  ;;  %s235_s26 = int_to_ptr.hbm [resolvable:$true] %s234_s26 }
  0x11   : > { %p5926_p10 = pnand %p5486_p9, %p45_p1  ;;  %s221_s18 = sshll.u32 %s5826_s17, 4  ;;  %s222_s18 = int_to_ptr.vmem [resolvable:$true] %s221_s18 }
  0x12   : > { %s5827_s29 = smov [#allocation10]   ;;  %p38_p12 = scmp.ne.s32.totalorder %s5817_s23, %s5813_s22 }
  0x13   : > { %5489 = dma.hbm_to_vmem [thread:$0]  (!%p5926_p10), %s203_s7, 1024, %s205_s10, [#allocation8], %s5824_s15, %s5824_s15, %s5825_s16  }
  0x14   : > { %5492 = dma.hbm_to_vmem [thread:$0]  (!%p5926_p10), %s220_s14, 1024, %s222_s18, [#allocation8], %s5824_s15, %s5824_s15, %s5825_s16  }
  0x15   : > { %s236_s30 = sshll.u32 %s5827_s29, 4  ;;  %s5941_s7 = sadd.s32 1, %s5821_s24   ;;  %s237_s30 = int_to_ptr.vmem [resolvable:$true] %s236_s30 }
  0x16   : > { %5495 = dma.hbm_to_vmem [thread:$0]  (!%p5926_p10), %s235_s26, 64, %s237_s30, [#allocation11]  }
  0x17   : > { %s28_s9 = ssub.s32 %s5821_s24, %s5941_s7  ;;  %s31_s10 = sadd.s32 1, %s5817_s23 }
  0x18   : > { %p29_p11 = scmp.eq.s32.totalorder %s28_s9, 0  ;;  %p39_p13 = scmp.eq.s32.totalorder %s5821_s24, 0 }
  0x19   : > { %p5507_p0 = scmp.lt.s32.totalorder %s5821_s24, 4  ;;  %p5957_p5 = por %p178_p2, %p38_p12 }
  0x1a   : > { %s5953_s12 = scalar_select %p29_p11, %s5817_s23, %s31_s10  }
  0x1b   : > { %p40_p3 = por %p39_p13, %p38_p12  ;;  %s247_s14 = sand.u32 1, %s5817_s23  }
  0x1c   : > { %s5180_s15 = sshll.u32 %s5821_s24, 7  ;;  %s4364_s11 = sshll.u32 %s247_s14, 7 }
  0x1d   : > { %s256_s18 = scalar_lea.hbm %s7319_s0, %s5180_s15  ;;  %s251_s20 = scalar_lea.vmem [#allocation4], %s4364_s11 }
  0x1e   : > { %s257_s19 = sshll.u32 %s256_s18, 4  ;;  %s259_s26 = sshll.u32 %s251_s20, 4  ;;  %s258_s19 = int_to_ptr.hbm [resolvable:$true] %s257_s19  ;;  %s260_s26 = int_to_ptr.vmem [resolvable:$true] %s259_s26 }
  0x1f   : > { %p5968_p7 = pnand %p5507_p0, %p40_p3  ;;  %s248_s30 = scalar_lea.sflag [#allocation5], %s247_s14 }
  0x20   : > { %s5717_s9 = sshra.s32 %s258_s19, 4  ;;  %s5724_s16 = scalar_lea.hbm %s7319_s0, 512  ;;  %s5718_s9 = int_to_ptr.hbm [resolvable:$true] %s5717_s9 }
  0x21   : > { %s5719_s10 = scalar_lea.hbm %s5718_s9, 128  ;;  %p5721_p9 = pneg %p5968_p7 }
  0x22   : > { %p5720_p2 = scmp.ne.s32.totalorder %s5718_s9, %s5719_s10  ;;  %p5725_p12 = scmp.lt.s32.totalorder %s5718_s9, %s7319_s0 }
  0x23   : > { %p5726_p13 = scmp.lt.s32.totalorder %s5724_s16, %s5719_s10 }
  0x24   : > { %p5722_p10 = pnand %p5721_p9, %p5720_p2 }
  0x25   : > { %p5727_p0 = por %p5726_p13, %p5725_p12 }
  0x26   : > { %p5723_p11 = pneg %p5722_p10 }
  0x28   : > { %p5728_p3 = pnand %p5727_p0, %p5723_p11 }
  0x2a   : > { %5731 = shalt.err (!%p5728_p3)
}
  0x2b   : > { %s5828_s14 = smov 128   ;;  %s5829_s20 = smov 8  }
  0x2c   : > { %5499 = dma.hbm_to_vmem [thread:$0]  (!%p5968_p7), %s258_s19, 2048, %s260_s26, %s248_s30, %s5828_s14, %s5828_s14, %s5829_s20  }
  0x2d   : > { %280 = sbr.rel (%p5918_p8) target bundleno = 900 (0x384), region = 44 }
  0x32   : > { %s5985_s15 = sand.u32 1, %s5813_s22  }
  0x33   : > { %s4368_s9 = sshll.u32 %s5985_s15, 7  ;;  %s283_s10 = scalar_lea.sflag [#allocation5], %s5985_s15 }
  0x34   : > { %s5991_s11 = scalar_lea.vmem [#allocation4], %s4368_s9 }
  0x35   : > { %5792 = dma.done.wait (%p5905_p4), %s283_s10, 2048  }
  0x36   : > { %5794 = vsyncadd (%p5905_p4), %s283_s10, 4294965248 }
  0x37   : > { %5796 = dma.done.wait (%p45_p1), [#allocation8], 2048  }
  0x38   : > { %5798 = vsyncadd (%p45_p1), [#allocation8], 4294965248 }
  0x39   : > { %5800 = dma.done.wait (%p45_p1), [#allocation11], 64  }
  0x3a   : > { %5802 = vsyncadd (%p45_p1), [#allocation11], 4294967232  ;;  %v5188_v0 = vld [vmem:[#allocation7 + $0x38] sm:$0xff]  ;;  %v5187_v1 = vld [vmem:[#allocation7 + $0x30] sm:$0xff]  ;;  %s4373_s27 = sshll.u32 %s5896_s25, 4  ;;  %v5830_v15 = vmov 0  }
  0x3b   : > { %435 = vmatpush.bf16.msra.mxu0 %v5188_v0  ;;  %5446 = vmatpush.bf16.msra.mxu3 %v5188_v0  ;;  %v5186_v2 = vld [vmem:[#allocation7 + $0x28] sm:$0xff]  ;;  %v5185_v3 = vld [vmem:[#allocation7 + $0x20] sm:$0xff]  ;;  %v5184_v4 = vld [vmem:[#allocation7 + $0x18] sm:$0xff]  ;;  %p338_p1 = scmp.lt.s32.totalorder %s4373_s27, 63  ;;  %500 = vst [vmem:[#allocation2] sm:$0xf] %v5830_v15 }
  0x3c   : > { %v5183_v5 = vld [vmem:[#allocation7 + $0x10] sm:$0xff]  ;;  %v5182_v6 = vld [vmem:[#allocation7 + $0x8] sm:$0xff]  ;;  %v5181_v7 = vld [vmem:[#allocation7] sm:$0xff]  ;;  %5562 = vset.pattern.permute.xlu1 %v5830_v15  ;;  %5563 = vset.pattern.permute.xlu2 %v5830_v15  ;;  %501 = vst [vmem:[#allocation2 + $0x4] sm:$0xf] %v5830_v15  ;;  %v5831_v36 = vmov 1  }
  0x3d   : > { %s7375_s27 = smov (!%p338_p1, %s4373_s27), 63  ;;  %v345_v8 = vld [vmem:[%s5991_s11] sm:$0xff]  ;;  %v346_v9 = vld [vmem:[%s5991_s11 + $0x8] sm:$0xff]  ;;  %5561 = vset.pattern.permute.xlu0 %v5830_v15  ;;  %502 = vst [vmem:[#allocation2 + $0x48] sm:$0xf] %v5830_v15  ;;  %v347_v17 = vld [vmem:[%s5991_s11 + $0x10] sm:$0xff] }
  0x3e   : > { %v349_v10 = vld [vmem:[%s5991_s11 + $0x20] sm:$0xff]  ;;  %v350_v11 = vld [vmem:[%s5991_s11 + $0x28] sm:$0xff]  ;;  %s4374_s8 = sshll.u32 %s7375_s27, 3  ;;  %v361_v12 = vpack.c.bf16 %v346_v9, %v345_v8  ;;  %503 = vst [vmem:[#allocation2 + $0x4c] sm:$0xf] %v5830_v15  ;;  %v348_v18 = vld [vmem:[%s5991_s11 + $0x18] sm:$0xff] }
  0x3f   : > { %436 = vmatpush.bf16.msra.mxu0 %v5187_v1  ;;  %5447 = vmatpush.bf16.msra.mxu3 %v5187_v1  ;;  %v363_v13 = vpack.c.bf16 %v350_v11, %v349_v10  ;;  %s6013_s29 = scalar_lea.vmem %s7320_s1, %s4374_s8  ;;  %v351_v19 = vld [vmem:[%s5991_s11 + $0x30] sm:$0xff]  ;;  %v352_v20 = vld [vmem:[%s5991_s11 + $0x38] sm:$0xff]  ;;  %v362_v21 = vpack.c.bf16 %v348_v18, %v347_v17  ;;  %v353_v27 = vld [vmem:[%s5991_s11 + $0x40] sm:$0xff]  ;;  %v5832_v49 = vmov 2   ;;  %vm612_vm0 = vsmask.f32 4352 }
  0x40   : > { %v6016_v14 = vld [vmem:[%s6013_s29 + $0x10] sm:$0xff]  ;;  %v6020_v16 = vld [vmem:[%s6013_s29 + $0x18] sm:$0xff]  ;;  %v364_v22 = vpack.c.bf16 %v352_v20, %v351_v19  ;;  %v6028_v23 = vld [vmem:[%s6013_s29 + $0x20] sm:$0xff]  ;;  %vm1341_vm1 = vsmask.f32 7424  ;;  %s4229_s10 = scalar_lea.sflag [#allocation6], %s5985_s15 }
  0x41   : > { %826 = vperm.xlu1 %5562, %v6016_v14   ;;  %v6031_v24 = vld [vmem:[%s6013_s29 + $0x38] sm:$0xff]  ;;  %836 = vperm.xlu2 %5563, %v6028_v23   ;;  %v6036_v25 = vld [vmem:[%s6013_s29 + $0x28] sm:$0xff]  ;;  %v6039_v26 = vld [vmem:[%s6013_s29 + $0x50] sm:$0xff] }
  0x42   : > { %v354_v28 = vld [vmem:[%s5991_s11 + $0x48] sm:$0xff]  ;;  %v6046_v30 = vld [vmem:[%s6013_s29 + $0x40] sm:$0xff]  ;;  %v6049_v31 = vld [vmem:[%s6013_s29 + $0x68] sm:$0xff] }
  0x43   : > { %437 = vmatpush.bf16.msra.mxu0 %v5186_v2  ;;  %5448 = vmatpush.bf16.msra.mxu3 %v5186_v2  ;;  %v365_v29 = vpack.c.bf16 %v354_v28, %v353_v27  ;;  %v6052_v32 = vld [vmem:[%s6013_s29] sm:$0xff]  ;;  %v6058_v33 = vld [vmem:[%s6013_s29 + $0x58] sm:$0xff]  ;;  %v356_v35 = vld [vmem:[%s5991_s11 + $0x58] sm:$0xff] }
  0x44   : > { %816 = vperm.xlu0 %5561, %v6052_v32   ;;  %v355_v34 = vld [vmem:[%s5991_s11 + $0x50] sm:$0xff]  ;;  %v6065_v38 = vld [vmem:[%s6013_s29 + $0x70] sm:$0xff]  ;;  %v6068_v39 = vld [vmem:[%s6013_s29 + $0x8] sm:$0xff] }
  0x45   : > { %v366_v37 = vpack.c.bf16 %v356_v35, %v355_v34  ;;  %v1110_v40 = vld [vmem:[%s6013_s29 + $0x30] sm:$0xff]  ;;  %v358_v42 = vld [vmem:[%s5991_s11 + $0x68] sm:$0xff]  ;;  %v1113_v44 = vld [vmem:[%s6013_s29 + $0x48] sm:$0xff] }
  0x46   : > { %v357_v41 = vld [vmem:[%s5991_s11 + $0x60] sm:$0xff]  ;;  %v6082_v45 = vld [vmem:[%s6013_s29 + $0x60] sm:$0xff]  ;;  %v360_v47 = vld [vmem:[%s5991_s11 + $0x78] sm:$0xff] }
  0x47   : > { %438 = vmatpush.bf16.msra.mxu0 %v5185_v3  ;;  %5449 = vmatpush.bf16.msra.mxu3 %v5185_v3  ;;  %v367_v43 = vpack.c.bf16 %v358_v42, %v357_v41  ;;  %v359_v46 = vld [vmem:[%s5991_s11 + $0x70] sm:$0xff]  ;;  %v5204_v50 = vld [vmem:[%s7322_s3 + $0x38] sm:$0xff]  ;;  %v5203_v51 = vld [vmem:[%s7322_s3 + $0x30] sm:$0xff] }
  0x48   : > { %v368_v48 = vpack.c.bf16 %v360_v47, %v359_v46  ;;  %5454 = vmatpush.bf16.msra.mxu1 %v5204_v50  ;;  %v6099_v52 = vld [vmem:[%s6013_s29 + $0x78] sm:$0xff]  ;;  %v5202_v53 = vld [vmem:[%s7322_s3 + $0x28] sm:$0xff]  ;;  %v5201_v55 = vld [vmem:[%s7322_s3 + $0x20] sm:$0xff] }
  0x49   : > { %831 = vperm.xlu1 %5562, %v6020_v16   ;;  %841 = vperm.xlu2 %5563, %v6036_v25   ;;  %v5220_v54 = vld [vmem:[%s7322_s3 + $0x78] sm:$0xff]  ;;  %v5219_v56 = vld [vmem:[%s7322_s3 + $0x70] sm:$0xff]  ;;  %v5218_v59 = vld [vmem:[%s7322_s3 + $0x68] sm:$0xff] }
  0x4a   : > { %5462 = vmatpush.bf16.msra.mxu2 %v5220_v54  ;;  %v5236_v57 = vld [vmem:[%s7322_s3 + $0xb8] sm:$0xff]  ;;  %v5235_v60 = vld [vmem:[%s7322_s3 + $0xb0] sm:$0xff]  ;;  %v5217_v62 = vld [vmem:[%s7322_s3 + $0x60] sm:$0xff] }
  0x4b   : > { %439 = vmatpush.bf16.msra.mxu0 %v5184_v4  ;;  %5450 = vmatpush.bf16.msra.mxu3 %v5184_v4  ;;  %v5200_v58 = vld [vmem:[%s7322_s3 + $0x18] sm:$0xff]  ;;  %v5199_v61 = vld [vmem:[%s7322_s3 + $0x10] sm:$0xff]  ;;  %v5234_v63 = vld [vmem:[%s7322_s3 + $0xa8] sm:$0xff] }
  0x4c   : > { %821 = vperm.xlu0 %5561, %v6068_v39   ;;  %5455 = vmatpush.bf16.msra.mxu1 %v5203_v51  ;;  %v5198_v0 = vld [vmem:[%s7322_s3 + $0x8] sm:$0xff]  ;;  %v5216_v1 = vld [vmem:[%s7322_s3 + $0x58] sm:$0xff]  ;;  %v5233_v2 = vld [vmem:[%s7322_s3 + $0xa0] sm:$0xff] }
  0x4d   : > { %v5197_v3 = vld [vmem:[%s7322_s3] sm:$0xff]  ;;  %v5215_v4 = vld [vmem:[%s7322_s3 + $0x50] sm:$0xff]  ;;  %v5230_v11 = vld [vmem:[%s7322_s3 + $0x88] sm:$0xff] }
  0x4e   : > { %5463 = vmatpush.bf16.msra.mxu2 %v5219_v56  ;;  %v5231_v8 = vld [vmem:[%s7322_s3 + $0x90] sm:$0xff]  ;;  %v5213_v10 = vld [vmem:[%s7322_s3 + $0x40] sm:$0xff] }
  0x4f   : > { %440 = vmatpush.bf16.msra.mxu0 %v5183_v5  ;;  %5451 = vmatpush.bf16.msra.mxu3 %v5183_v5  ;;  %v5232_v5 = vld [vmem:[%s7322_s3 + $0x98] sm:$0xff]  ;;  %v6169_v9 = vld [vmem:[#allocation10] ss:$0 sm:$0xff]  ;;  %v5229_v17 = vld [vmem:[%s7322_s3 + $0x80] sm:$0xff] }
  0x50   : > { %5456 = vmatpush.bf16.msra.mxu1 %v5202_v53  ;;  %v5189_v27 = vld [vmem:[#allocation2] sm:$0xf0] }
  0x51   : > { %851 = vperm.xlu1 %5562, %v6031_v24   ;;  %856 = vperm.xlu2 %5563, %v6046_v30  }
  0x52   : > { %5464 = vmatpush.bf16.msra.mxu2 %v5218_v59 }
  0x53   : > { %441 = vmatpush.bf16.msra.mxu0 %v5182_v6  ;;  %5452 = vmatpush.bf16.msra.mxu3 %v5182_v6  ;;  %v5214_v6 = vld [vmem:[%s7322_s3 + $0x48] sm:$0xff] }
  0x54   : > { %846 = vperm.xlu0 %5561, %v1110_v40   ;;  %5457 = vmatpush.bf16.msra.mxu1 %v5201_v55 }
  0x56   : > { %5465 = vmatpush.bf16.msra.mxu2 %v5217_v62 }
  0x57   : > { %442 = vmatpush.bf16.msra.mxu0 %v5181_v7  ;;  %5453 = vmatpush.bf16.msra.mxu3 %v5181_v7 }
  0x58   : > { %5458 = vmatpush.bf16.msra.mxu1 %v5200_v58 }
  0x59   : > { %866 = vperm.xlu1 %5562, %v6039_v26   ;;  %871 = vperm.xlu2 %5563, %v6058_v33  }
  0x5a   : > { %443 = vmatmul.bf16.vlgmr.msra.gmra.mxu0 %v361_v12  ;;  %453 = vmatmul.bf16.vlgmr.msra.gmra.mxu3 %v363_v13 }
  0x5b   : > { %749 = vmatpush.bf16.msrb.mxu0 %v5204_v50  ;;  %1466 = vmatpush.bf16.msrb.mxu3 %v5236_v57 }
  0x5c   : > { %861 = vperm.xlu0 %5561, %v1113_v44   ;;  %5459 = vmatpush.bf16.msra.mxu1 %v5199_v61 }
  0x5d   : > { %5466 = vmatpush.bf16.msra.mxu2 %v5216_v1 }
  0x5f   : > { %750 = vmatpush.bf16.msrb.mxu0 %v5203_v51  ;;  %1467 = vmatpush.bf16.msrb.mxu3 %v5235_v60 }
  0x60   : > { %5460 = vmatpush.bf16.msra.mxu1 %v5198_v0 }
  0x61   : > { %881 = vperm.xlu1 %5562, %v6049_v31   ;;  %886 = vperm.xlu2 %5563, %v6065_v38  }
  0x62   : > { %5467 = vmatpush.bf16.msra.mxu2 %v5215_v4 }
  0x63   : > { %751 = vmatpush.bf16.msrb.mxu0 %v5202_v53  ;;  %1468 = vmatpush.bf16.msrb.mxu3 %v5234_v63 }
  0x64   : > { %876 = vperm.xlu0 %5561, %v6082_v45   ;;  %5461 = vmatpush.bf16.msra.mxu1 %v5197_v3 }
  0x66   : > { %5468 = vmatpush.bf16.msra.mxu2 %v5214_v6 }
  0x67   : > { %752 = vmatpush.bf16.msrb.mxu0 %v5201_v55  ;;  %1469 = vmatpush.bf16.msrb.mxu3 %v5233_v2 }
  0x69   : > { %5564 = vset.pattern.permute.xlu1 %v5831_v36  ;;  %5565 = vset.pattern.permute.xlu2 %v5831_v36 }
  0x6a   : > { %448 = vmatmul.bf16.gmra.mxu0 %v362_v21  ;;  %458 = vmatmul.bf16.gmra.mxu3 %v364_v22  ;;  %v4409_v22 = vld [vmem:[#allocation2] sm:$0x8] }
  0x6b   : > { %1122 = vperm.xlu1 %5564, %v6052_v32   ;;  %1127 = vperm.xlu2 %5565, %v6068_v39   ;;  %v4410_v34 = vor.u32 %v5189_v27, %v4409_v22 }
  0x6c   : > { %891 = vperm.xlu0 %5561, %v6099_v52   ;;  %753 = vmatpush.bf16.msrb.mxu0 %v5200_v58 }
  0x6d   : > { %1470 = vmatpush.bf16.msrb.mxu3 %v5232_v5  ;;  %5469 = vmatpush.bf16.msra.mxu2 %v5213_v10  ;;  %v614_v42 = vshrl.u32 %v4410_v34, 16 }
  0x70   : > { %754 = vmatpush.bf16.msrb.mxu0 %v5199_v61 }
  0x71   : > { %1471 = vmatpush.bf16.msrb.mxu3 %v5231_v8 }
  0x73   : > { %1137 = vperm.xlu1 %5564, %v6020_v16   ;;  %1142 = vperm.xlu2 %5565, %v6028_v23  }
  0x74   : > { %5566 = vset.pattern.permute.xlu0 %v5831_v36  ;;  %755 = vmatpush.bf16.msrb.mxu0 %v5198_v0 }
  0x75   : > { %1132 = vperm.xlu0 %5566, %v6016_v14   ;;  %1472 = vmatpush.bf16.msrb.mxu3 %v5230_v11 }
  0x78   : > { %756 = vmatpush.bf16.msrb.mxu0 %v5197_v3 }
  0x79   : > { %1473 = vmatpush.bf16.msrb.mxu3 %v5229_v17 }
  0x7a   : > { %463 = vmatmul.bf16.gmra.mxu3 %v365_v29 }
  0x7b   : > { %1147 = vperm.xlu1 %5564, %v6036_v25   ;;  %1152 = vperm.xlu2 %5565, %v1110_v40  }
  0x7c   : > { %1055 = vmatpush.bf16.msra.mxu0 %v5220_v54  ;;  %v5267_v54 = vld [vmem:[%s7322_s3 + $0x130] sm:$0xff] }
  0x7d   : > { %1157 = vperm.xlu0 %5566, %v6031_v24  }
  0x80   : > { %1056 = vmatpush.bf16.msra.mxu0 %v5219_v56 }
  0x83   : > { %1162 = vperm.xlu1 %5564, %v6046_v30   ;;  %1167 = vperm.xlu2 %5565, %v1113_v44  }
  0x84   : > { %1057 = vmatpush.bf16.msra.mxu0 %v5218_v59 }
  0x85   : > { %1172 = vperm.xlu0 %5566, %v6039_v26  }
  0x88   : > { %1058 = vmatpush.bf16.msra.mxu0 %v5217_v62 }
  0x8a   : > { %468 = vmatmul.bf16.gmra.mxu3 %v366_v37 }
  0x8b   : > { %1177 = vperm.xlu1 %5564, %v6058_v33   ;;  %1182 = vperm.xlu2 %5565, %v6082_v45  }
  0x8c   : > { %1059 = vmatpush.bf16.msra.mxu0 %v5216_v1 }
  0x8d   : > { %1187 = vperm.xlu0 %5566, %v6049_v31  }
  0x90   : > { %1060 = vmatpush.bf16.msra.mxu0 %v5215_v4  ;;  %v5252_v4 = vld [vmem:[%s7322_s3 + $0xf8] sm:$0xff] }
  0x93   : > { %1192 = vperm.xlu1 %5564, %v6065_v38   ;;  %1197 = vperm.xlu2 %5565, %v6099_v52  }
  0x94   : > { %1061 = vmatpush.bf16.msra.mxu0 %v5214_v6 }
  0x95   : > { %5567 = vset.pattern.permute.xlu0 %v5832_v49 }
  0x96   : > { %1533 = vperm.xlu0 %5567, %v6052_v32  }
  0x98   : > { %1062 = vmatpush.bf16.msra.mxu0 %v5213_v10  ;;  %v5251_v10 = vld [vmem:[%s7322_s3 + $0xf0] sm:$0xff] }
  0x9a   : > { %473 = vmatmul.bf16.gmra.mxu3 %v367_v43  ;;  %v617_v43 = vshll.u32 %v4410_v34, 16 }
  0x9b   : > { %5568 = vset.pattern.permute.xlu1 %v5832_v49  ;;  %5569 = vset.pattern.permute.xlu2 %v5832_v49 }
  0x9c   : > { %1538 = vperm.xlu1 %5568, %v6068_v39   ;;  %1543 = vperm.xlu2 %5569, %v6016_v14   ;;  %v619_v50 = vrot.slane %v617_v43, 4 }
  0x9e   : > { %1558 = vperm.xlu0 %5567, %v6036_v25  }
  0xa4   : > { %1548 = vperm.xlu1 %5568, %v6020_v16   ;;  %1553 = vperm.xlu2 %5569, %v6028_v23  }
  0xa6   : > { %1573 = vperm.xlu0 %5567, %v6046_v30  }
  0xaa   : > { %478 = vmatmul.bf16.gmra.mxu3 %v368_v48  ;;  %v616_v48 = vrot.slane %v614_v42, 3 }
  0xac   : > { %1563 = vperm.xlu1 %5568, %v1110_v40   ;;  %1568 = vperm.xlu2 %5569, %v6031_v24   ;;  %v5833_v40 = vmov 3   ;;  %v620_v55 = vor.u32 %v619_v50, %v616_v48  ;;  %v5248_v50 = vld [vmem:[%s7322_s3 + $0xd8] sm:$0xff] }
  0xb4   : > { %1578 = vperm.xlu1 %5568, %v1113_v44   ;;  %1583 = vperm.xlu2 %5569, %v6039_v26  }
  0xbc   : > { %1593 = vperm.xlu1 %5568, %v6082_v45   ;;  %1598 = vperm.xlu2 %5569, %v6049_v31   ;;  %v5268_v45 = vld [vmem:[%s7322_s3 + $0x138] sm:$0xff] }
  0xbd   : > { %2226 = vmatpush.bf16.msrb.mxu1 %v5268_v45 }
  0xc1   : > { %2227 = vmatpush.bf16.msrb.mxu1 %v5267_v54  ;;  %v5247_v54 = vld [vmem:[%s7322_s3 + $0xd0] sm:$0xff] }
  0xc4   : > { %1608 = vperm.xlu1 %5568, %v6099_v52   ;;  %5570 = vset.pattern.permute.xlu2 %v5833_v40 }
  0xc5   : > { %1955 = vperm.xlu2 %5570, %v6052_v32  }
  0xcc   : > { %5572 = vset.pattern.permute.xlu1 %v5833_v40 }
  0xcd   : > { %1965 = vperm.xlu1 %5572, %v6016_v14   ;;  %1970 = vperm.xlu2 %5570, %v6020_v16  }
  0xd5   : > { %1975 = vperm.xlu1 %5572, %v6028_v23   ;;  %1980 = vperm.xlu2 %5570, %v6036_v25   ;;  %v5249_v25 = vld [vmem:[%s7322_s3 + $0xe0] sm:$0xff] }
  0xd7   : > { %v444_v7 = vpop.f32.mrf.mxu0 }
  0xd8   : > { %v445_v13 = vadd.f32 %v6169_v9, %v444_v7 }
  0xda   : > { %v484_v19 = vmax.f32 %v445_v13, 0.0 }
  0xdd   : > { %v454_v12 = vpop.f32.mrf.mxu3  ;;  %1990 = vperm.xlu1 %5572, %v6031_v24   ;;  %v5250_v24 = vld [vmem:[%s7322_s3 + $0xe8] sm:$0xff]  ;;  %1995 = vperm.xlu2 %5570, %v6046_v30   ;;  %v5265_v30 = vld [vmem:[%s7322_s3 + $0x120] sm:$0xff] }
  0xde   : > { %v455_v20 = vadd.f32 %v6169_v9, %v454_v12 }
  0xdf   : > { %v446_v15 = vpop.f32.mrf.mxu0 }
  0xe0   : > { %v447_v18 = vadd.f32 %v6169_v9, %v446_v15  ;;  %v488_v35 = vmax.f32 %v455_v20, 0.0 }
  0xe2   : > { %v485_v21 = vmax.f32 %v447_v18, 0.0 }
  0xe4   : > { %v5353_v28 = vpack.c.bf16 %v485_v21, %v484_v19 }
  0xe5   : > { %v456_v29 = vpop.f32.mrf.mxu3  ;;  %2005 = vperm.xlu1 %5572, %v6039_v26   ;;  %2010 = vperm.xlu2 %5570, %v6058_v33  }
  0xe6   : > { %5430 = vst [vmem:[#allocation2 + $0x8] sm:$0xff] %v5353_v28   ;;  %v457_v36 = vadd.f32 %v6169_v9, %v456_v29  ;;  %v5266_v28 = vld [vmem:[%s7322_s3 + $0x128] sm:$0xff] }
  0xe7   : > { %v449_v37 = vpop.f32.mrf.mxu0  ;;  %2228 = vmatpush.bf16.msrb.mxu1 %v5266_v28 }
  0xe8   : > { %v489_v41 = vmax.f32 %v457_v36, 0.0  ;;  %v450_v14 = vadd.f32 %v6169_v9, %v449_v37 }
  0xea   : > { %v5363_v44 = vpack.c.bf16 %v489_v41, %v488_v35  ;;  %v486_v58 = vmax.f32 %v450_v14, 0.0 }
  0xeb   : > { %2229 = vmatpush.bf16.msrb.mxu1 %v5265_v30 }
  0xec   : > { %5432 = vst [vmem:[#allocation2 + $0x18] sm:$0xff] %v5363_v44  }
  0xed   : > { %v459_v46 = vpop.f32.mrf.mxu3  ;;  %v5190_v47 = vld [vmem:[#allocation2 + $0x8] sm:$0xff]  ;;  %2020 = vperm.xlu1 %5572, %v6049_v31   ;;  %2025 = vperm.xlu2 %5570, %v6065_v38  }
  0xee   : > { %v622_v51 = vshrl.u32 %v5190_v47, 16  ;;  %v625_v52 = vshll.u32 %v5190_v47, 16  ;;  %v460_v59 = vadd.f32 %v6169_v9, %v459_v46  ;;  %v5221_v0 = vld [vmem:[#allocation2 + $0x4] sm:$0xff] }
  0xef   : > { %v451_v49 = vpop.f32.mrf.mxu0  ;;  %v1345_v6 = vshll.u32 %v5221_v0, 16  ;;  %v1343_v18 = vshrl.u32 %v5221_v0, 16  ;;  %v5205_v33 = vld [vmem:[#allocation2 + $0x4] sm:$0xff] }
  0xf0   : > { %v452_v53 = vadd.f32 %v6169_v9, %v451_v49  ;;  %v624_v56 = vrot.slane %v622_v51, 3  ;;  %v627_v57 = vrot.slane %v625_v52, 4  ;;  %v490_v1 = vmax.f32 %v460_v59, 0.0 }
  0xf1   : > { %v1347_v15 = vrot.slane %v1345_v6, 1 }
  0xf2   : > { %v487_v60 = vmax.f32 %v452_v53, 0.0  ;;  %v628_v61 = vor.u32 %v627_v57, %v624_v56 }
  0xf3   : > { %v5192_v3 = vld [vmem:[#allocation2 + $0x18] sm:$0xff]  ;;  %v1348_v29 = vor.u32 %v1347_v15, %v1343_v18 }
  0xf4   : > { %v5358_v62 = vpack.c.bf16 %v487_v60, %v486_v58  ;;  %v629_v23 = vsel %vm612_vm0, %v620_v55, %v628_v61  ;;  %v640_v8 = vshrl.u32 %v5192_v3, 16  ;;  %v643_v11 = vshll.u32 %v5192_v3, 16  ;;  %v6242_v55 = vpop.permute.xlu2 %836  ;;  %v1526_v18 = vld [vmem:[%s6013_s29 + $0x58] sm:$0xff] }
  0xf5   : > { %v461_v63 = vpop.f32.mrf.mxu3  ;;  %757 = vmatmul.bf16.vlgmr.msrb.gmra.mxu0 %v629_v23  ;;  %1588 = vperm.xlu0 %5567, %v1526_v18  }
  0xf6   : > { %5431 = vst [vmem:[#allocation2 + $0x10] sm:$0xff] %v5358_v62   ;;  %v462_v2 = vadd.f32 %v6169_v9, %v461_v63  ;;  %1888 = vmatpush.bf16.msrb.mxu0 %v5252_v4  ;;  %v642_v19 = vrot.slane %v640_v8, 3  ;;  %v645_v27 = vrot.slane %v643_v11, 4  ;;  %v5245_v63 = vld [vmem:[%s7322_s3 + $0xc0] sm:$0xff] }
  0xf8   : > { %v491_v5 = vmax.f32 %v462_v2, 0.0  ;;  %v646_v43 = vor.u32 %v645_v27, %v642_v19  ;;  %v6256_v2 = vpop.permute.xlu1 %826 }
  0xfa   : > { %v5368_v7 = vpack.c.bf16 %v491_v5, %v490_v1  ;;  %1889 = vmatpush.bf16.msrb.mxu0 %v5251_v10  ;;  %v7326_v1 = vmov 5  }
  0xfb   : > { %5573 = vset.pattern.permute.xlu1 %v7326_v1  ;;  %5574 = vset.pattern.permute.xlu2 %v7326_v1 }
  0xfc   : > { %5433 = vst [vmem:[#allocation2 + $0x20] sm:$0xff] %v5368_v7   ;;  %2591 = vperm.xlu1 %5573, %v6052_v32   ;;  %v6262_v8 = vpop.permute.xlu2 %841  ;;  %2596 = vperm.xlu2 %5574, %v6068_v39  }
  0xfd   : > { %v464_v16 = vpop.f32.mrf.mxu3  ;;  %v5207_v12 = vld [vmem:[#allocation2 + $0x14] sm:$0xff]  ;;  %v5222_v13 = vld [vmem:[#allocation2 + $0xc] sm:$0xff] }
  0xfe   : > { %v5191_v17 = vld [vmem:[#allocation2 + $0x10] sm:$0xff]  ;;  %1073 = vmatmul.bf16.vlgmr.msra.gmra.mxu2 %v5207_v12  ;;  %v1350_v20 = vshll.u32 %v5222_v13, 16  ;;  %1890 = vmatpush.bf16.msrb.mxu0 %v5250_v24  ;;  %v465_v37 = vadd.f32 %v6169_v9, %v464_v16  ;;  %v1354_v31 = vshrl.u32 %v5222_v13, 16  ;;  %v5264_v24 = vld [vmem:[%s7322_s3 + $0x118] sm:$0xff] }
  0xff   : > { %v631_v21 = vshrl.u32 %v5191_v17, 16  ;;  %v634_v22 = vshll.u32 %v5191_v17, 16  ;;  %v6237_v49 = vld [vmem:[#allocation2 + $0x14] sm:$0xff]  ;;  %2230 = vmatpush.bf16.msrb.mxu1 %v5264_v24 }
 0x100   : > { %v1352_v34 = vrot.slane %v1350_v20, 1  ;;  %v492_v47 = vmax.f32 %v465_v37, 0.0  ;;  %v1358_v58 = vshll.u32 %v6237_v49, 16  ;;  %v6270_v19 = vpop.permute.xlu1 %831  ;;  %v6276_v20 = vld [vmem:[%s6013_s29 + $0x18] sm:$0xff]  ;;  %v1362_v28 = vshrl.u32 %v6237_v49, 16  ;;  %v5238_v49 = vld [vmem:[#allocation2 + $0xc] sm:$0xff] }
 0x101   : > { %v633_v35 = vrot.slane %v631_v21, 3  ;;  %v636_v36 = vrot.slane %v634_v22, 4 }
 0x102   : > { %v1353_v41 = vsel %vm1341_vm1, %v1348_v29, %v1352_v34  ;;  %1891 = vmatpush.bf16.msrb.mxu0 %v5249_v25  ;;  %v1356_v62 = vor.u32 %v1354_v31, %v1352_v34  ;;  %v1360_v23 = vrot.slane %v1358_v58, 1  ;;  %v5284_v29 = vld [vmem:[%s7322_s3 + $0x178] sm:$0xff]  ;;  %v5262_v31 = vld [vmem:[%s7322_s3 + $0x108] sm:$0xff] }
 0x103   : > { %v637_v42 = vor.u32 %v636_v36, %v633_v35  ;;  %1474 = vmatmul.bf16.vlgmr.msrb.gmra.mxu3 %v1353_v41  ;;  %v5193_v46 = vld [vmem:[#allocation2 + $0x20] sm:$0xff]  ;;  %v5263_v35 = vld [vmem:[%s7322_s3 + $0x110] sm:$0xff]  ;;  %v6294_v41 = vpop.permute.xlu0 %816  ;;  %2524 = vmatpush.bf16.msrb.mxu2 %v5284_v29 }
 0x104   : > { %v649_v51 = vshrl.u32 %v5193_v46, 16  ;;  %v652_v52 = vshll.u32 %v5193_v46, 16  ;;  %v5208_v57 = vld [vmem:[#allocation2 + $0x1c] sm:$0xff]  ;;  %v1361_v4 = vsel %vm1341_vm1, %v1356_v62, %v1360_v23  ;;  %2606 = vperm.xlu1 %5573, %v6276_v20   ;;  %v6286_v34 = vpop.permute.xlu2 %856  ;;  %v1364_v36 = vor.u32 %v1362_v28, %v1360_v23  ;;  %2231 = vmatpush.bf16.msrb.mxu1 %v5263_v35  ;;  %v5237_v46 = vld [vmem:[#allocation2 + $0x4] sm:$0xf0] }
 0x105   : > { %v466_v44 = vpop.f32.mrf.mxu3  ;;  %v638_v26 = vsel %vm612_vm0, %v628_v61, %v637_v42  ;;  %v647_v45 = vsel %vm612_vm0, %v637_v42, %v646_v43  ;;  %v5246_v61 = vld [vmem:[%s7322_s3 + $0xc8] sm:$0xff]  ;;  %v6265_v16 = vld [vmem:[#allocation2 + $0x1c] sm:$0xff]  ;;  %v1529_v42 = vld [vmem:[%s6013_s29 + $0x70] sm:$0xff]  ;;  %v1764_v62 = vshll.u32 %v5238_v49, 16 }
 0x106   : > { %v467_v48 = vadd.f32 %v6169_v9, %v466_v44  ;;  %762 = vmatmul.bf16.gmra.mxu0 %v638_v26  ;;  %767 = vmatmul.bf16.vlgmr.msra.gmra.mxu1 %v647_v45  ;;  %v651_v59 = vrot.slane %v649_v51, 3  ;;  %v654_v60 = vrot.slane %v652_v52, 4  ;;  %v1366_v17 = vshll.u32 %v6265_v16, 16  ;;  %v6299_v44 = vld [vmem:[%s6013_s29 + $0x28] sm:$0xff]  ;;  %v4649_v26 = vld [vmem:[#allocation2 + $0x4] sm:$0x8] }
 0x107   : > { %1892 = vmatpush.bf16.msrb.mxu0 %v5248_v50  ;;  %v5206_v45 = vld [vmem:[#allocation2 + $0xc] sm:$0xff]  ;;  %1603 = vperm.xlu0 %5567, %v1529_v42   ;;  %v6310_v51 = vld [vmem:[%s6013_s29 + $0x20] sm:$0xff]  ;;  %v1370_v18 = vshrl.u32 %v6265_v16, 16 }
 0x108   : > { %v493_v14 = vmax.f32 %v467_v48, 0.0  ;;  %v655_v0 = vor.u32 %v654_v60, %v651_v59  ;;  %v6280_v25 = vrot.slane %v1366_v17, 1  ;;  %v6312_v52 = vpop.permute.xlu1 %851  ;;  %2611 = vperm.xlu2 %5574, %v6310_v51   ;;  %2232 = vmatpush.bf16.msrb.mxu1 %v5262_v31  ;;  %v6342_v17 = vld [vmem:[%s6013_s29 + $0x30] sm:$0xff] }
 0x10a   : > { %v5373_v53 = vpack.c.bf16 %v493_v14, %v492_v47  ;;  %v656_v6 = vsel %vm612_vm0, %v646_v43, %v655_v0  ;;  %v1369_v39 = vsel %vm1341_vm1, %v1364_v36, %v6280_v25  ;;  %v5283_v47 = vld [vmem:[%s7322_s3 + $0x170] sm:$0xff] }
 0x10b   : > { %1893 = vmatpush.bf16.msrb.mxu0 %v5247_v54  ;;  %2525 = vmatpush.bf16.msrb.mxu2 %v5283_v47  ;;  %v5239_v47 = vld [vmem:[#allocation2 + $0x14] sm:$0xff] }
 0x10c   : > { %5434 = vst [vmem:[#allocation2 + $0x28] sm:$0xff] %v5373_v53   ;;  %2616 = vperm.xlu1 %5573, %v6299_v44  }
 0x10d   : > { %v469_v56 = vpop.f32.mrf.mxu3 }
 0x10e   : > { %1078 = vmatmul.bf16.gmra.mxu2 %v5208_v57  ;;  %v470_v3 = vadd.f32 %v6169_v9, %v469_v56  ;;  %v4650_v56 = vor.u32 %v5237_v46, %v4649_v26  ;;  %v5282_v57 = vld [vmem:[%s7322_s3 + $0x168] sm:$0xff] }
 0x10f   : > { %1894 = vmatpush.bf16.msrb.mxu0 %v5246_v61  ;;  %v1761_v61 = vshrl.u32 %v5238_v49, 16  ;;  %2526 = vmatpush.bf16.msrb.mxu2 %v5282_v57 }
 0x110   : > { %v494_v10 = vmax.f32 %v470_v3, 0.0  ;;  %v6330_v3 = vld [vmem:[%s6013_s29 + $0x8] sm:$0xff]  ;;  %5571 = vset.pattern.permute.xlu0 %v5833_v40  ;;  %2621 = vperm.xlu2 %5574, %v6342_v17  }
 0x111   : > { %1960 = vperm.xlu0 %5571, %v6330_v3  }
 0x113   : > { %1479 = vmatmul.bf16.gmra.mxu3 %v1361_v4  ;;  %1895 = vmatpush.bf16.msrb.mxu0 %v5245_v63  ;;  %v5194_v7 = vld [vmem:[#allocation2 + $0x28] sm:$0xff]  ;;  %v6324_v63 = vpop.permute.xlu2 %871 }
 0x114   : > { %v658_v12 = vshrl.u32 %v5194_v7, 16  ;;  %v661_v13 = vshll.u32 %v5194_v7, 16  ;;  %v5209_v22 = vld [vmem:[#allocation2 + $0x24] sm:$0xff]  ;;  %7340 = vst [vmem:[#allocation17_spill] sm:$0xff] %v6324_v63 }
 0x115   : > { %v471_v5 = vpop.f32.mrf.mxu3  ;;  %v6315_v30 = vld [vmem:[#allocation2 + $0x24] sm:$0xff] }
 0x116   : > { %v472_v11 = vadd.f32 %v6169_v9, %v471_v5  ;;  %772 = vmatmul.bf16.gmra.mxu1 %v656_v6  ;;  %1063 = vmatmul.bf16.vlgmr.msra.gmra.mxu0 %v5205_v33  ;;  %v660_v38 = vrot.slane %v658_v12, 3  ;;  %v663_v27 = vrot.slane %v661_v13, 4  ;;  %v1374_v4 = vshll.u32 %v6315_v30, 16  ;;  %v6333_v6 = vpop.permute.xlu0 %821  ;;  %v5281_v7 = vld [vmem:[%s7322_s3 + $0x160] sm:$0xff] }
 0x117   : > { %v1753_v33 = vshrl.u32 %v4650_v56, 16  ;;  %v1756_v5 = vshll.u32 %v4650_v56, 16  ;;  %v1763_v13 = vrot.slane %v1761_v61, 3  ;;  %2527 = vmatpush.bf16.msrb.mxu2 %v5281_v7  ;;  %v5300_v56 = vld [vmem:[%s7322_s3 + $0x1b8] sm:$0xff] }
 0x118   : > { %v495_v32 = vmax.f32 %v472_v11, 0.0  ;;  %v6292_v37 = vor.u32 %v663_v27, %v660_v38  ;;  %v6345_v40 = vrot.slane %v1374_v4, 1  ;;  %v5280_v38 = vld [vmem:[%s7322_s3 + $0x158] sm:$0xff]  ;;  %v1372_v27 = vor.u32 %v1370_v18, %v6280_v25  ;;  %v5279_v25 = vld [vmem:[%s7322_s3 + $0x150] sm:$0xff]  ;;  %2946 = vmatpush.bf16.msra.mxu3 %v5300_v56  ;;  %v5277_v4 = vld [vmem:[%s7322_s3 + $0x140] sm:$0xff] }
 0x119   : > { %v1755_v24 = vrot.slane %v1753_v33, 3  ;;  %1985 = vperm.xlu0 %5571, %v6342_v17   ;;  %v7332_v18 = vmov 7  }
 0x11a   : > { %v5378_v15 = vpack.c.bf16 %v495_v32, %v494_v10  ;;  %v665_v50 = vsel %vm612_vm0, %v655_v0, %v6292_v37  ;;  %v6327_v0 = vld [vmem:[%s6013_s29 + $0x40] sm:$0xff]  ;;  %v1377_v35 = vsel %vm1341_vm1, %v1372_v27, %v6345_v40 }
 0x11b   : > { %2631 = vperm.xlu1 %5573, %v6327_v0   ;;  %v6361_v42 = vpop.permute.xlu2 %886  ;;  %2528 = vmatpush.bf16.msrb.mxu2 %v5280_v38 }
 0x11c   : > { %5435 = vst [vmem:[#allocation2 + $0x30] sm:$0xff] %v5378_v15   ;;  %v1766_v15 = vrot.slane %v1764_v62, 4 }
 0x11d   : > { %v474_v21 = vpop.f32.mrf.mxu3 }
 0x11e   : > { %1083 = vmatmul.bf16.gmra.mxu2 %v5209_v22  ;;  %v475_v43 = vadd.f32 %v6169_v9, %v474_v21  ;;  %v1758_v21 = vrot.slane %v1756_v5, 4  ;;  %v6347_v22 = vpop.permute.xlu1 %866  ;;  %v6356_v29 = vor.u32 %v1766_v15, %v1763_v13 }
 0x11f   : > { %2529 = vmatpush.bf16.msrb.mxu2 %v5279_v25 }
 0x120   : > { %v496_v53 = vmax.f32 %v475_v43, 0.0  ;;  %v1759_v36 = vor.u32 %v1758_v21, %v1755_v24  ;;  %v6364_v43 = vld [vmem:[%s6013_s29] sm:$0xff] }
 0x123   : > { %1484 = vmatmul.bf16.gmra.mxu3 %v1369_v39  ;;  %v5195_v14 = vld [vmem:[#allocation2 + $0x30] sm:$0xff] }
 0x124   : > { %v667_v59 = vshrl.u32 %v5195_v14, 16  ;;  %v670_v60 = vshll.u32 %v5195_v14, 16  ;;  %v5210_v11 = vld [vmem:[#allocation2 + $0x2c] sm:$0xff] }
 0x125   : > { %v476_v48 = vpop.f32.mrf.mxu3  ;;  %v6378_v14 = vld [vmem:[%s6013_s29 + $0x48] sm:$0xff] }
 0x126   : > { %v477_v54 = vadd.f32 %v6169_v9, %v476_v48  ;;  %777 = vmatmul.bf16.gmra.mxu1 %v665_v50  ;;  %1068 = vmatmul.bf16.gmra.mxu0 %v5206_v45  ;;  %v669_v32 = vrot.slane %v667_v59, 3  ;;  %v672_v12 = vrot.slane %v670_v60, 4  ;;  %v1768_v45 = vsel %vm612_vm0, %v1759_v36, %v6356_v29  ;;  %v6374_v48 = vpop.permute.xlu0 %846  ;;  %v6395_v61 = vpop.permute.xlu1 %881 }
 0x127   : > { %v7330_v50 = vmov 6   ;;  %2636 = vperm.xlu2 %5574, %v6378_v14   ;;  %v1770_v59 = vshrl.u32 %v5239_v47, 16  ;;  %v1773_v60 = vshll.u32 %v5239_v47, 16  ;;  %7341 = vst [vmem:[#allocation18_spill] sm:$0xff] %v6395_v61  ;;  %2000 = vperm.xlu0 %5571, %v6378_v14   ;;  %v5299_v47 = vld [vmem:[%s7322_s3 + $0x1b0] sm:$0xff] }
 0x128   : > { %v497_v58 = vmax.f32 %v477_v54, 0.0  ;;  %v6354_v28 = vor.u32 %v672_v12, %v669_v32  ;;  %5576 = vset.pattern.permute.xlu1 %v7330_v50  ;;  %v6385_v54 = vld [vmem:[#allocation2 + $0x2c] sm:$0xff]  ;;  %v6402_v32 = vpop.permute.xlu2 %1127  ;;  %v1378_v12 = vshrl.u32 %v6315_v30, 16  ;;  %2947 = vmatpush.bf16.msra.mxu3 %v5299_v47 }
 0x129   : > { %3013 = vperm.xlu1 %5576, %v6364_v43  }
 0x12a   : > { %v5383_v23 = vpack.c.bf16 %v497_v58, %v496_v53  ;;  %v674_v26 = vsel %vm612_vm0, %v6292_v37, %v6354_v28  ;;  %v5261_v37 = vld [vmem:[%s7322_s3 + $0x100] sm:$0xff]  ;;  %v1380_v24 = vor.u32 %v1378_v12, %v6345_v40  ;;  %v5316_v40 = vld [vmem:[%s7322_s3 + $0x1f8] sm:$0xff]  ;;  %v5269_v12 = vld [vmem:[#allocation2 + $0x8] sm:$0xff] }
 0x12b   : > { %2233 = vmatpush.bf16.msrb.mxu1 %v5261_v37  ;;  %3284 = vmatpush.bf16.msra.mxu0 %v5316_v40  ;;  %v6462_v40 = vld [vmem:[#allocation2 + $0x10] sm:$0xff] }
 0x12c   : > { %5436 = vst [vmem:[#allocation2 + $0x38] sm:$0xff] %v5383_v23   ;;  %v1382_v23 = vshll.u32 %v6385_v54, 16  ;;  %v2408_v47 = vshll.u32 %v6462_v40, 16 }
 0x12d   : > { %v479_v10 = vpop.f32.mrf.mxu3 }
 0x12e   : > { %1088 = vmatmul.bf16.gmra.mxu2 %v5210_v11  ;;  %v480_v16 = vadd.f32 %v6169_v9, %v479_v10  ;;  %v1772_v10 = vrot.slane %v1770_v59, 3  ;;  %v1775_v11 = vrot.slane %v1773_v60, 4  ;;  %v1384_v13 = vrot.slane %v1382_v23, 1  ;;  %v6405_v15 = vpop.permute.xlu0 %861 }
 0x12f   : > { %5577 = vset.pattern.permute.xlu2 %v7330_v50 }
 0x130   : > { %v498_v49 = vmax.f32 %v480_v16, 0.0  ;;  %v6412_v38 = vor.u32 %v1775_v11, %v1772_v10  ;;  %3018 = vperm.xlu2 %5577, %v6330_v3   ;;  %v1385_v30 = vsel %vm1341_vm1, %v1380_v24, %v1384_v13  ;;  %v6417_v16 = vpop.permute.xlu1 %1122  ;;  %v1952_v10 = vld [vmem:[%s6013_s29 + $0x78] sm:$0xff]  ;;  %v5297_v11 = vld [vmem:[%s7322_s3 + $0x1a0] sm:$0xff] }
 0x131   : > { %5578 = vset.pattern.permute.xlu1 %v7332_v18 }
 0x132   : > { %3356 = vperm.xlu1 %5578, %v6330_v3   ;;  %v1777_v25 = vsel %vm612_vm0, %v6356_v29, %v6412_v38  ;;  %v7328_v29 = vmov 8  }
 0x133   : > { %1489 = vmatmul.bf16.gmra.mxu3 %v1377_v35  ;;  %v5196_v46 = vld [vmem:[#allocation2 + $0x38] sm:$0xff] }
 0x134   : > { %v676_v31 = vshrl.u32 %v5196_v46, 16  ;;  %v679_v58 = vshll.u32 %v5196_v46, 16  ;;  %v5211_v33 = vld [vmem:[#allocation2 + $0x34] sm:$0xff]  ;;  %v1949_v46 = vld [vmem:[%s6013_s29 + $0x60] sm:$0xff] }
 0x135   : > { %v481_v39 = vpop.f32.mrf.mxu3  ;;  %2015 = vperm.xlu0 %5571, %v1949_v46   ;;  %v5241_v46 = vld [vmem:[#allocation2 + $0x24] sm:$0xff] }
 0x136   : > { %v482_v53 = vadd.f32 %v6169_v9, %v481_v39  ;;  %782 = vmatmul.bf16.gmra.mxu1 %v674_v26  ;;  %1896 = vmatmul.bf16.vlgmr.msrb.gmra.mxu0 %v1768_v45  ;;  %v5278_v9 = vld [vmem:[%s7322_s3 + $0x148] sm:$0xff]  ;;  %v678_v5 = vrot.slane %v676_v31, 3  ;;  %v681_v7 = vrot.slane %v679_v58, 4  ;;  %v5240_v39 = vld [vmem:[#allocation2 + $0x1c] sm:$0xff] }
 0x137   : > { %2530 = vmatpush.bf16.msrb.mxu2 %v5278_v9  ;;  %v5332_v45 = vld [vmem:[%s7322_s3 + $0x238] sm:$0xff]  ;;  %v1779_v56 = vshrl.u32 %v5240_v39, 16  ;;  %v6440_v9 = vpop.permute.xlu0 %876  ;;  %v5298_v31 = vld [vmem:[%s7322_s3 + $0x1a8] sm:$0xff] }
 0x138   : > { %v499_v57 = vmax.f32 %v482_v53, 0.0  ;;  %v6410_v21 = vor.u32 %v681_v7, %v678_v5  ;;  %3694 = vmatpush.bf16.msra.mxu1 %v5332_v45  ;;  %5579 = vset.pattern.permute.xlu2 %v7328_v29  ;;  %v3335_v7 = vld [vmem:[%s6013_s29 + $0x10] sm:$0xff] }
 0x139   : > { %3761 = vperm.xlu2 %5579, %v6364_v43   ;;  %v1781_v23 = vrot.slane %v1779_v56, 3  ;;  %2948 = vmatpush.bf16.msra.mxu3 %v5298_v31  ;;  %v1791_v31 = vshll.u32 %v5241_v46, 16 }
 0x13a   : > { %v5388_v62 = vpack.c.bf16 %v499_v57, %v498_v49  ;;  %v683_v36 = vsel %vm612_vm0, %v6354_v28, %v6410_v21  ;;  %v6435_v49 = vld [vmem:[#allocation2 + $0x34] sm:$0xff]  ;;  %v6437_v28 = vpop.permute.xlu2 %1142  ;;  %5580 = vset.pattern.permute.xlu1 %v7328_v29  ;;  %v1782_v57 = vshll.u32 %v5240_v39, 16 }
 0x13b   : > { %2531 = vmatpush.bf16.msrb.mxu2 %v5277_v4  ;;  %3766 = vperm.xlu1 %5580, %v6330_v3   ;;  %v1390_v58 = vshll.u32 %v6435_v49, 16  ;;  %v6449_v3 = vpop.permute.xlu1 %1137  ;;  %v5296_v39 = vld [vmem:[%s7322_s3 + $0x198] sm:$0xff] }
 0x13c   : > { %5437 = vst [vmem:[#allocation2 + $0x40] sm:$0xff] %v5388_v62   ;;  %v1784_v4 = vrot.slane %v1782_v57, 4  ;;  %v1788_v57 = vshrl.u32 %v5241_v46, 16 }
 0x13d   : > { %v1392_v5 = vrot.slane %v1390_v58, 1  ;;  %2030 = vperm.xlu0 %5571, %v1952_v10   ;;  %2949 = vmatpush.bf16.msra.mxu3 %v5297_v11  ;;  %v2401_v58 = vshrl.u32 %v5269_v12, 16  ;;  %v1793_v10 = vrot.slane %v1791_v31, 4 }
 0x13e   : > { %1093 = vmatmul.bf16.gmra.mxu2 %v5211_v33  ;;  %v1386_v33 = vshrl.u32 %v6385_v54, 16 }
 0x140   : > { %v1388_v24 = vor.u32 %v1386_v33, %v1384_v13  ;;  %v5315_v13 = vld [vmem:[%s7322_s3 + $0x1f0] sm:$0xff]  ;;  %v1790_v33 = vrot.slane %v1788_v57, 3  ;;  %v5330_v57 = vld [vmem:[%s7322_s3 + $0x228] sm:$0xff] }
 0x141   : > { %5581 = vset.pattern.permute.xlu2 %v7330_v50  ;;  %3285 = vmatpush.bf16.msra.mxu0 %v5315_v13 }
 0x142   : > { %v1393_v54 = vsel %vm1341_vm1, %v1388_v24, %v1392_v5  ;;  %3023 = vperm.xlu2 %5581, %v3335_v7   ;;  %2950 = vmatpush.bf16.msra.mxu3 %v5296_v39  ;;  %v1794_v39 = vor.u32 %v1793_v10, %v1790_v33 }
 0x143   : > { %v552_v27 = vld [vmem:[#allocation2 + $0x40] sm:$0xf]  ;;  %1494 = vmatmul.bf16.gmra.mxu3 %v1385_v30  ;;  %5584 = vset.pattern.permute.xlu1 %v7332_v18  ;;  %v6488_v56 = vpop.permute.xlu1 %1147 }
 0x144   : > { %v602_v35 = vunpack.c.l.b16 %v552_v27  ;;  %v5212_v59 = vld [vmem:[#allocation2 + $0x3c] sm:$0xff]  ;;  %v6457_v27 = vor.u32 %v1784_v4, %v1781_v23  ;;  %3361 = vperm.xlu1 %5584, %v3335_v7   ;;  %v5294_v4 = vld [vmem:[%s7322_s3 + $0x188] sm:$0xff] }
 0x145   : > { %5575 = vset.pattern.permute.xlu0 %v7326_v1 }
 0x146   : > { %787 = vmatmul.bf16.gmra.mxu1 %v683_v36  ;;  %1901 = vmatmul.bf16.gmra.mxu0 %v1777_v25  ;;  %v611_v26 = vpack.c.b16 %v602_v35, %v602_v35  ;;  %v6460_v35 = vpop.permute.xlu2 %1152  ;;  %v6465_v36 = vpop.permute.xlu0 %891  ;;  %v2403_v25 = vshll.u32 %v5269_v12, 16  ;;  %v1786_v45 = vsel %vm612_vm0, %v6412_v38, %v6457_v27 }
 0x147   : > { %7342 = vst [vmem:[#allocation19_spill] sm:$0xff] %v6465_v36  ;;  %2601 = vperm.xlu0 %5575, %v3335_v7   ;;  %v7347_v36 = vmov 8  }
 0x148   : > { %v685_v53 = vshrl.u32 %v611_v26, 16  ;;  %v688_v37 = vshll.u32 %v611_v26, 16  ;;  %v2405_v38 = vrot.slane %v2403_v25, 1  ;;  %v1280_v25 = vld [vmem:[#allocation2 + $0x44] sm:$0x1] }
 0x149   : > { %v1331_v46 = vunpack.c.l.b16 %v1280_v25 }
 0x14a   : > { %v687_v60 = vrot.slane %v685_v53, 3  ;;  %v690_v62 = vrot.slane %v688_v37, 4  ;;  %v5331_v53 = vld [vmem:[%s7322_s3 + $0x230] sm:$0xff]  ;;  %v6483_v37 = vld [vmem:[#allocation2 + $0x3c] sm:$0xff]  ;;  %v2406_v23 = vor.u32 %v2405_v38, %v2401_v58  ;;  %5585 = vset.pattern.permute.xlu2 %v7332_v18  ;;  %v5314_v38 = vld [vmem:[%s7322_s3 + $0x1e8] sm:$0xff] }
 0x14b   : > { %3695 = vmatpush.bf16.msra.mxu1 %v5331_v53  ;;  %3366 = vperm.xlu2 %5585, %v6276_v20   ;;  %v5242_v53 = vld [vmem:[#allocation2 + $0x2c] sm:$0xff]  ;;  %v1340_v58 = vpack.c.b16 %v1331_v46, %v1331_v46  ;;  %v1402_v25 = vshrl.u32 %v6483_v37, 16 }
 0x14c   : > { %v691_v30 = vor.u32 %v690_v62, %v687_v60  ;;  %5586 = vset.pattern.permute.xlu1 %v7328_v29  ;;  %v1398_v60 = vshll.u32 %v6483_v37, 16  ;;  %3286 = vmatpush.bf16.msra.mxu0 %v5314_v38  ;;  %v1800_v33 = vshll.u32 %v5242_v53, 16  ;;  %v6553_v37 = vld [vmem:[#allocation2 + $0x20] sm:$0xff]  ;;  %v4889_v38 = vld [vmem:[#allocation2 + $0x8] sm:$0x8] }
 0x14d   : > { %3771 = vperm.xlu1 %5586, %v3335_v7   ;;  %v1394_v7 = vshrl.u32 %v6435_v49, 16  ;;  %v5253_v49 = vld [vmem:[#allocation2 + $0x8] sm:$0xff] }
 0x14e   : > { %1098 = vmatmul.bf16.gmra.mxu2 %v5212_v59  ;;  %v692_v26 = vsel %vm612_vm0, %v6410_v21, %v691_v30  ;;  %v5295_v21 = vld [vmem:[%s7322_s3 + $0x190] sm:$0xff]  ;;  %v2410_v59 = vrot.slane %v2408_v47, 1  ;;  %v6493_v62 = vpop.permute.xlu2 %1167  ;;  %v6499_v11 = vpop.permute.xlu0 %1132  ;;  %v1400_v24 = vrot.slane %v1398_v60, 1  ;;  %v5293_v30 = vld [vmem:[%s7322_s3 + $0x180] sm:$0xff]  ;;  %v6515_v47 = vld [vmem:[#allocation2 + $0x18] sm:$0xff] }
 0x14f   : > { %2951 = vmatpush.bf16.msra.mxu3 %v5295_v21  ;;  %v1396_v13 = vor.u32 %v1394_v7, %v1392_v5  ;;  %v1795_v5 = vsel %vm612_vm0, %v6457_v27, %v1794_v39  ;;  %v2412_v27 = vshrl.u32 %v6462_v40, 16  ;;  %v2416_v60 = vshll.u32 %v6515_v47, 16  ;;  %3696 = vmatpush.bf16.msra.mxu1 %v5330_v57  ;;  %v5285_v57 = vld [vmem:[#allocation2 + $0x8] sm:$0xf0] }
 0x150   : > { %v2411_v12 = vsel %vm1341_vm1, %v2406_v23, %v2410_v59  ;;  %v6535_v23 = vld [vmem:[%s6013_s29 + $0x50] sm:$0xff]  ;;  %v1404_v46 = vor.u32 %v1402_v25, %v1400_v24  ;;  %v5329_v25 = vld [vmem:[%s7322_s3 + $0x220] sm:$0xff] }
 0x151   : > { %v2414_v10 = vor.u32 %v2412_v27, %v2410_v59  ;;  %v5286_v27 = vld [vmem:[#allocation2 + $0x10] sm:$0xff] }
 0x153   : > { %1499 = vmatmul.bf16.gmra.mxu3 %v1393_v54  ;;  %v6508_v54 = vld [vmem:[%s6013_s29 + $0x38] sm:$0xff]  ;;  %5587 = vset.pattern.permute.xlu2 %v7328_v29 }
 0x154   : > { %2952 = vmatpush.bf16.msra.mxu3 %v5294_v4  ;;  %2626 = vperm.xlu0 %5575, %v6508_v54   ;;  %v1797_v4 = vshrl.u32 %v5242_v53, 16 }
 0x155   : > { %5588 = vset.pattern.permute.xlu1 %v7330_v50  ;;  %3776 = vperm.xlu2 %5587, %v6276_v20  }
 0x156   : > { %792 = vmatmul.bf16.gmra.mxu1 %v692_v26  ;;  %1906 = vmatmul.bf16.gmra.mxu0 %v1786_v45  ;;  %v6511_v26 = vpop.permute.xlu1 %1162  ;;  %v1401_v45 = vsel %vm1341_vm1, %v1396_v13, %v1400_v24  ;;  %v6521_v21 = vpop.permute.xlu2 %1182  ;;  %v1799_v40 = vrot.slane %v1797_v4, 3  ;;  %v1802_v13 = vrot.slane %v1800_v33, 4  ;;  %v4890_v4 = vor.u32 %v5285_v57, %v4889_v38  ;;  %v5243_v33 = vld [vmem:[#allocation2 + $0x34] sm:$0xff] }
 0x157   : > { %3038 = vperm.xlu1 %5588, %v6299_v44   ;;  %v6529_v31 = vpop.permute.xlu0 %1157  ;;  %3697 = vmatpush.bf16.msra.mxu1 %v5329_v25  ;;  %v2420_v57 = vshrl.u32 %v6515_v47, 16 }
 0x158   : > { %2953 = vmatpush.bf16.msra.mxu3 %v5293_v30  ;;  %v2418_v30 = vrot.slane %v2416_v60, 1  ;;  %v5254_v60 = vld [vmem:[#allocation2 + $0x10] sm:$0xff] }
 0x15c   : > { %2641 = vperm.xlu0 %5575, %v6535_v23  }
 0x15d   : > { %5589 = vset.pattern.permute.xlu2 %v7332_v18 }
 0x15e   : > { %2532 = vmatmul.bf16.vlgmr.msrb.gmra.mxu2 %v2411_v12  ;;  %v1406_v12 = vshll.u32 %v1340_v58, 16  ;;  %v6538_v7 = vpop.permute.xlu1 %1177  ;;  %v6545_v59 = vpop.permute.xlu2 %1197  ;;  %3371 = vperm.xlu2 %5589, %v6310_v51  }
 0x15f   : > { %7343 = vst [vmem:[#allocation20_spill] sm:$0xff] %v6538_v7  ;;  %5590 = vset.pattern.permute.xlu1 %v7328_v29  ;;  %v6550_v53 = vpop.permute.xlu0 %1172 }
 0x160   : > { %3781 = vperm.xlu1 %5590, %v6310_v51   ;;  %7344 = vst [vmem:[#allocation21_spill] sm:$0xff] %v6545_v59 }
 0x163   : > { %1504 = vmatmul.bf16.gmra.mxu3 %v1401_v45  ;;  %v2419_v45 = vsel %vm1341_vm1, %v2414_v10, %v2418_v30 }
 0x164   : > { %5582 = vset.pattern.permute.xlu0 %v7330_v50 }
 0x165   : > { %3028 = vperm.xlu0 %5582, %v6276_v20   ;;  %v2424_v20 = vshll.u32 %v6553_v37, 16 }
 0x166   : > { %1911 = vmatmul.bf16.gmra.mxu0 %v1795_v5  ;;  %2234 = vmatmul.bf16.vlgmr.msrb.gmra.mxu1 %v5253_v49  ;;  %v1408_v49 = vrot.slane %v1406_v12, 1  ;;  %v6548_v5 = vor.u32 %v1802_v13, %v1799_v40  ;;  %v6562_v10 = vpop.permute.xlu1 %1192  ;;  %v5313_v12 = vld [vmem:[%s7322_s3 + $0x1e0] sm:$0xff]  ;;  %v2819_v40 = vshrl.u32 %v5286_v27, 16  ;;  %v2811_v13 = vshrl.u32 %v4890_v4, 16  ;;  %v6574_v38 = vpop.permute.xlu2 %1543 }
 0x167   : > { %5591 = vset.pattern.permute.xlu2 %v7328_v29  ;;  %3287 = vmatpush.bf16.msra.mxu0 %v5313_v12 }
 0x168   : > { %v1409_v58 = vsel %vm1341_vm1, %v1404_v46, %v1408_v49  ;;  %v1804_v51 = vsel %vm612_vm0, %v1794_v39, %v6548_v5  ;;  %5592 = vset.pattern.permute.xlu1 %v7330_v50  ;;  %v2822_v39 = vshll.u32 %v5286_v27, 16  ;;  %v1806_v46 = vshrl.u32 %v5243_v33, 16  ;;  %3786 = vperm.xlu2 %5591, %v6299_v44  }
 0x169   : > { %3043 = vperm.xlu1 %5592, %v6342_v17   ;;  %v1809_v49 = vshll.u32 %v5243_v33, 16  ;;  %v2813_v33 = vrot.slane %v2811_v13, 3  ;;  %v6596_v13 = vld [vmem:[#allocation2 + $0x28] sm:$0xff] }
 0x16a   : > { %v2824_v12 = vrot.slane %v2822_v39, 4  ;;  %v1808_v25 = vrot.slane %v1806_v46, 3 }
 0x16b   : > { %v1811_v29 = vrot.slane %v1809_v49, 4 }
 0x16d   : > { %5583 = vset.pattern.permute.xlu0 %v7332_v18  ;;  %v6593_v39 = vor.u32 %v1811_v29, %v1808_v25  ;;  %v5255_v29 = vld [vmem:[#allocation2 + $0x18] sm:$0xff] }
 0x16e   : > { %2537 = vmatmul.bf16.gmra.mxu2 %v2419_v45  ;;  %v2814_v45 = vshll.u32 %v4890_v4, 16  ;;  %3351 = vperm.xlu0 %5583, %v6364_v43   ;;  %v2422_v4 = vor.u32 %v2420_v57, %v2418_v30  ;;  %v6590_v50 = vpop.permute.xlu1 %1538  ;;  %v7346_v43 = vmov 6  }
 0x170   : > { %v2816_v1 = vrot.slane %v2814_v45, 4  ;;  %5593 = vset.pattern.permute.xlu2 %v7346_v43 }
 0x171   : > { %5595 = vset.pattern.permute.xlu1 %v7332_v18  ;;  %3048 = vperm.xlu2 %5593, %v6508_v54  }
 0x172   : > { %v6556_v24 = vpop.f32.mrf.mxu0  ;;  %3386 = vperm.xlu1 %5595, %v6508_v54  }
 0x173   : > { %1509 = vmatmul.bf16.gmra.mxu3 %v1409_v58  ;;  %v6577_v58 = vrot.slane %v2424_v20, 1 }
 0x175   : > { %v2427_v47 = vsel %vm1341_vm1, %v2422_v4, %v6577_v58 }
 0x176   : > { %1916 = vmatmul.bf16.gmra.mxu0 %v1804_v51  ;;  %2239 = vmatmul.bf16.gmra.mxu1 %v5254_v60  ;;  %v6582_v60 = vpop.permute.xlu0 %1187  ;;  %v2821_v51 = vrot.slane %v2819_v40, 3  ;;  %v2817_v40 = vor.u32 %v2816_v1, %v2813_v33  ;;  %v5244_v33 = vld [vmem:[#allocation2 + $0x3c] sm:$0xff] }
 0x177   : > { %7345 = vst [vmem:[#allocation22_spill] sm:$0xff] %v6582_v60  ;;  %3376 = vperm.xlu0 %5583, %v6299_v44   ;;  %v5328_v44 = vld [vmem:[%s7322_s3 + $0x218] sm:$0xff]  ;;  %v5311_v60 = vld [vmem:[%s7322_s3 + $0x1d0] sm:$0xff] }
 0x178   : > { %v6587_v20 = vor.u32 %v2824_v12, %v2821_v51  ;;  %v6606_v51 = vpop.permute.xlu2 %1553  ;;  %v1813_v12 = vsel %vm612_vm0, %v6548_v5, %v6593_v39  ;;  %3698 = vmatpush.bf16.msra.mxu1 %v5328_v44 }
 0x179   : > { %5596 = vset.pattern.permute.xlu2 %v7347_v36 }
 0x17a   : > { %v6580_v27 = vpop.f32.mrf.mxu0  ;;  %v2826_v57 = vsel %vm612_vm0, %v2817_v40, %v6587_v20  ;;  %5597 = vset.pattern.permute.xlu1 %v7346_v43  ;;  %3791 = vperm.xlu2 %5596, %v6342_v17  }
 0x17b   : > { %3053 = vperm.xlu1 %5597, %v6327_v0  }
 0x17e   : > { %2542 = vmatmul.bf16.gmra.mxu2 %v2427_v47  ;;  %v1534_v4 = vpop.permute.xlu0 %1533  ;;  %v2432_v47 = vshll.u32 %v6596_v13, 16 }
 0x17f   : > { %3381 = vperm.xlu0 %5583, %v6342_v17  }
 0x180   : > { %v6627_v18 = vrot.slane %v2432_v47, 1  ;;  %v6644_v63 = vpop.permute.xlu2 %1568 }
 0x181   : > { %v1074_v30 = vpop.f32.mrf.mxu2 }
 0x182   : > { %v1204_v45 = vmul.f32 %v6437_v28, %v1074_v30  ;;  %v5287_v28 = vld [vmem:[#allocation2 + $0x18] sm:$0xff]  ;;  %5598 = vset.pattern.permute.xlu2 %v7346_v43 }
 0x183   : > { %v6600_v46 = vpop.f32.mrf.mxu0  ;;  %v768_v49 = vpop.f32.mrf.mxu1  ;;  %2954 = vmatmul.bf16.vlgmr.msra.gmra.mxu3 %v2826_v57  ;;  %v2828_v5 = vshrl.u32 %v5287_v28, 16  ;;  %v1818_v57 = vshll.u32 %v5244_v33, 16  ;;  %3058 = vperm.xlu2 %5598, %v6378_v14  }
 0x184   : > { %v898_v1 = vmul.f32 %v6242_v55, %v768_v49  ;;  %v5312_v55 = vld [vmem:[%s7322_s3 + $0x1d8] sm:$0xff]  ;;  %v1815_v49 = vshrl.u32 %v5244_v33, 16 }
 0x185   : > { %3288 = vmatpush.bf16.msra.mxu0 %v5312_v55  ;;  %v2830_v44 = vrot.slane %v2828_v5, 3  ;;  %v1820_v47 = vrot.slane %v1818_v57, 4 }
 0x186   : > { %v6611_v25 = vadd.f32 %v1204_v45, %v898_v1  ;;  %1921 = vmatmul.bf16.gmra.mxu0 %v1813_v12  ;;  %2244 = vmatmul.bf16.gmra.mxu1 %v5255_v29  ;;  %v1475_v40 = vpop.f32.mrf.mxu3  ;;  %v2831_v45 = vshll.u32 %v5287_v28, 16  ;;  %v6624_v1 = vpop.permute.xlu1 %1548  ;;  %v2428_v12 = vshrl.u32 %v6553_v37, 16  ;;  %v1817_v37 = vrot.slane %v1815_v49, 3 }
 0x187   : > { %v6620_v30 = vmul.f32 %v1534_v4, %v1475_v40  ;;  %v7348_v49 = vmov 7   ;;  %5594 = vset.pattern.permute.xlu0 %v7346_v43 }
 0x188   : > { %v2430_v33 = vor.u32 %v2428_v12, %v6577_v58  ;;  %v2833_v59 = vrot.slane %v2831_v45, 4  ;;  %v6652_v5 = vor.u32 %v1820_v47, %v1817_v37  ;;  %5599 = vset.pattern.permute.xlu1 %v7348_v49  ;;  %v6655_v12 = vld [vmem:[#allocation2 + $0x30] sm:$0xff]  ;;  %v5256_v47 = vld [vmem:[#allocation2 + $0x20] sm:$0xff] }
 0x189   : > { %v1076_v29 = vpop.f32.mrf.mxu2  ;;  %3289 = vmatpush.bf16.msra.mxu0 %v5311_v60  ;;  %3391 = vperm.xlu1 %5599, %v6327_v0   ;;  %v894_v0 = vmul.f32 %v6294_v41, %v6556_v24  ;;  %v2440_v41 = vshll.u32 %v6655_v12, 16  ;;  %v5327_v24 = vld [vmem:[%s7322_s3 + $0x210] sm:$0xff] }
 0x18a   : > { %v1205_v4 = vmul.f32 %v6488_v56, %v1076_v29  ;;  %v2435_v56 = vsel %vm1341_vm1, %v2430_v33, %v6627_v18  ;;  %v1691_v29 = vld [vmem:[#allocation2 + $0x44] sm:$0xf]  ;;  %v6650_v58 = vor.u32 %v2833_v59, %v2830_v44  ;;  %3699 = vmatpush.bf16.msra.mxu1 %v5327_v24 }
 0x18b   : > { %v6631_v40 = vpop.f32.mrf.mxu0  ;;  %v770_v55 = vpop.f32.mrf.mxu1  ;;  %v1742_v45 = vunpack.c.l.b16 %v1691_v29  ;;  %v5288_v33 = vld [vmem:[#allocation2 + $0x20] sm:$0xff]  ;;  %5600 = vset.pattern.permute.xlu2 %v7348_v49 }
 0x18c   : > { %v899_v28 = vmul.f32 %v6262_v8, %v770_v55  ;;  %v6648_v8 = vpop.permute.xlu0 %1558  ;;  %v2835_v59 = vsel %vm612_vm0, %v6587_v20, %v6650_v58  ;;  %v1822_v20 = vsel %vm612_vm0, %v6593_v39, %v6652_v5 }
 0x18e   : > { %v6637_v61 = vadd.f32 %v1205_v4, %v899_v28  ;;  %v6646_v17 = vpop.f32.mrf.mxu3  ;;  %2547 = vmatmul.bf16.gmra.mxu2 %v2435_v56  ;;  %v5310_v4 = vld [vmem:[%s7322_s3 + $0x1c8] sm:$0xff]  ;;  %v6667_v44 = vpop.permute.xlu1 %1563  ;;  %v1751_v56 = vpack.c.b16 %v1742_v45, %v1742_v45  ;;  %v2837_v45 = vshrl.u32 %v5288_v33, 16 }
 0x18f   : > { %3290 = vmatpush.bf16.msra.mxu0 %v5310_v4  ;;  %v2840_v4 = vshll.u32 %v5288_v33, 16 }
 0x191   : > { %v1079_v57 = vpop.f32.mrf.mxu2  ;;  %5601 = vset.pattern.permute.xlu1 %v7347_v36 }
 0x192   : > { %v1206_v55 = vmul.f32 %v6460_v35, %v1079_v57  ;;  %3806 = vperm.xlu1 %5601, %v6378_v14   ;;  %v1612_v14 = vmul.f32 %v6590_v50, %v6646_v17  ;;  %v6723_v50 = vld [vmem:[#allocation2 + $0x38] sm:$0xff] }
 0x193   : > { %v773_v28 = vpop.f32.mrf.mxu1  ;;  %v1064_v60 = vpop.f32.mrf.mxu0  ;;  %2959 = vmatmul.bf16.gmra.mxu3 %v2835_v59  ;;  %v1827_v59 = vshll.u32 %v1751_v56, 16 }
 0x194   : > { %v900_v37 = vmul.f32 %v6374_v48, %v773_v28  ;;  %v1200_v35 = vmul.f32 %v6417_v16, %v1064_v60  ;;  %v5309_v48 = vld [vmem:[%s7322_s3 + $0x1c0] sm:$0xff]  ;;  %v6690_v28 = vpop.permute.xlu2 %1583  ;;  %v1824_v60 = vshrl.u32 %v1751_v56, 16  ;;  %v895_v56 = vmul.f32 %v6333_v6, %v6580_v27 }
 0x195   : > { %v2999_v16 = vld [vmem:[%s6013_s29 + $0x20] sm:$0xff]  ;;  %3291 = vmatpush.bf16.msra.mxu0 %v5309_v48  ;;  %7349 = vst [vmem:[#allocation23_spill] sm:$0xff] %v6690_v28  ;;  %v1829_v28 = vrot.slane %v1827_v59, 4 }
 0x196   : > { %v6677_v29 = vadd.f32 %v1206_v55, %v900_v37  ;;  %v1232_v57 = vadd.f32 %v1200_v35, %v894_v0  ;;  %1926 = vmatmul.bf16.gmra.mxu0 %v1822_v20  ;;  %2249 = vmatmul.bf16.gmra.mxu1 %v5256_v47  ;;  %v1480_v39 = vpop.f32.mrf.mxu3  ;;  %v2436_v37 = vshrl.u32 %v6596_v13, 16  ;;  %v6693_v35 = vrot.slane %v2440_v41, 1  ;;  %v6695_v47 = vpop.permute.xlu0 %1573 }
 0x197   : > { %3033 = vperm.xlu0 %5594, %v2999_v16   ;;  %v2839_v16 = vrot.slane %v2837_v45, 3  ;;  %v1826_v7 = vrot.slane %v1824_v60, 3  ;;  %v6721_v60 = vld [vmem:[%s6013_s29 + $0x58] sm:$0xff] }
 0x198   : > { %v6688_v55 = vadd.f32 %v6620_v30, %v1232_v57  ;;  %v2842_v30 = vrot.slane %v2840_v4, 4  ;;  %v3342_v57 = vld [vmem:[%s6013_s29 + $0x48] sm:$0xff]  ;;  %v2438_v24 = vor.u32 %v2436_v37, %v6627_v18 }
 0x199   : > { %v1081_v0 = vpop.f32.mrf.mxu2  ;;  %3396 = vperm.xlu2 %5600, %v3342_v57   ;;  %v1830_v27 = vor.u32 %v1829_v28, %v1826_v7  ;;  %v896_v7 = vmul.f32 %v6256_v2, %v6600_v46  ;;  %v1613_v57 = vmul.f32 %v6574_v38, %v1480_v39  ;;  %v2448_v2 = vshll.u32 %v6723_v50, 16 }
 0x19a   : > { %v1207_v33 = vmul.f32 %v6529_v31, %v1081_v0  ;;  %v6707_v31 = vpop.permute.xlu1 %1578  ;;  %5604 = vset.pattern.permute.xlu1 %v7346_v43 }
 0x19b   : > { %v775_v20 = vpop.f32.mrf.mxu1  ;;  %v1066_v48 = vpop.f32.mrf.mxu0  ;;  %3068 = vperm.xlu1 %5604, %v6721_v60  }
 0x19c   : > { %v901_v13 = vmul.f32 %v6312_v52, %v775_v20  ;;  %v1201_v41 = vmul.f32 %v6402_v32, %v1066_v48  ;;  %v2443_v52 = vsel %vm1341_vm1, %v2438_v24, %v6693_v35  ;;  %v6715_v32 = vor.u32 %v2842_v30, %v2839_v16  ;;  %v5289_v20 = vld [vmem:[#allocation2 + $0x28] sm:$0xff]  ;;  %v6730_v48 = vpop.permute.xlu2 %1598 }
 0x19d   : > { %v1831_v30 = vsel %vm612_vm0, %v6652_v5, %v1830_v27  ;;  %v2846_v46 = vshrl.u32 %v5289_v20, 16  ;;  %v7350_v24 = vmov 5   ;;  %v6763_v27 = vrot.slane %v2448_v2, 1 }
 0x19e   : > { %v6711_v45 = vadd.f32 %v1207_v33, %v901_v13  ;;  %v1233_v4 = vadd.f32 %v1201_v41, %v895_v56  ;;  %v1482_v6 = vpop.f32.mrf.mxu3  ;;  %2552 = vmatmul.bf16.gmra.mxu2 %v2443_v52  ;;  %v2844_v33 = vsel %vm612_vm0, %v6650_v58, %v6715_v32  ;;  %v6739_v58 = vpop.permute.xlu0 %1588  ;;  %v2849_v41 = vshll.u32 %v5289_v20, 16 }
 0x19f   : > { %3063 = vperm.xlu0 %5594, %v6535_v23   ;;  %v2444_v52 = vshrl.u32 %v6655_v12, 16  ;;  %v1614_v12 = vmul.f32 %v6624_v1, %v1482_v6 }
 0x1a0   : > { %v6718_v18 = vadd.f32 %v1612_v14, %v1233_v4 }
 0x1a1   : > { %v1084_v59 = vpop.f32.mrf.mxu2  ;;  %5602 = vset.pattern.permute.xlu2 %v7350_v24 }
 0x1a2   : > { %v1208_v17 = vmul.f32 %v6511_v26, %v1084_v59  ;;  %v5257_v26 = vld [vmem:[#allocation2 + $0x28] sm:$0xff]  ;;  %v6750_v5 = vpop.permute.xlu1 %1593  ;;  %2646 = vperm.xlu2 %5602, %v6721_v60  }
 0x1a3   : > { %v778_v0 = vpop.f32.mrf.mxu1  ;;  %v1069_v37 = vpop.f32.mrf.mxu0  ;;  %2964 = vmatmul.bf16.gmra.mxu3 %v2844_v33  ;;  %5606 = vset.pattern.permute.xlu1 %v7348_v49 }
 0x1a4   : > { %v902_v28 = vmul.f32 %v6286_v34, %v778_v0  ;;  %v1202_v16 = vmul.f32 %v6499_v11, %v1069_v37  ;;  %v5326_v34 = vld [vmem:[%s7322_s3 + $0x208] sm:$0xff]  ;;  %v2851_v0 = vrot.slane %v2849_v41, 4  ;;  %3406 = vperm.xlu1 %5606, %v6721_v60   ;;  %v1956_v33 = vpop.permute.xlu2 %1955  ;;  %v5258_v41 = vld [vmem:[#allocation2 + $0x30] sm:$0xff] }
 0x1a5   : > { %3700 = vmatpush.bf16.msra.mxu1 %v5326_v34  ;;  %v5290_v34 = vld [vmem:[#allocation2 + $0x30] sm:$0xff] }
 0x1a6   : > { %v6742_v56 = vadd.f32 %v1208_v17, %v902_v28  ;;  %v1234_v13 = vadd.f32 %v1202_v16, %v896_v7  ;;  %1931 = vmatmul.bf16.gmra.mxu0 %v1831_v30  ;;  %2254 = vmatmul.bf16.gmra.mxu1 %v5257_v26  ;;  %v1485_v11 = vpop.f32.mrf.mxu3  ;;  %v2848_v17 = vrot.slane %v2846_v46, 3  ;;  %v3751_v28 = vld [vmem:[%s6013_s29 + $0x40] sm:$0xff]  ;;  %v6777_v26 = vpop.permute.xlu0 %1603 }
 0x1a7   : > { %5603 = vset.pattern.permute.xlu0 %v7347_v36  ;;  %v1615_v38 = vmul.f32 %v6606_v51, %v1485_v11  ;;  %v6791_v30 = vld [vmem:[#allocation2 + $0x40] sm:$0xff] }
 0x1a8   : > { %3796 = vperm.xlu0 %5603, %v6508_v54   ;;  %v6755_v39 = vadd.f32 %v1613_v57, %v1234_v13  ;;  %v897_v54 = vmul.f32 %v6270_v19, %v6631_v40  ;;  %v6779_v19 = vor.u32 %v2851_v0, %v2848_v17  ;;  %v2855_v17 = vshrl.u32 %v5290_v34, 16 }
 0x1a9   : > { %v6758_v14 = vadd.f32 %v1615_v38, %v6611_v25  ;;  %v6760_v4 = vpop.f32.mrf.mxu2  ;;  %v2446_v25 = vor.u32 %v2444_v52, %v6693_v35  ;;  %v5301_v38 = vld [vmem:[#allocation2 + $0xc] sm:$0xff]  ;;  %v2858_v0 = vshll.u32 %v5290_v34, 16 }
 0x1aa   : > { %5605 = vset.pattern.permute.xlu2 %v7348_v49  ;;  %v6786_v1 = vpop.permute.xlu1 %1608  ;;  %v2853_v2 = vsel %vm612_vm0, %v6715_v32, %v6779_v19  ;;  %v5325_v32 = vld [vmem:[%s7322_s3 + $0x200] sm:$0xff]  ;;  %v2586_v34 = vld [vmem:[%s6013_s29 + $0x68] sm:$0xff] }
 0x1ab   : > { %v6765_v59 = vpop.f32.mrf.mxu1  ;;  %v1071_v51 = vpop.f32.mrf.mxu0  ;;  %v2451_v7 = vsel %vm1341_vm1, %v2446_v25, %v6763_v27  ;;  %3401 = vperm.xlu2 %5605, %v6535_v23   ;;  %3701 = vmatpush.bf16.msra.mxu1 %v5325_v32  ;;  %v5291_v32 = vld [vmem:[#allocation2 + $0x38] sm:$0xff] }
 0x1ac   : > { %v1203_v37 = vmul.f32 %v6449_v3, %v1071_v51  ;;  %5608 = vset.pattern.permute.xlu1 %v7350_v24 }
 0x1ae   : > { %v1235_v20 = vadd.f32 %v1203_v37, %v897_v54  ;;  %v1487_v16 = vpop.f32.mrf.mxu3  ;;  %2557 = vmatmul.bf16.gmra.mxu2 %v2451_v7  ;;  %v6812_v54 = vpop.permute.xlu2 %1970 }
 0x1af   : > { %v1616_v3 = vmul.f32 %v6648_v8, %v1487_v16  ;;  %v1961_v25 = vpop.permute.xlu0 %1960  ;;  %v2339_v16 = vld [vmem:[#allocation2 + $0x48] sm:$0x1] }
 0x1b0   : > { %3801 = vperm.xlu0 %5603, %v3751_v28   ;;  %v6783_v40 = vadd.f32 %v1614_v12, %v1235_v20  ;;  %v2452_v12 = vshrl.u32 %v6723_v50, 16  ;;  %v2857_v28 = vrot.slane %v2855_v17, 3 }
 0x1b1   : > { %v6789_v35 = vadd.f32 %v1616_v3, %v6637_v61  ;;  %v1089_v6 = vpop.f32.mrf.mxu2  ;;  %v6799_v61 = vld [vmem:[%s6013_s29 + $0x60] sm:$0xff] }
 0x1b2   : > { %v1210_v57 = vmul.f32 %v6550_v53, %v1089_v6  ;;  %v2456_v53 = vshll.u32 %v6791_v30, 16  ;;  %2651 = vperm.xlu1 %5608, %v6799_v61   ;;  %v1966_v3 = vpop.permute.xlu1 %1965 }
 0x1b3   : > { %v783_v13 = vpop.f32.mrf.mxu1  ;;  %v1897_v8 = vpop.f32.mrf.mxu0  ;;  %2969 = vmatmul.bf16.gmra.mxu3 %v2853_v2  ;;  %5607 = vset.pattern.permute.xlu2 %v7347_v36 }
 0x1b4   : > { %v904_v11 = vmul.f32 %v6347_v22, %v783_v13  ;;  %v2033_v46 = vmul.f32 %v1956_v33, %v1897_v8  ;;  %v2458_v20 = vrot.slane %v2456_v53, 1  ;;  %3811 = vperm.xlu2 %5607, %v6535_v23   ;;  %v2390_v13 = vunpack.c.l.b16 %v2339_v16 }
 0x1b6   : > { %v6802_v52 = vadd.f32 %v1210_v57, %v904_v11  ;;  %2259 = vmatmul.bf16.gmra.mxu1 %v5258_v41  ;;  %3292 = vmatmul.bf16.vlgmr.msra.gmra.mxu0 %v5301_v38  ;;  %v6809_v22 = vadd.f32 %v2033_v46, %v6688_v55  ;;  %v1490_v51 = vpop.f32.mrf.mxu3  ;;  %v2454_v57 = vor.u32 %v2452_v12, %v6763_v27  ;;  %v6839_v27 = vpop.permute.xlu2 %1980 }
 0x1b7   : > { %v1617_v37 = vmul.f32 %v6667_v44, %v1490_v51  ;;  %v2399_v46 = vpack.c.b16 %v2390_v13, %v2390_v13 }
 0x1b8   : > { %3816 = vperm.xlu0 %5603, %v6721_v60   ;;  %v2860_v60 = vrot.slane %v2858_v0, 4  ;;  %v5302_v0 = vld [vmem:[#allocation2 + $0x14] sm:$0xff] }
 0x1b9   : > { %v6818_v33 = vadd.f32 %v1617_v37, %v6677_v29  ;;  %v6820_v55 = vpop.f32.mrf.mxu2  ;;  %v2459_v29 = vsel %vm1341_vm1, %v2454_v57, %v2458_v20  ;;  %v6865_v57 = vld [vmem:[%s6013_s29 + $0x78] sm:$0xff] }
 0x1ba   : > { %v6831_v23 = vor.u32 %v2860_v60, %v2857_v28  ;;  %5610 = vset.pattern.permute.xlu1 %v7346_v43  ;;  %v1976_v37 = vpop.permute.xlu1 %1975  ;;  %v2867_v28 = vshll.u32 %v5291_v32, 16 }
 0x1bb   : > { %v6824_v7 = vpop.f32.mrf.mxu1  ;;  %v1899_v44 = vpop.f32.mrf.mxu0  ;;  %3073 = vperm.xlu1 %5610, %v6799_v61  }
 0x1bc   : > { %v2034_v6 = vmul.f32 %v1961_v25, %v1899_v44  ;;  %5609 = vset.pattern.permute.xlu2 %v7350_v24  ;;  %v2862_v53 = vsel %vm612_vm0, %v6779_v19, %v6831_v23  ;;  %v2864_v19 = vshrl.u32 %v5291_v32, 16 }
 0x1bd   : > { %2656 = vperm.xlu2 %5609, %v2586_v34  }
 0x1be   : > { %v6829_v8 = vadd.f32 %v2034_v6, %v6718_v18  ;;  %v1492_v50 = vpop.f32.mrf.mxu3  ;;  %2562 = vmatmul.bf16.gmra.mxu2 %v2459_v29 }
 0x1bf   : > { %v1618_v2 = vmul.f32 %v6644_v63, %v1492_v50  ;;  %v2869_v50 = vrot.slane %v2867_v28, 4 }
 0x1c0   : > { %5612 = vset.pattern.permute.xlu0 %v7348_v49 }
 0x1c1   : > { %3411 = vperm.xlu0 %5612, %v6799_v61   ;;  %v6842_v18 = vadd.f32 %v1618_v2, %v6711_v45  ;;  %v1094_v11 = vpop.f32.mrf.mxu2  ;;  %v5259_v45 = vld [vmem:[#allocation2 + $0x38] sm:$0xff] }
 0x1c2   : > { %v1212_v41 = vmul.f32 %v6521_v21, %v1094_v11  ;;  %v2464_v21 = vshll.u32 %v2399_v46, 16 }
 0x1c3   : > { %v788_v38 = vpop.f32.mrf.mxu1  ;;  %v1902_v63 = vpop.f32.mrf.mxu0  ;;  %2974 = vmatmul.bf16.gmra.mxu3 %v2862_v53  ;;  %5613 = vset.pattern.permute.xlu1 %v7348_v49 }
 0x1c4   : > { %v906_v51 = vmul.f32 %v6440_v9, %v788_v38  ;;  %v2035_v17 = vmul.f32 %v1966_v3, %v1902_v63  ;;  %v2460_v9 = vshrl.u32 %v6791_v30, 16  ;;  %3416 = vperm.xlu1 %5613, %v2586_v34   ;;  %v6871_v30 = vpop.permute.xlu2 %1995  ;;  %v6884_v63 = vpop.permute.xlu1 %1990 }
 0x1c5   : > { %5611 = vset.pattern.permute.xlu2 %v7346_v43 }
 0x1c6   : > { %v6850_v25 = vadd.f32 %v1212_v41, %v906_v51  ;;  %2264 = vmatmul.bf16.gmra.mxu1 %v5259_v45  ;;  %3297 = vmatmul.bf16.gmra.mxu0 %v5302_v0  ;;  %v6853_v12 = vadd.f32 %v2035_v17, %v6755_v39  ;;  %v1495_v44 = vpop.f32.mrf.mxu3  ;;  %v2462_v6 = vor.u32 %v2460_v9, %v2458_v20  ;;  %v2466_v39 = vrot.slane %v2464_v21, 1  ;;  %v5292_v51 = vld [vmem:[#allocation2 + $0x40] sm:$0xff] }
 0x1c7   : > { %v1619_v60 = vmul.f32 %v6695_v47, %v1495_v44  ;;  %v2866_v47 = vrot.slane %v2864_v19, 3  ;;  %v903_v20 = vmul.f32 %v6405_v15, %v6765_v59  ;;  %3078 = vperm.xlu2 %5611, %v2586_v34   ;;  %v5260_v45 = vld [vmem:[#allocation2 + $0x40] sm:$0xff]  ;;  %v2876_v44 = vshll.u32 %v5292_v51, 16 }
 0x1c8   : > { %v2467_v11 = vsel %vm1341_vm1, %v2462_v6, %v2466_v39  ;;  %v5303_v0 = vld [vmem:[#allocation2 + $0x1c] sm:$0xff]  ;;  %v7351_v19 = vld [vmem:[#allocation23_spill] sm:$0xff]  ;;  %v2587_v39 = vld [vmem:[%s6013_s29 + $0x70] sm:$0xff]  ;;  %s7238_s29 = scalar_lea.vmem [#allocation12], %s4368_s9  ;;  %s5349_s9 = sshll.u32 %s5896_s25, 7 }
 0x1c9   : > { %5617 = vset.pattern.permute.xlu0 %v7350_v24  ;;  %v6860_v16 = vadd.f32 %v1619_v60, %v6742_v56  ;;  %v6862_v3 = vpop.f32.mrf.mxu2  ;;  %v1209_v56 = vmul.f32 %v6493_v62, %v6760_v4  ;;  %v6882_v38 = vor.u32 %v2869_v50, %v2866_v47  ;;  %v2878_v50 = vrot.slane %v2876_v44, 4  ;;  %s4240_s18 = scalar_lea.hbm %s7325_s6, %s5349_s9  ;;  %s4241_s14 = sshll.u32 %s7238_s29, 4  ;;  %s4242_s14 = int_to_ptr.vmem [resolvable:$true] %s4241_s14 }
 0x1ca   : > { %2666 = vperm.xlu0 %5617, %v6865_v57   ;;  %s4243_s20 = sshll.u32 %s4240_s18, 4  ;;  %s4244_s20 = int_to_ptr.hbm [resolvable:$true] %s4243_s20 }
 0x1cb   : > { %v6867_v29 = vpop.f32.mrf.mxu1  ;;  %v1904_v13 = vpop.f32.mrf.mxu0  ;;  %v1241_v53 = vadd.f32 %v1209_v56, %v903_v20  ;;  %v2871_v32 = vsel %vm612_vm0, %v6831_v23, %v6882_v38  ;;  %v6917_v56 = vld [vmem:[#allocation2 + $0x14] sm:$0xff]  ;;  %v7352_v20 = vld [vmem:[#allocation20_spill] sm:$0xff]  ;;  %s5761_s25 = sshra.s32 %s4244_s20, 4  ;;  %s5762_s25 = int_to_ptr.hbm [resolvable:$true] %s5761_s25 }
 0x1cc   : > { %v2036_v2 = vmul.f32 %v6812_v54, %v1904_v13  ;;  %5615 = vset.pattern.permute.xlu1 %v7347_v36  ;;  %v6906_v9 = vpop.permute.xlu1 %2005  ;;  %s5763_s27 = scalar_lea.hbm %s5762_s25, 128  ;;  %p5768_p2 = scmp.lt.s32.totalorder %s5762_s25, %s7325_s6 }
 0x1cd   : > { %3826 = vperm.xlu1 %5615, %v2586_v34   ;;  %v5317_v34 = vld [vmem:[#allocation2 + $0xc] sm:$0xff]  ;;  %p5764_p4 = scmp.ne.s32.totalorder %s5762_s25, %s5763_s27 }
 0x1ce   : > { %v6880_v46 = vadd.f32 %v2036_v2, %v6783_v40  ;;  %v1497_v41 = vpop.f32.mrf.mxu3  ;;  %2567 = vmatmul.bf16.gmra.mxu2 %v2467_v11  ;;  %v3573_v60 = vshll.u32 %v5317_v34, 16  ;;  %v1211_v2 = vmul.f32 %v7352_v20, %v6820_v55 }
 0x1cf   : > { %v1620_v62 = vmul.f32 %v6707_v31, %v1497_v41  ;;  %5614 = vset.pattern.permute.xlu2 %v7347_v36  ;;  %p5765_p8 = pnand %p5764_p4, %p5957_p5 }
 0x1d0   : > { %3821 = vperm.xlu2 %5614, %v6799_v61  }
 0x1d1   : > { %v6888_v15 = vadd.f32 %v1620_v62, %v1241_v53  ;;  %v1099_v4 = vpop.f32.mrf.mxu2  ;;  %v2749_v53 = vld [vmem:[#allocation2 + $0x48] sm:$0xf]  ;;  %v3575_v62 = vrot.slane %v3573_v60, 1  ;;  %p5766_p7 = pneg %p5765_p8 }
 0x1d2   : > { %v1214_v59 = vmul.f32 %v6562_v10, %v1099_v4  ;;  %5622 = vset.pattern.permute.xlu0 %v7347_v36  ;;  %v6898_v10 = vpop.permute.xlu2 %2010  ;;  %v2800_v55 = vunpack.c.l.b16 %v2749_v53  ;;  %v5304_v60 = vld [vmem:[#allocation2 + $0x24] sm:$0xff] }
 0x1d3   : > { %v793_v54 = vpop.f32.mrf.mxu1  ;;  %v1907_v40 = vpop.f32.mrf.mxu0  ;;  %2979 = vmatmul.bf16.gmra.mxu3 %v2871_v32  ;;  %3831 = vperm.xlu0 %5622, %v2587_v39   ;;  %v3578_v32 = vshll.u32 %v6917_v56, 16 }
 0x1d4   : > { %v908_v17 = vmul.f32 %v6361_v42, %v793_v54  ;;  %v2037_v31 = vmul.f32 %v1976_v37, %v1907_v40  ;;  %v2873_v37 = vshrl.u32 %v5292_v51, 16  ;;  %v3571_v40 = vshrl.u32 %v5317_v34, 16 }
 0x1d5   : > { %5618 = vset.pattern.permute.xlu1 %v7346_v43  ;;  %v2809_v44 = vpack.c.b16 %v2800_v55, %v2800_v55 }
 0x1d6   : > { %v6900_v21 = vadd.f32 %v1214_v59, %v908_v17  ;;  %2269 = vmatmul.bf16.gmra.mxu1 %v5260_v45  ;;  %3302 = vmatmul.bf16.gmra.mxu0 %v5303_v0  ;;  %v6903_v23 = vadd.f32 %v2037_v31, %v6758_v14  ;;  %v1500_v42 = vpop.f32.mrf.mxu3  ;;  %v2875_v47 = vrot.slane %v2873_v37, 3  ;;  %v3576_v17 = vor.u32 %v3575_v62, %v3571_v40  ;;  %v1986_v31 = vpop.permute.xlu0 %1985  ;;  %v7354_v40 = vld [vmem:[#allocation22_spill] sm:$0xff] }
 0x1d7   : > { %v1621_v28 = vmul.f32 %v7351_v19, %v1500_v42  ;;  %3083 = vperm.xlu1 %5618, %v2587_v39   ;;  %v3580_v37 = vrot.slane %v3578_v32, 1  ;;  %v6942_v19 = vpop.permute.xlu1 %2020  ;;  %v2885_v20 = vshll.u32 %v2809_v44, 16  ;;  %v1213_v32 = vmul.f32 %v7354_v40, %v6862_v3 }
 0x1d8   : > { %5616 = vset.pattern.permute.xlu2 %v7350_v24  ;;  %v6928_v54 = vor.u32 %v2878_v50, %v2875_v47  ;;  %v2882_v50 = vshrl.u32 %v2809_v44, 16 }
 0x1d9   : > { %v6909_v6 = vadd.f32 %v1621_v28, %v6802_v52  ;;  %v6911_v61 = vpop.f32.mrf.mxu2  ;;  %v7353_v52 = vld [vmem:[#allocation17_spill] sm:$0xff]  ;;  %2661 = vperm.xlu2 %5616, %v2587_v39  }
 0x1da   : > { %v905_v11 = vmul.f32 %v7353_v52, %v6824_v7  ;;  %v6931_v51 = vpop.permute.xlu2 %2025  ;;  %v2880_v34 = vsel %vm612_vm0, %v6882_v38, %v6928_v54  ;;  %v2884_v62 = vrot.slane %v2882_v50, 3 }
 0x1db   : > { %v6915_v13 = vpop.f32.mrf.mxu1  ;;  %v1909_v14 = vpop.f32.mrf.mxu0 }
 0x1dc   : > { %v2038_v41 = vmul.f32 %v6839_v27, %v1909_v14  ;;  %v1243_v7 = vadd.f32 %v1211_v2, %v905_v11  ;;  %v3581_v14 = vsel %vm1341_vm1, %v3576_v17, %v3580_v37 }
 0x1de   : > { %v6926_v4 = vadd.f32 %v2038_v41, %v6789_v35  ;;  %v1502_v59 = vpop.f32.mrf.mxu3  ;;  %v5348_v35 = vld [vmem:[#allocation9 + $0x38] sm:$0xff] }
 0x1df   : > { %v1622_v27 = vmul.f32 %v6739_v58, %v1502_v59  ;;  %5620 = vset.pattern.permute.xlu1 %v7348_v49  ;;  %4115 = vmatpush.bf16.msra.mxu2 %v5348_v35  ;;  %v2887_v59 = vrot.slane %v2885_v20, 4 }
 0x1e0   : > { %3421 = vperm.xlu1 %5620, %v2587_v39  }
 0x1e1   : > { %v6934_v45 = vadd.f32 %v1622_v27, %v1243_v7  ;;  %v6936_v24 = vpop.f32.mrf.mxu2  ;;  %5619 = vset.pattern.permute.xlu2 %v7346_v43  ;;  %v7355_v43 = vld [vmem:[#allocation18_spill] sm:$0xff]  ;;  %v2888_v35 = vor.u32 %v2887_v59, %v2884_v62 }
 0x1e2   : > { %3088 = vperm.xlu2 %5619, %v6865_v57   ;;  %v2597_v52 = vpop.permute.xlu2 %2596 }
 0x1e3   : > { %v1912_v0 = vpop.f32.mrf.mxu0  ;;  %v2235_v42 = vpop.f32.mrf.mxu1  ;;  %2984 = vmatmul.bf16.gmra.mxu3 %v2880_v34 }
 0x1e4   : > { %v2039_v58 = vmul.f32 %v1986_v31, %v1912_v0  ;;  %v6945_v28 = vadd.f32 %v2235_v42, %v6809_v22  ;;  %v6954_v22 = vld [vmem:[#allocation2 + $0x1c] sm:$0xff] }
 0x1e5   : > { %v3586_v27 = vshll.u32 %v6954_v22, 16 }
 0x1e6   : > { %3307 = vmatmul.bf16.gmra.mxu0 %v5304_v60  ;;  %3702 = vmatmul.bf16.vlgmr.msra.gmra.mxu1 %v3581_v14  ;;  %v6949_v38 = vadd.f32 %v2039_v58, %v6818_v33  ;;  %v1505_v47 = vpop.f32.mrf.mxu3  ;;  %v2889_v60 = vsel %vm612_vm0, %v6928_v54, %v2888_v35 }
 0x1e7   : > { %v1623_v2 = vmul.f32 %v6750_v5, %v1505_v47  ;;  %v907_v5 = vmul.f32 %v7355_v43, %v6867_v29  ;;  %v3588_v0 = vrot.slane %v3586_v27, 1 }
 0x1e8   : > { %5623 = vset.pattern.permute.xlu1 %v7347_v36  ;;  %v2001_v36 = vpop.permute.xlu0 %2000 }
 0x1e9   : > { %v6957_v11 = vadd.f32 %v1623_v2, %v6850_v25  ;;  %v2535_v39 = vpop.f32.mrf.mxu2  ;;  %v6967_v25 = vpop.permute.xlu1 %2591  ;;  %3836 = vperm.xlu1 %5623, %v6865_v57   ;;  %v1245_v29 = vadd.f32 %v1213_v32, %v907_v5 }
 0x1ea   : > { %v2670_v41 = vmul.f32 %v2597_v52, %v2535_v39  ;;  %5621 = vset.pattern.permute.xlu2 %v7348_v49 }
 0x1eb   : > { %v1914_v53 = vpop.f32.mrf.mxu0  ;;  %v2237_v33 = vpop.f32.mrf.mxu1  ;;  %3426 = vperm.xlu2 %5621, %v6865_v57  }
 0x1ec   : > { %v2040_v55 = vmul.f32 %v6884_v63, %v1914_v53  ;;  %v2292_v7 = vadd.f32 %v2237_v33, %v6829_v8  ;;  %v3582_v8 = vshrl.u32 %v6917_v56, 16  ;;  %v5305_v56 = vld [vmem:[#allocation2 + $0x2c] sm:$0xff] }
 0x1ee   : > { %v6969_v17 = vadd.f32 %v2670_v41, %v2292_v7  ;;  %v6972_v31 = vadd.f32 %v2040_v55, %v6842_v18  ;;  %v1507_v3 = vpop.f32.mrf.mxu3  ;;  %v5347_v18 = vld [vmem:[#allocation9 + $0x30] sm:$0xff]  ;;  %v3584_v14 = vor.u32 %v3582_v8, %v3580_v37  ;;  %v7356_v41 = vld [vmem:[#allocation21_spill] sm:$0xff]  ;;  %v3590_v55 = vshrl.u32 %v6954_v22, 16 }
 0x1ef   : > { %v1624_v63 = vmul.f32 %v6730_v48, %v1507_v3  ;;  %4116 = vmatpush.bf16.msra.mxu2 %v5347_v18  ;;  %v5320_v37 = vld [vmem:[#allocation2 + $0x24] sm:$0xff]  ;;  %v1215_v53 = vmul.f32 %v7356_v41, %v6911_v61  ;;  %v5346_v3 = vld [vmem:[#allocation9 + $0x28] sm:$0xff] }
 0x1f0   : > { %v3589_v57 = vsel %vm1341_vm1, %v3584_v14, %v3588_v0  ;;  %v2016_v62 = vpop.permute.xlu0 %2015  ;;  %v3594_v40 = vshll.u32 %v5320_v37, 16  ;;  %v5306_v8 = vld [vmem:[#allocation2 + $0x34] sm:$0xff] }
 0x1f1   : > { %v6979_v42 = vadd.f32 %v1624_v63, %v1245_v29  ;;  %v6981_v34 = vpop.f32.mrf.mxu2  ;;  %v6993_v20 = vpop.permute.xlu1 %2606  ;;  %v3592_v29 = vor.u32 %v3590_v55, %v3588_v0 }
 0x1f2   : > { %v3596_v7 = vrot.slane %v3594_v40, 1 }
 0x1f3   : > { %v1917_v44 = vpop.f32.mrf.mxu0  ;;  %v2240_v58 = vpop.f32.mrf.mxu1  ;;  %2989 = vmatmul.bf16.gmra.mxu3 %v2889_v60  ;;  %4117 = vmatpush.bf16.msra.mxu2 %v5346_v3 }
 0x1f4   : > { %v2041_v48 = vmul.f32 %v6871_v30, %v1917_v44  ;;  %v6987_v49 = vadd.f32 %v2240_v58, %v6853_v12  ;;  %v6996_v30 = vpop.permute.xlu2 %2611  ;;  %v3597_v22 = vsel %vm1341_vm1, %v3592_v29, %v3596_v7  ;;  %v5321_v44 = vld [vmem:[#allocation2 + $0x2c] sm:$0xff] }
 0x1f6   : > { %3312 = vmatmul.bf16.gmra.mxu0 %v5305_v56  ;;  %3707 = vmatmul.bf16.gmra.mxu1 %v3589_v57  ;;  %v6991_v47 = vadd.f32 %v2041_v48, %v6860_v16  ;;  %v1510_v50 = vpop.f32.mrf.mxu3  ;;  %v7357_v16 = vld [vmem:[#allocation19_spill] sm:$0xff]  ;;  %v3602_v48 = vshll.u32 %v5321_v44, 16 }
 0x1f7   : > { %v1625_v54 = vmul.f32 %v6777_v26, %v1510_v50  ;;  %v909_v33 = vmul.f32 %v7357_v16, %v6915_v13  ;;  %v3598_v50 = vshrl.u32 %v5320_v37, 16 }
 0x1f9   : > { %v6999_v12 = vadd.f32 %v1625_v54, %v6900_v21  ;;  %v7001_v2 = vpop.f32.mrf.mxu2  ;;  %v1247_v43 = vadd.f32 %v1215_v53, %v909_v33  ;;  %v7015_v61 = vpop.permute.xlu1 %2616  ;;  %v3604_v54 = vrot.slane %v3602_v48, 1  ;;  %v3600_v16 = vor.u32 %v3598_v50, %v3596_v7  ;;  %v5307_v33 = vld [vmem:[#allocation2 + $0x3c] sm:$0xff] }
 0x1fb   : > { %v1919_v52 = vpop.f32.mrf.mxu0  ;;  %v2242_v39 = vpop.f32.mrf.mxu1 }
 0x1fc   : > { %v2042_v59 = vmul.f32 %v2001_v36, %v1919_v52  ;;  %v7008_v26 = vadd.f32 %v2242_v39, %v6880_v46  ;;  %v7028_v36 = vpop.permute.xlu0 %2030  ;;  %v5345_v39 = vld [vmem:[#allocation9 + $0x20] sm:$0xff] }
 0x1fd   : > { %4118 = vmatpush.bf16.msra.mxu2 %v5345_v39 }
 0x1fe   : > { %v7011_v32 = vadd.f32 %v2042_v59, %v6888_v15  ;;  %v1512_v21 = vpop.f32.mrf.mxu3 }
 0x1ff   : > { %v1626_v5 = vmul.f32 %v6786_v1, %v1512_v21  ;;  %v7025_v1 = vpop.permute.xlu2 %2621  ;;  %v5322_v21 = vld [vmem:[#allocation2 + $0x34] sm:$0xff] }
 0x201   : > { %v7017_v27 = vadd.f32 %v1626_v5, %v1247_v43  ;;  %v7019_v13 = vpop.f32.mrf.mxu2 }
 0x203   : > { %v1922_v46 = vpop.f32.mrf.mxu0  ;;  %v2245_v35 = vpop.f32.mrf.mxu1 }
 0x204   : > { %v2043_v15 = vmul.f32 %v6906_v9, %v1922_v46  ;;  %v7023_v63 = vadd.f32 %v2245_v35, %v6903_v23  ;;  %v7035_v23 = vpop.permute.xlu1 %2631  ;;  %v3610_v46 = vshll.u32 %v5322_v21, 16 }
 0x206   : > { %3317 = vmatmul.bf16.gmra.mxu0 %v5306_v8  ;;  %3712 = vmatmul.bf16.gmra.mxu1 %v3597_v22  ;;  %v7031_v18 = vadd.f32 %v2043_v15, %v6909_v6  ;;  %v7046_v6 = vpop.permute.xlu0 %2601  ;;  %v3612_v8 = vrot.slane %v3610_v46, 1  ;;  %v5344_v22 = vld [vmem:[#allocation9 + $0x18] sm:$0xff]  ;;  %v2955_v46 = vpop.f32.mrf.mxu3 }
 0x207   : > { %v7044_v57 = vpop.permute.xlu2 %2636  ;;  %4119 = vmatpush.bf16.msra.mxu2 %v5344_v22 }
 0x209   : > { %v7033_v0 = vpop.f32.mrf.mxu2 }
 0x20b   : > { %v1924_v9 = vpop.f32.mrf.mxu0  ;;  %v2247_v58 = vpop.f32.mrf.mxu1 }
 0x20c   : > { %v2044_v60 = vmul.f32 %v6898_v10, %v1924_v9  ;;  %v7039_v14 = vadd.f32 %v2247_v58, %v6926_v4  ;;  %v7054_v59 = vpop.permute.xlu1 %3013 }
 0x20e   : > { %v7042_v56 = vadd.f32 %v2044_v60, %v6934_v45  ;;  %v3605_v45 = vsel %vm1341_vm1, %v3600_v16, %v3604_v54  ;;  %v2627_v43 = vpop.permute.xlu0 %2626 }
 0x20f   : > { %v7059_v40 = vpop.permute.xlu2 %3018 }
 0x211   : > { %v7048_v52 = vpop.f32.mrf.mxu2 }
 0x213   : > { %v1927_v41 = vpop.f32.mrf.mxu0  ;;  %v2250_v53 = vpop.f32.mrf.mxu1 }
 0x214   : > { %v2045_v10 = vmul.f32 %v2016_v62, %v1927_v41  ;;  %v7051_v4 = vadd.f32 %v2250_v53, %v6949_v38  ;;  %v7066_v15 = vpop.permute.xlu1 %3356 }
 0x216   : > { %3322 = vmatmul.bf16.gmra.mxu0 %v5307_v33  ;;  %3717 = vmatmul.bf16.gmra.mxu1 %v3605_v45  ;;  %v7057_v37 = vadd.f32 %v2045_v10, %v6957_v11  ;;  %v3606_v11 = vshrl.u32 %v5321_v44, 16  ;;  %v5323_v44 = vld [vmem:[#allocation2 + $0x3c] sm:$0xff]  ;;  %v3614_v45 = vshrl.u32 %v5322_v21, 16 }
 0x217   : > { %v7068_v48 = vpop.permute.xlu2 %3761 }
 0x218   : > { %v3608_v60 = vor.u32 %v3606_v11, %v3604_v54 }
 0x219   : > { %v2550_v5 = vpop.f32.mrf.mxu2 }
 0x21a   : > { %v2676_v62 = vmul.f32 %v2627_v43, %v2550_v5  ;;  %v3613_v39 = vsel %vm1341_vm1, %v3608_v60, %v3612_v8  ;;  %v5343_v5 = vld [vmem:[#allocation9 + $0x10] sm:$0xff]  ;;  %v5342_v60 = vld [vmem:[#allocation9 + $0x8] sm:$0xff] }
 0x21b   : > { %v1929_v55 = vpop.f32.mrf.mxu0  ;;  %v2252_v38 = vpop.f32.mrf.mxu1  ;;  %4120 = vmatpush.bf16.msra.mxu2 %v5343_v5 }
 0x21c   : > { %v2046_v7 = vmul.f32 %v6942_v19, %v1929_v55  ;;  %v2298_v3 = vadd.f32 %v2252_v38, %v6972_v31  ;;  %v5308_v31 = vld [vmem:[#allocation2 + $0x44] sm:$0xff]  ;;  %v7076_v41 = vpop.permute.xlu1 %3766 }
 0x21e   : > { %v7063_v35 = vadd.f32 %v2676_v62, %v2298_v3  ;;  %v2078_v29 = vadd.f32 %v2046_v7, %v6979_v42  ;;  %v5324_v3 = vld [vmem:[#allocation2 + $0x44] sm:$0xff] }
 0x21f   : > { %v7082_v10 = vpop.permute.xlu2 %3023  ;;  %v3626_v22 = vshll.u32 %v5324_v3, 16  ;;  %4121 = vmatpush.bf16.msra.mxu2 %v5342_v60 }
 0x223   : > { %v1932_v9 = vpop.f32.mrf.mxu0  ;;  %v2255_v58 = vpop.f32.mrf.mxu1 }
 0x224   : > { %v2047_v50 = vmul.f32 %v6931_v51, %v1932_v9  ;;  %v7072_v19 = vadd.f32 %v2255_v58, %v6991_v47  ;;  %v3618_v47 = vshll.u32 %v5323_v44, 16  ;;  %v7085_v55 = vpop.permute.xlu1 %3361  ;;  %v3509_v58 = vld [vmem:[#allocation2 + $0x4c] sm:$0x1] }
 0x226   : > { %3327 = vmatmul.bf16.gmra.mxu0 %v5308_v31  ;;  %3722 = vmatmul.bf16.gmra.mxu1 %v3613_v39  ;;  %v2079_v42 = vadd.f32 %v2047_v50, %v6999_v12  ;;  %v3620_v43 = vrot.slane %v3618_v47, 1  ;;  %v3616_v12 = vor.u32 %v3614_v45, %v3612_v8  ;;  %v3622_v8 = vshrl.u32 %v5323_v44, 16 }
 0x227   : > { %v3628_v31 = vrot.slane %v3626_v22, 1 }
 0x228   : > { %v3624_v9 = vor.u32 %v3622_v8, %v3620_v43 }
 0x22b   : > { %v1934_v53 = vpop.f32.mrf.mxu0  ;;  %v2257_v54 = vpop.f32.mrf.mxu1 }
 0x22c   : > { %v2048_v16 = vmul.f32 %v7028_v36, %v1934_v53  ;;  %v7080_v51 = vadd.f32 %v2257_v54, %v7011_v32  ;;  %v3621_v36 = vsel %vm1341_vm1, %v3616_v12, %v3620_v43  ;;  %v7091_v32 = vpop.permute.xlu2 %3366  ;;  %v7096_v21 = vpop.permute.xlu1 %3771  ;;  %v3629_v53 = vsel %vm1341_vm1, %v3624_v9, %v3628_v31 }
 0x22d   : > { %v2957_v54 = vpop.f32.mrf.mxu3 }
 0x22e   : > { %v2080_v33 = vadd.f32 %v2048_v16, %v7017_v27 }
 0x233   : > { %v2260_v62 = vpop.f32.mrf.mxu1  ;;  %v3293_v11 = vpop.f32.mrf.mxu0 }
 0x234   : > { %v7088_v38 = vadd.f32 %v2260_v62, %v7031_v18  ;;  %v7098_v18 = vpop.permute.xlu2 %3776  ;;  %v7104_v16 = vpop.permute.xlu1 %3038 }
 0x235   : > { %v7110_v62 = vpop.permute.xlu0 %2641 }
 0x236   : > { %7358 = vst [vmem:[#allocation23_spill] sm:$0xff] %v7088_v38  ;;  %3727 = vmatmul.bf16.gmra.mxu1 %v3621_v36  ;;  %v2960_v36 = vpop.f32.mrf.mxu3  ;;  %v7137_v38 = vld [vmem:[#allocation10 + $0x1] ss:$0 sm:$0xff] }
 0x23b   : > { %v2262_v7 = vpop.f32.mrf.mxu1  ;;  %v3295_v44 = vpop.f32.mrf.mxu0 }
 0x23c   : > { %v7094_v27 = vadd.f32 %v2262_v7, %v7042_v56  ;;  %v3560_v56 = vunpack.c.l.b16 %v3509_v58  ;;  %v7106_v43 = vpop.permute.xlu2 %3371  ;;  %v7112_v22 = vpop.permute.xlu1 %3781 }
 0x23e   : > { %7359 = vst [vmem:[#allocation20_spill] sm:$0xff] %v7094_v27  ;;  %v3569_v47 = vpack.c.b16 %v3560_v56, %v3560_v56  ;;  %v3029_v56 = vpop.permute.xlu0 %3028 }
 0x240   : > { %v3634_v12 = vshll.u32 %v3569_v47, 16 }
 0x242   : > { %v3636_v8 = vrot.slane %v3634_v12, 1 }
 0x243   : > { %v2265_v50 = vpop.f32.mrf.mxu1  ;;  %v3298_v9 = vpop.f32.mrf.mxu0 }
 0x244   : > { %v7101_v39 = vadd.f32 %v2265_v50, %v7057_v37  ;;  %v3630_v37 = vshrl.u32 %v5324_v3, 16  ;;  %v7119_v3 = vpop.permute.xlu1 %3043 }
 0x246   : > { %7360 = vst [vmem:[#allocation17_spill] sm:$0xff] %v7101_v39  ;;  %3732 = vmatmul.bf16.gmra.mxu1 %v3629_v53  ;;  %v3632_v7 = vor.u32 %v3630_v37, %v3628_v31  ;;  %v7117_v53 = vpop.permute.xlu2 %3786  ;;  %v2669_v37 = vmul.f32 %v6967_v25, %v6936_v24  ;;  %v3092_v39 = vmul.f32 %v7059_v40, %v2957_v54 }
 0x247   : > { %v3430_v24 = vmul.f32 %v7066_v15, %v3295_v44 }
 0x248   : > { %v3637_v50 = vsel %vm1341_vm1, %v3632_v7, %v3636_v8  ;;  %v3091_v7 = vmul.f32 %v7054_v59, %v2955_v46  ;;  %v3124_v59 = vadd.f32 %v3092_v39, %v6969_v17  ;;  %v3093_v39 = vmul.f32 %v7082_v10, %v2960_v36 }
 0x24b   : > { %v2267_v45 = vpop.f32.mrf.mxu1  ;;  %v3300_v12 = vpop.f32.mrf.mxu0 }
 0x24c   : > { %v7108_v5 = vadd.f32 %v2267_v45, %v2078_v29  ;;  %v5341_v29 = vld [vmem:[#allocation9] sm:$0xff]  ;;  %v2962_v45 = vpop.f32.mrf.mxu3  ;;  %v7130_v27 = vpop.permute.xlu1 %3386 }
 0x24d   : > { %4122 = vmatpush.bf16.msra.mxu2 %v5341_v29 }
 0x24e   : > { %7361 = vst [vmem:[#allocation22_spill] sm:$0xff] %v7108_v5 }
 0x253   : > { %v2270_v58 = vpop.f32.mrf.mxu1 }
 0x254   : > { %v7114_v60 = vadd.f32 %v2270_v58, %v2079_v42  ;;  %v7125_v42 = vpop.permute.xlu2 %3048  ;;  %v3352_v58 = vpop.permute.xlu0 %3351 }
 0x255   : > { %v3429_v29 = vmul.f32 %v3352_v58, %v3293_v11  ;;  %v7143_v15 = vpop.permute.xlu1 %3053 }
 0x256   : > { %7362 = vst [vmem:[#allocation18_spill] sm:$0xff] %v7114_v60  ;;  %3737 = vmatmul.bf16.gmra.mxu1 %v3637_v50  ;;  %v2701_v50 = vadd.f32 %v2669_v37, %v6945_v28  ;;  %v2965_v60 = vpop.f32.mrf.mxu3  ;;  %v3462_v37 = vadd.f32 %v3430_v24, %v3124_v59  ;;  %v3094_v59 = vmul.f32 %v3029_v56, %v2962_v45 }
 0x258   : > { %v3123_v5 = vadd.f32 %v3091_v7, %v2701_v50 }
 0x25b   : > { %v2272_v47 = vpop.f32.mrf.mxu1 }
 0x25c   : > { %v7121_v31 = vadd.f32 %v2272_v47, %v2080_v33  ;;  %v3303_v47 = vpop.f32.mrf.mxu0  ;;  %v7134_v25 = vpop.permute.xlu2 %3791 }
 0x25d   : > { %v3377_v28 = vpop.permute.xlu0 %3376 }
 0x25e   : > { %7363 = vst [vmem:[#allocation21_spill] sm:$0xff] %v7121_v31  ;;  %v3461_v31 = vadd.f32 %v3429_v29, %v3123_v5  ;;  %v2967_v54 = vpop.f32.mrf.mxu3  ;;  %v2671_v5 = vmul.f32 %v7046_v6, %v6981_v34  ;;  %v3431_v29 = vmul.f32 %v7085_v55, %v3298_v9 }
 0x260   : > { %v2703_v50 = vadd.f32 %v2671_v5, %v6987_v49  ;;  %v3432_v49 = vmul.f32 %v7091_v32, %v3300_v12  ;;  %v2673_v32 = vmul.f32 %v6996_v30, %v7019_v13  ;;  %v3096_v30 = vmul.f32 %v7104_v16, %v2967_v54 }
 0x262   : > { %v3125_v6 = vadd.f32 %v3093_v39, %v2703_v50 }
 0x263   : > { %v3703_v8 = vpop.f32.mrf.mxu1 }
 0x264   : > { %v3839_v33 = vmul.f32 %v7068_v48, %v3703_v8  ;;  %v3305_v17 = vpop.f32.mrf.mxu0  ;;  %v7151_v24 = vpop.permute.xlu2 %3058 }
 0x265   : > { %v7153_v34 = vpop.permute.xlu0 %3381 }
 0x266   : > { %v3871_v46 = vadd.f32 %v3839_v33, %v3461_v31 }
 0x268   : > { %v3921_v58 = vadd.f32 %v7137_v38, %v3871_v46  ;;  %v2970_v46 = vpop.f32.mrf.mxu3 }
 0x26a   : > { %v3937_v31 = vmax.f32 %v3921_v58, 0.0 }
 0x26b   : > { %v3705_v11 = vpop.f32.mrf.mxu1 }
 0x26c   : > { %v3840_v40 = vmul.f32 %v7076_v41, %v3705_v11  ;;  %v2672_v41 = vmul.f32 %v6993_v20, %v7001_v2  ;;  %v3463_v11 = vadd.f32 %v3431_v29, %v3125_v6  ;;  %v7158_v20 = vpop.permute.xlu1 %3391  ;;  %v3308_v55 = vpop.f32.mrf.mxu0 }
 0x26e   : > { %v3872_v48 = vadd.f32 %v3840_v40, %v3462_v37  ;;  %v2704_v36 = vadd.f32 %v2672_v41, %v7008_v26  ;;  %v3034_v26 = vpop.permute.xlu0 %3033  ;;  %v3433_v41 = vmul.f32 %v7106_v43, %v3303_v47 }
 0x26f   : > { %v3095_v5 = vmul.f32 %v3034_v26, %v2965_v60 }
 0x270   : > { %v3922_v44 = vadd.f32 %v7137_v38, %v3872_v48  ;;  %v3126_v37 = vadd.f32 %v3094_v59, %v2704_v36 }
 0x272   : > { %v3938_v7 = vmax.f32 %v3922_v44, 0.0  ;;  %v3464_v40 = vadd.f32 %v3432_v49, %v3126_v37  ;;  %v2972_v44 = vpop.f32.mrf.mxu3 }
 0x273   : > { %v3708_v8 = vpop.f32.mrf.mxu1 }
 0x274   : > { %v5393_v33 = vpack.c.bf16 %v3938_v7, %v3937_v31  ;;  %v3841_v10 = vmul.f32 %v7096_v21, %v3708_v8  ;;  %v7162_v21 = vpop.permute.xlu2 %3396  ;;  %v2674_v8 = vmul.f32 %v7015_v61, %v7033_v0  ;;  %v7170_v50 = vpop.permute.xlu1 %3806 }
 0x275   : > { %v2553_v0 = vpop.f32.mrf.mxu2 }
 0x276   : > { %5438 = vst [vmem:[#allocation2 + $0x8] sm:$0xff] %v5393_v33   ;;  %v3873_v2 = vadd.f32 %v3841_v10, %v3463_v11  ;;  %v3310_v33 = vpop.f32.mrf.mxu0  ;;  %v2706_v60 = vadd.f32 %v2674_v8, %v7039_v14  ;;  %v3434_v10 = vmul.f32 %v3377_v28, %v3305_v17  ;;  %v2675_v14 = vmul.f32 %v7025_v1, %v7048_v52  ;;  %v7185_v17 = vpop.permute.xlu0 %3063 }
 0x277   : > { %v3098_v1 = vmul.f32 %v7125_v42, %v2972_v44 }
 0x278   : > { %v3923_v56 = vadd.f32 %v7137_v38, %v3873_v2  ;;  %v3128_v36 = vadd.f32 %v3096_v30, %v2706_v60 }
 0x27a   : > { %v3939_v39 = vmax.f32 %v3923_v56, 0.0  ;;  %v2975_v49 = vpop.f32.mrf.mxu3  ;;  %v3466_v43 = vadd.f32 %v3434_v10, %v3128_v36  ;;  %v2707_v56 = vadd.f32 %v2675_v14, %v7051_v4 }
 0x27b   : > { %v3710_v9 = vpop.f32.mrf.mxu1 }
 0x27c   : > { %v3842_v58 = vmul.f32 %v7098_v18, %v3710_v9  ;;  %v2705_v18 = vadd.f32 %v2673_v32, %v7023_v63  ;;  %v7176_v63 = vpop.permute.xlu2 %2646  ;;  %v7179_v2 = vpop.permute.xlu1 %3068  ;;  %v3097_v9 = vmul.f32 %v7119_v3, %v2970_v46  ;;  %v3436_v46 = vmul.f32 %v7130_v27, %v3310_v33 }
 0x27d   : > { %v5333_v48 = vld [vmem:[#allocation2 + $0x8] sm:$0xff]  ;;  %v2555_v32 = vpop.f32.mrf.mxu2 }
 0x27e   : > { %v3874_v45 = vadd.f32 %v3842_v58, %v3464_v40  ;;  %4123 = vmatmul.bf16.vlgmr.msra.gmra.mxu2 %v5333_v48  ;;  %v3127_v6 = vadd.f32 %v3095_v5, %v2705_v18  ;;  %v3313_v54 = vpop.f32.mrf.mxu0  ;;  %v3797_v18 = vpop.permute.xlu0 %3796 }
 0x280   : > { %v3924_v12 = vadd.f32 %v7137_v38, %v3874_v45  ;;  %v3465_v59 = vadd.f32 %v3433_v41, %v3127_v6  ;;  %v3435_v45 = vmul.f32 %v7153_v34, %v3308_v55 }
 0x282   : > { %v3940_v31 = vmax.f32 %v3924_v12, 0.0  ;;  %v3129_v12 = vadd.f32 %v3097_v9, %v2707_v56  ;;  %v2977_v52 = vpop.f32.mrf.mxu3 }
 0x283   : > { %v3713_v7 = vpop.f32.mrf.mxu1 }
 0x284   : > { %v5398_v29 = vpack.c.bf16 %v3940_v31, %v3939_v39  ;;  %v3843_v13 = vmul.f32 %v7112_v22, %v3713_v7  ;;  %v7194_v39 = vpop.permute.xlu1 %3406  ;;  %v3467_v3 = vadd.f32 %v3435_v45, %v3129_v12  ;;  %v3130_v7 = vadd.f32 %v3098_v1, %v7063_v35 }
 0x285   : > { %v2558_v6 = vpop.f32.mrf.mxu2  ;;  %v3099_v35 = vmul.f32 %v7143_v15, %v2975_v49 }
 0x286   : > { %5439 = vst [vmem:[#allocation2 + $0x10] sm:$0xff] %v5398_v29   ;;  %v3875_v61 = vadd.f32 %v3843_v13, %v3465_v59  ;;  %v3315_v31 = vpop.f32.mrf.mxu0  ;;  %v3468_v55 = vadd.f32 %v3436_v46, %v3130_v7 }
 0x288   : > { %v3925_v16 = vadd.f32 %v7137_v38, %v3875_v61  ;;  %v2678_v61 = vmul.f32 %v7044_v57, %v2555_v32 }
 0x28a   : > { %v3941_v40 = vmax.f32 %v3925_v16, 0.0  ;;  %v2980_v30 = vpop.f32.mrf.mxu3  ;;  %v2710_v15 = vadd.f32 %v2678_v61, %v7080_v51  ;;  %v2679_v51 = vmul.f32 %v7110_v62, %v2558_v6 }
 0x28b   : > { %v3715_v11 = vpop.f32.mrf.mxu1 }
 0x28c   : > { %v3844_v47 = vmul.f32 %v7117_v53, %v3715_v11  ;;  %v7188_v53 = vpop.permute.xlu2 %3401  ;;  %v7201_v33 = vpop.permute.xlu1 %2651  ;;  %v3437_v11 = vmul.f32 %v7158_v20, %v3313_v54 }
 0x28d   : > { %v5334_v37 = vld [vmem:[#allocation2 + $0x10] sm:$0xff]  ;;  %v2560_v14 = vpop.f32.mrf.mxu2 }
 0x28e   : > { %v3876_v22 = vadd.f32 %v3844_v47, %v3466_v43  ;;  %4128 = vmatmul.bf16.gmra.mxu2 %v5334_v37  ;;  %v3318_v59 = vpop.f32.mrf.mxu0  ;;  %v3802_v47 = vpop.permute.xlu0 %3801 }
 0x290   : > { %v3926_v28 = vadd.f32 %v7137_v38, %v3876_v22  ;;  %v3438_v22 = vmul.f32 %v7162_v21, %v3315_v31  ;;  %v3439_v31 = vmul.f32 %v7188_v53, %v3318_v59 }
 0x292   : > { %v3942_v58 = vmax.f32 %v3926_v28, 0.0 }
 0x293   : > { %v3718_v48 = vpop.f32.mrf.mxu1 }
 0x294   : > { %v5403_v26 = vpack.c.bf16 %v3942_v58, %v3941_v40  ;;  %v3845_v5 = vmul.f32 %v7134_v25, %v3718_v48  ;;  %v3812_v41 = vpop.permute.xlu2 %3811  ;;  %v2677_v25 = vmul.f32 %v7035_v23, %v2553_v0  ;;  %v3100_v0 = vmul.f32 %v7151_v24, %v2977_v52  ;;  %v3074_v57 = vpop.permute.xlu1 %3073 }
 0x295   : > { %v2563_v1 = vpop.f32.mrf.mxu2 }
 0x296   : > { %5440 = vst [vmem:[#allocation2 + $0x18] sm:$0xff] %v5403_v26   ;;  %v3877_v4 = vadd.f32 %v3845_v5, %v3467_v3  ;;  %v2709_v36 = vadd.f32 %v2677_v25, %v7072_v19  ;;  %v3132_v28 = vadd.f32 %v3100_v0, %v2710_v15  ;;  %v2982_v19 = vpop.f32.mrf.mxu3  ;;  %v3320_v58 = vpop.f32.mrf.mxu0  ;;  %v3101_v26 = vmul.f32 %v7185_v17, %v2980_v30  ;;  %v7364_v5 = vld [vmem:[#allocation23_spill] sm:$0xff]  ;;  %v7366_v0 = vld [vmem:[#allocation17_spill] sm:$0xff] }
 0x297   : > { %v2711_v3 = vadd.f32 %v2679_v51, %v7364_v5 }
 0x298   : > { %v3927_v42 = vadd.f32 %v7137_v38, %v3877_v4  ;;  %v3131_v23 = vadd.f32 %v3099_v35, %v2709_v36  ;;  %v3470_v20 = vadd.f32 %v3438_v22, %v3132_v28 }
 0x299   : > { %v3133_v62 = vadd.f32 %v3101_v26, %v2711_v3 }
 0x29a   : > { %v3943_v13 = vmax.f32 %v3927_v42, 0.0  ;;  %v3469_v49 = vadd.f32 %v3437_v11, %v3131_v23 }
 0x29b   : > { %v3720_v34 = vpop.f32.mrf.mxu1  ;;  %v3471_v42 = vadd.f32 %v3439_v31, %v3133_v62 }
 0x29c   : > { %v3846_v8 = vmul.f32 %v3797_v18, %v3720_v34  ;;  %v2657_v16 = vpop.permute.xlu2 %2656  ;;  %v3417_v4 = vpop.permute.xlu1 %3416  ;;  %v3102_v34 = vmul.f32 %v7179_v2, %v2982_v19 }
 0x29d   : > { %v5335_v29 = vld [vmem:[#allocation2 + $0x18] sm:$0xff]  ;;  %v3817_v18 = vpop.permute.xlu0 %3816  ;;  %v2565_v35 = vpop.f32.mrf.mxu2 }
 0x29e   : > { %v3878_v44 = vadd.f32 %v3846_v8, %v3468_v55  ;;  %4133 = vmatmul.bf16.gmra.mxu2 %v5335_v29  ;;  %v2985_v46 = vpop.f32.mrf.mxu3  ;;  %v3323_v17 = vpop.f32.mrf.mxu0  ;;  %v7365_v8 = vld [vmem:[#allocation20_spill] sm:$0xff]  ;;  %v2682_v15 = vmul.f32 %v2657_v16, %v2565_v35 }
 0x29f   : > { %v3103_v11 = vmul.f32 %v3074_v57, %v2985_v46 }
 0x2a0   : > { %v3928_v27 = vadd.f32 %v7137_v38, %v3878_v44  ;;  %v3440_v44 = vmul.f32 %v7194_v39, %v3320_v58 }
 0x2a2   : > { %v3944_v60 = vmax.f32 %v3928_v27, 0.0 }
 0x2a3   : > { %v3723_v10 = vpop.f32.mrf.mxu1 }
 0x2a4   : > { %v5408_v43 = vpack.c.bf16 %v3944_v60, %v3943_v13  ;;  %v3847_v37 = vmul.f32 %v3802_v47, %v3723_v10  ;;  %v3079_v21 = vpop.permute.xlu2 %3078  ;;  %v3827_v10 = vpop.permute.xlu1 %3826 }
 0x2a5   : > { %v3412_v36 = vpop.permute.xlu0 %3411 }
 0x2a6   : > { %5441 = vst [vmem:[#allocation2 + $0x20] sm:$0xff] %v5408_v43   ;;  %v3879_v9 = vadd.f32 %v3847_v37, %v3469_v49  ;;  %v2987_v60 = vpop.f32.mrf.mxu3  ;;  %v3325_v39 = vpop.f32.mrf.mxu0  ;;  %v3441_v49 = vmul.f32 %v3412_v36, %v3323_v17 }
 0x2a7   : > { %v3104_v19 = vmul.f32 %v3079_v21, %v2987_v60 }
 0x2a8   : > { %v3929_v24 = vadd.f32 %v7137_v38, %v3879_v9 }
 0x2aa   : > { %v3945_v32 = vmax.f32 %v3929_v24, 0.0 }
 0x2ab   : > { %v3725_v40 = vpop.f32.mrf.mxu1 }
 0x2ac   : > { %v3848_v54 = vmul.f32 %v7170_v50, %v3725_v40  ;;  %v2680_v50 = vmul.f32 %v7176_v63, %v2560_v14  ;;  %v3822_v63 = vpop.permute.xlu2 %3821  ;;  %v2568_v40 = vpop.f32.mrf.mxu2 }
 0x2ad   : > { %v5336_v48 = vld [vmem:[#allocation2 + $0x20] sm:$0xff]  ;;  %v3084_v57 = vpop.permute.xlu1 %3083  ;;  %v2667_v24 = vpop.permute.xlu0 %2666 }
 0x2ae   : > { %v3880_v56 = vadd.f32 %v3848_v54, %v3470_v20  ;;  %4138 = vmatmul.bf16.gmra.mxu2 %v5336_v48  ;;  %v2712_v29 = vadd.f32 %v2680_v50, %v7365_v8  ;;  %v2990_v54 = vpop.f32.mrf.mxu3  ;;  %v3442_v48 = vmul.f32 %v3417_v4, %v3325_v39 }
 0x2af   : > { %v3105_v31 = vmul.f32 %v3084_v57, %v2990_v54 }
 0x2b0   : > { %v3930_v45 = vadd.f32 %v7137_v38, %v3880_v56  ;;  %v3134_v6 = vadd.f32 %v3102_v34, %v2712_v29 }
 0x2b2   : > { %v3946_v12 = vmax.f32 %v3930_v45, 0.0  ;;  %v3472_v27 = vadd.f32 %v3440_v44, %v3134_v6  ;;  %v3328_v45 = vpop.f32.mrf.mxu0 }
 0x2b3   : > { %v3728_v52 = vpop.f32.mrf.mxu1 }
 0x2b4   : > { %v5413_v7 = vpack.c.bf16 %v3946_v12, %v3945_v32  ;;  %v3849_v55 = vmul.f32 %v3812_v41, %v3728_v52  ;;  %v2681_v41 = vmul.f32 %v7201_v33, %v2563_v1  ;;  %v2662_v14 = vpop.permute.xlu2 %2661  ;;  %v7367_v33 = vld [vmem:[#allocation22_spill] sm:$0xff]  ;;  %v2570_v50 = vpop.f32.mrf.mxu2 }
 0x2b5   : > { %v2714_v20 = vadd.f32 %v2682_v15, %v7367_v33  ;;  %v2683_v5 = vmul.f32 %v2662_v14, %v2568_v40  ;;  %v3422_v46 = vpop.permute.xlu1 %3421  ;;  %v3832_v62 = vpop.permute.xlu0 %3831  ;;  %v2684_v8 = vmul.f32 %v2667_v24, %v2570_v50  ;;  %v7232_v15 = vld [vmem:[#allocation10 + $0x2] ss:$0 sm:$0xff] }
 0x2b6   : > { %5442 = vst [vmem:[#allocation2 + $0x28] sm:$0xff] %v5413_v7   ;;  %v3881_v25 = vadd.f32 %v3849_v55, %v3471_v42  ;;  %v2713_v37 = vadd.f32 %v2681_v41, %v7366_v0  ;;  %v2992_v7 = vpop.f32.mrf.mxu3  ;;  %v7368_v55 = vld [vmem:[#allocation18_spill] sm:$0xff]  ;;  %v3443_v29 = vmul.f32 %v3422_v46, %v3328_v45 }
 0x2b7   : > { %v3136_v56 = vadd.f32 %v3104_v19, %v2714_v20  ;;  %v2715_v17 = vadd.f32 %v2683_v5, %v7368_v55 }
 0x2b8   : > { %v3931_v59 = vadd.f32 %v7137_v38, %v3881_v25  ;;  %v3135_v28 = vadd.f32 %v3103_v11, %v2713_v37 }
 0x2b9   : > { %v3474_v16 = vadd.f32 %v3442_v48, %v3136_v56  ;;  %v3137_v25 = vadd.f32 %v3105_v31, %v2715_v17  ;;  %v4171_v17 = vld [vmem:[%s5991_s11 + $0x38] sm:$0xff] }
 0x2ba   : > { %v3947_v43 = vmax.f32 %v3931_v59, 0.0  ;;  %v3473_v58 = vadd.f32 %v3441_v49, %v3135_v28  ;;  %v3330_v6 = vpop.f32.mrf.mxu0 }
 0x2bb   : > { %v3730_v30 = vpop.f32.mrf.mxu1  ;;  %v3475_v35 = vadd.f32 %v3443_v29, %v3137_v25 }
 0x2bc   : > { %v3850_v53 = vmul.f32 %v3817_v18, %v3730_v30  ;;  %v3089_v12 = vpop.permute.xlu2 %3088 }
 0x2bd   : > { %v5337_v13 = vld [vmem:[#allocation2 + $0x28] sm:$0xff]  ;;  %v3837_v60 = vpop.permute.xlu1 %3836 }
 0x2be   : > { %v3882_v2 = vadd.f32 %v3850_v53, %v3472_v27  ;;  %4143 = vmatmul.bf16.gmra.mxu2 %v5337_v13  ;;  %v7369_v27 = vld [vmem:[#allocation21_spill] sm:$0xff] }
 0x2bf   : > { %v2716_v53 = vadd.f32 %v2684_v8, %v7369_v27 }
 0x2c0   : > { %v3932_v61 = vadd.f32 %v7137_v38, %v3882_v2 }
 0x2c2   : > { %v3948_v47 = vmax.f32 %v3932_v61, 0.0 }
 0x2c3   : > { %v3733_v23 = vpop.f32.mrf.mxu1 }
 0x2c4   : > { %v5418_v22 = vpack.c.bf16 %v3948_v47, %v3947_v43  ;;  %v3851_v9 = vmul.f32 %v3822_v63, %v3733_v23  ;;  %v3427_v44 = vpop.permute.xlu2 %3426  ;;  %v3106_v63 = vmul.f32 %v3089_v12, %v2992_v7  ;;  %v4168_v12 = vld [vmem:[%s5991_s11 + $0x20] sm:$0xff] }
 0x2c5   : > { %v3444_v13 = vmul.f32 %v3427_v44, %v3330_v6  ;;  %v4172_v6 = vld [vmem:[%s5991_s11 + $0x40] sm:$0xff] }
 0x2c6   : > { %5443 = vst [vmem:[#allocation2 + $0x30] sm:$0xff] %v5418_v22   ;;  %v3883_v51 = vadd.f32 %v3851_v9, %v3473_v58  ;;  %v3138_v59 = vadd.f32 %v3106_v63, %v2716_v53  ;;  %v4164_v22 = vld [vmem:[%s5991_s11] sm:$0xff]  ;;  %v4165_v9 = vld [vmem:[%s5991_s11 + $0x8] sm:$0xff]  ;;  %v4166_v58 = vld [vmem:[%s5991_s11 + $0x10] sm:$0xff] }
 0x2c7   : > { %v4173_v53 = vld [vmem:[%s5991_s11 + $0x48] sm:$0xff] }
 0x2c8   : > { %v3933_v21 = vadd.f32 %v7137_v38, %v3883_v51  ;;  %v3476_v41 = vadd.f32 %v3444_v13, %v3138_v59  ;;  %v4167_v51 = vld [vmem:[%s5991_s11 + $0x18] sm:$0xff] }
 0x2ca   : > { %v3949_v4 = vmax.f32 %v3933_v21, 0.0 }
 0x2cb   : > { %v3735_v26 = vpop.f32.mrf.mxu1 }
 0x2cc   : > { %v3852_v32 = vmul.f32 %v3827_v10, %v3735_v26 }
 0x2cd   : > { %v5338_v1 = vld [vmem:[#allocation2 + $0x30] sm:$0xff] }
 0x2ce   : > { %v3884_v52 = vadd.f32 %v3852_v32, %v3474_v16  ;;  %4148 = vmatmul.bf16.gmra.mxu2 %v5338_v1 }
 0x2d0   : > { %v3934_v3 = vadd.f32 %v7137_v38, %v3884_v52 }
 0x2d2   : > { %v3950_v18 = vmax.f32 %v3934_v3, 0.0  ;;  %v4169_v3 = vld [vmem:[%s5991_s11 + $0x28] sm:$0xff] }
 0x2d3   : > { %v3738_v34 = vpop.f32.mrf.mxu1 }
 0x2d4   : > { %v5423_v42 = vpack.c.bf16 %v3950_v18, %v3949_v4  ;;  %v3853_v30 = vmul.f32 %v3832_v62, %v3738_v34  ;;  %v4170_v4 = vld [vmem:[%s5991_s11 + $0x30] sm:$0xff] }
 0x2d6   : > { %5444 = vst [vmem:[#allocation2 + $0x38] sm:$0xff] %v5423_v42   ;;  %v3885_v2 = vadd.f32 %v3853_v30, %v3475_v35 }
 0x2d8   : > { %v3935_v39 = vadd.f32 %v7137_v38, %v3885_v2  ;;  %v4174_v2 = vld [vmem:[%s5991_s11 + $0x50] sm:$0xff] }
 0x2da   : > { %v3951_v47 = vmax.f32 %v3935_v39, 0.0  ;;  %v4175_v39 = vld [vmem:[%s5991_s11 + $0x58] sm:$0xff] }
 0x2db   : > { %v3740_v10 = vpop.f32.mrf.mxu1 }
 0x2dc   : > { %v3854_v36 = vmul.f32 %v3837_v60, %v3740_v10 }
 0x2dd   : > { %v5339_v61 = vld [vmem:[#allocation2 + $0x38] sm:$0xff] }
 0x2de   : > { %v3886_v11 = vadd.f32 %v3854_v36, %v3476_v41  ;;  %4153 = vmatmul.bf16.gmra.mxu2 %v5339_v61 }
 0x2e0   : > { %v3936_v43 = vadd.f32 %v7137_v38, %v3886_v11 }
 0x2e2   : > { %v3952_v23 = vmax.f32 %v3936_v43, 0.0 }
 0x2e4   : > { %v5428_v0 = vpack.c.bf16 %v3952_v23, %v3951_v47 }
 0x2e6   : > { %5445 = vst [vmem:[#allocation2 + $0x40] sm:$0xff] %v5428_v0   ;;  %v4176_v0 = vld [vmem:[%s5991_s11 + $0x60] sm:$0xff] }
 0x2ed   : > { %v5340_v37 = vld [vmem:[#allocation2 + $0x40] sm:$0xff] }
 0x2ee   : > { %4158 = vmatmul.bf16.gmra.mxu2 %v5340_v37 }
 0x301   : > { %v4124_v49 = vpop.f32.mrf.mxu2 }
 0x302   : > { %v4125_v14 = vadd.f32 %v7232_v15, %v4124_v49 }
 0x304   : > { %v4180_v28 = vadd.f32 %v4164_v22, %v4125_v14 }
 0x306   : > { %v4196_v19 = vmax.f32 %v4180_v28, 0.0  ;;  %v4177_v28 = vld [vmem:[%s5991_s11 + $0x68] sm:$0xff] }
 0x308   : > { %4212 = vst [vmem:[%s7238_s29] sm:$0xff] %v4196_v19 }
 0x309   : > { %v4126_v38 = vpop.f32.mrf.mxu2 }
 0x30a   : > { %v4127_v40 = vadd.f32 %v7232_v15, %v4126_v38 }
 0x30c   : > { %v4181_v33 = vadd.f32 %v4165_v9, %v4127_v40 }
 0x30e   : > { %v4197_v20 = vmax.f32 %v4181_v33, 0.0  ;;  %v4178_v33 = vld [vmem:[%s5991_s11 + $0x70] sm:$0xff] }
 0x310   : > { %4213 = vst [vmem:[%s7238_s29 + $0x8] sm:$0xff] %v4197_v20 }
 0x311   : > { %v4129_v54 = vpop.f32.mrf.mxu2 }
 0x312   : > { %v4130_v48 = vadd.f32 %v7232_v15, %v4129_v54 }
 0x314   : > { %v4182_v57 = vadd.f32 %v4166_v58, %v4130_v48 }
 0x316   : > { %v4198_v24 = vmax.f32 %v4182_v57, 0.0  ;;  %v4179_v57 = vld [vmem:[%s5991_s11 + $0x78] sm:$0xff]  ;;  %s5767_s11 = scalar_lea.hbm %s7325_s6, 512 }
 0x317   : > { %p5769_p9 = scmp.lt.s32.totalorder %s5767_s11, %s5763_s27 }
 0x318   : > { %4214 = vst [vmem:[%s7238_s29 + $0x10] sm:$0xff] %v4198_v24 }
 0x319   : > { %v4131_v56 = vpop.f32.mrf.mxu2  ;;  %p5770_p10 = por %p5769_p9, %p5768_p2 }
 0x31a   : > { %v4132_v45 = vadd.f32 %v7232_v15, %v4131_v56 }
 0x31b   : > { %p5771_p11 = pnand %p5770_p10, %p5766_p7 }
 0x31c   : > { %v4183_v26 = vadd.f32 %v4167_v51, %v4132_v45 }
 0x31e   : > { %v4199_v16 = vmax.f32 %v4183_v26, 0.0 }
 0x320   : > { %4215 = vst [vmem:[%s7238_s29 + $0x18] sm:$0xff] %v4199_v16 }
 0x321   : > { %v4134_v32 = vpop.f32.mrf.mxu2 }
 0x322   : > { %v4135_v1 = vadd.f32 %v7232_v15, %v4134_v32 }
 0x324   : > { %v4184_v21 = vadd.f32 %v4168_v12, %v4135_v1 }
 0x326   : > { %v4200_v52 = vmax.f32 %v4184_v21, 0.0 }
 0x328   : > { %4216 = vst [vmem:[%s7238_s29 + $0x20] sm:$0xff] %v4200_v52 }
 0x329   : > { %v4136_v5 = vpop.f32.mrf.mxu2 }
 0x32a   : > { %v4137_v50 = vadd.f32 %v7232_v15, %v4136_v5 }
 0x32c   : > { %v4185_v46 = vadd.f32 %v4169_v3, %v4137_v50 }
 0x32e   : > { %v4201_v31 = vmax.f32 %v4185_v46, 0.0 }
 0x330   : > { %4217 = vst [vmem:[%s7238_s29 + $0x28] sm:$0xff] %v4201_v31 }
 0x331   : > { %v4139_v7 = vpop.f32.mrf.mxu2 }
 0x332   : > { %v4140_v18 = vadd.f32 %v7232_v15, %v4139_v7 }
 0x334   : > { %v4186_v62 = vadd.f32 %v4170_v4, %v4140_v18 }
 0x336   : > { %v4202_v34 = vmax.f32 %v4186_v62, 0.0 }
 0x338   : > { %4218 = vst [vmem:[%s7238_s29 + $0x30] sm:$0xff] %v4202_v34 }
 0x339   : > { %v4141_v55 = vpop.f32.mrf.mxu2 }
 0x33a   : > { %v4142_v8 = vadd.f32 %v7232_v15, %v4141_v55 }
 0x33c   : > { %v4187_v29 = vadd.f32 %v4171_v17, %v4142_v8 }
 0x33e   : > { %v4203_v42 = vmax.f32 %v4187_v29, 0.0 }
 0x340   : > { %4219 = vst [vmem:[%s7238_s29 + $0x38] sm:$0xff] %v4203_v42 }
 0x341   : > { %v4144_v44 = vpop.f32.mrf.mxu2 }
 0x342   : > { %v4145_v25 = vadd.f32 %v7232_v15, %v4144_v44 }
 0x344   : > { %v4188_v63 = vadd.f32 %v4172_v6, %v4145_v25 }
 0x346   : > { %v4204_v30 = vmax.f32 %v4188_v63, 0.0 }
 0x348   : > { %4220 = vst [vmem:[%s7238_s29 + $0x40] sm:$0xff] %v4204_v30 }
 0x349   : > { %v4146_v27 = vpop.f32.mrf.mxu2 }
 0x34a   : > { %v4147_v35 = vadd.f32 %v7232_v15, %v4146_v27 }
 0x34c   : > { %v4189_v13 = vadd.f32 %v4173_v53, %v4147_v35 }
 0x34e   : > { %v4205_v60 = vmax.f32 %v4189_v13, 0.0 }
 0x350   : > { %4221 = vst [vmem:[%s7238_s29 + $0x48] sm:$0xff] %v4205_v60 }
 0x351   : > { %v4149_v59 = vpop.f32.mrf.mxu2 }
 0x352   : > { %v4150_v10 = vadd.f32 %v7232_v15, %v4149_v59 }
 0x354   : > { %v4190_v41 = vadd.f32 %v4174_v2, %v4150_v10 }
 0x356   : > { %v4206_v36 = vmax.f32 %v4190_v41, 0.0 }
 0x358   : > { %4222 = vst [vmem:[%s7238_s29 + $0x50] sm:$0xff] %v4206_v36 }
 0x359   : > { %v4151_v61 = vpop.f32.mrf.mxu2 }
 0x35a   : > { %v4152_v11 = vadd.f32 %v7232_v15, %v4151_v61 }
 0x35c   : > { %v4191_v43 = vadd.f32 %v4175_v39, %v4152_v11 }
 0x35e   : > { %v4207_v47 = vmax.f32 %v4191_v43, 0.0 }
 0x360   : > { %4223 = vst [vmem:[%s7238_s29 + $0x58] sm:$0xff] %v4207_v47 }
 0x361   : > { %v4154_v23 = vpop.f32.mrf.mxu2 }
 0x362   : > { %v4155_v37 = vadd.f32 %v7232_v15, %v4154_v23 }
 0x364   : > { %v4192_v49 = vadd.f32 %v4176_v0, %v4155_v37 }
 0x366   : > { %v4208_v22 = vmax.f32 %v4192_v49, 0.0 }
 0x368   : > { %4224 = vst [vmem:[%s7238_s29 + $0x60] sm:$0xff] %v4208_v22 }
 0x369   : > { %v4156_v14 = vpop.f32.mrf.mxu2 }
 0x36a   : > { %v4157_v19 = vadd.f32 %v7232_v15, %v4156_v14 }
 0x36c   : > { %v4193_v38 = vadd.f32 %v4177_v28, %v4157_v19 }
 0x36e   : > { %v4209_v9 = vmax.f32 %v4193_v38, 0.0 }
 0x370   : > { %4225 = vst [vmem:[%s7238_s29 + $0x68] sm:$0xff] %v4209_v9 }
 0x371   : > { %v4159_v40 = vpop.f32.mrf.mxu2 }
 0x372   : > { %v4160_v20 = vadd.f32 %v7232_v15, %v4159_v40 }
 0x374   : > { %v4194_v54 = vadd.f32 %v4178_v33, %v4160_v20 }
 0x376   : > { %v4210_v58 = vmax.f32 %v4194_v54, 0.0 }
 0x378   : > { %4226 = vst [vmem:[%s7238_s29 + $0x70] sm:$0xff] %v4210_v58 }
 0x379   : > { %v4161_v48 = vpop.f32.mrf.mxu2 }
 0x37a   : > { %v4162_v24 = vadd.f32 %v7232_v15, %v4161_v48 }
 0x37c   : > { %v4195_v56 = vadd.f32 %v4179_v57, %v4162_v24 }
 0x37e   : > { %v4211_v51 = vmax.f32 %v4195_v56, 0.0 }
 0x380   : > { %4227 = vst [vmem:[%s7238_s29 + $0x78] sm:$0xff] %v4211_v51 }
 0x381   : > { %5774 = shalt.err (!%p5771_p11)
}
 0x382   : > { %s5838_s15 = smov 128   ;;  %s5839_s29 = smov 8  }
 0x383   : > { %5484 = dma.vmem_to_hbm [thread:$0]  (%p5957_p5), %s4242_s14, 2048, %s4244_s20, %s4229_s10, %s5838_s15, %s5838_s15, %s5839_s29  }
 0x384 PF: > { %p5511_p12 = scmp.ge.s32.totalorder %s5821_s24, 2  ;;  %s4258_s9 = sand.u32 1, %s5809_s21  }
 0x385   : > { %s4259_s16 = scalar_lea.sflag [#allocation6], %s4258_s9 }
 0x386   : > { %p5501_p13 = pnand %p5511_p12, %p5910_p6 }
 0x388   : > { %p5502_p0 = pneg %p5501_p13 }
 0x38a   : > { %5804 = dma.done.wait (%p5502_p0), %s4259_s16, 2048  }
 0x38b   : > { %5806 = vsyncadd (%p5502_p0), %s4259_s16, 4294965248  ;;  %p21_p3 = scmp.ge.s32.totalorder %s5941_s7, 6   ;;  %s7370_s21 = smov %s5813_s22 }
 0x38c   : > { %s7371_s22 = smov %s5817_s23  ;;  %s7372_s23 = smov %s5953_s12 }
 0x38d   : > { %s7373_s24 = smov %s5941_s7  ;;  %23 = sbr.rel (!%p21_p3) target bundleno = 7 (0x7), region = 112 }
 0x392   :  { %4265 = vsyncpa [#allocation5], 1 }
 0x393   :  { %4267 = vsyncpa [#allocation5 + $0x1], 1 }
 0x394   :  { %4268 = vsyncpa [#allocation8], 1 }
 0x395   :  { %4269 = vsyncpa [#allocation11], 1 }
 0x396   :  { %4270 = vsyncpa [#allocation6], 1 }
 0x397   :  { %4272 = vsyncpa [#allocation6 + $0x1], 1 }

</bundles_post_ra>
